<compile_context>
chip_gen: v6e
topology: v6e:2x2x1
jax: 0.10.0
libtpu: 0.0.40
codegen_flags: <defaults>
</compile_context>

<pallas_src>
import functools
import math

import jax
import jax.numpy as jnp
from jax.experimental import pallas as pl
from jax.experimental.pallas import tpu as pltpu

LN_EPS = 1e-5  # torch.nn.LayerNorm default


def _layernorm(t, g, b):
    mu = jnp.mean(t, axis=-1, keepdims=True)
    var = jnp.mean((t - mu) ** 2, axis=-1, keepdims=True)
    return (t - mu) * jax.lax.rsqrt(var + LN_EPS) * g + b


# ---------------------------------------------------------------------------
# Pallas kernels
# ---------------------------------------------------------------------------
def transformer_stack_kernel(pad_ref, x_ref,
                             lna_g_ref, lna_b_ref,
                             wq_ref, bq_ref, wk_ref, bk_ref, wv_ref, bv_ref,
                             wo_ref, bo_ref,
                             lnf_g_ref, lnf_b_ref,
                             w1_ref, b1_ref, w2_ref, b2_ref,
                             lnh_g_ref, lnh_b_ref,
                             xo_ref, ko_ref, vo_ref,
                             *, heads, mxu_dtype):
    """One TransformerLayer per grid step; x carried in xo's VMEM block over
    the inner 'layer' grid axis (accumulator pattern).  Final LayerNorm fused
    into the last layer step."""
    layer = pl.program_id(1)
    last_layer = pl.num_programs(1) - 1
    nb, s, d = x_ref.shape
    dh = d // heads
    m = nb * s

    @pl.when(layer == 0)
    def _load_input():
        xo_ref[...] = x_ref[...]

    x = xo_ref[...].reshape(m, d)                       # (nb*s, d): big MXU M

    def mm(a, w):                                       # bf16/f32 MXU, f32 acc
        return jnp.dot(a.astype(mxu_dtype), w.astype(mxu_dtype),
                       preferred_element_type=jnp.float32)

    # ---- pre-attention LayerNorm + q/k/v projections (full-width (D,D)) ----
    a = _layernorm(x, lna_g_ref[0], lna_b_ref[0])
    q = mm(a, wq_ref[0]) + bq_ref[0]
    k = mm(a, wk_ref[0]) + bk_ref[0]
    ko_ref[...] = k.reshape(1, nb, s, d)    # "present" key: lane-dense, ASAP
    v = mm(a, wv_ref[0]) + bv_ref[0]
    vo_ref[...] = v.reshape(1, nb, s, d)    # "present" value: lane-dense, ASAP

    # ---- multi-head attention ----
    # Head split/merge: a single compiler-handled relayout (reshape+transpose)
    # in the MXU dtype, instead of per-head lane slices + stack + lane concat.
    def to_heads(t):                        # (m, d) -> (nb*heads, s, dh)
        return (t.astype(mxu_dtype)
                 .reshape(nb, s, heads, dh)
                 .transpose(0, 2, 1, 3)
                 .reshape(nb * heads, s, dh))

    qh = to_heads(q * (1.0 / math.sqrt(dh)))            # pre-scale q, not scores
    kh = to_heads(k)
    vh = to_heads(v)

    # additive pad bias computed once per step from the (nb, s) pad row
    bias = jnp.broadcast_to(pad_ref[...].reshape(nb, 1, 1, s) * (-10000.0),
                            (nb, heads, 1, s)).reshape(nb * heads, 1, s)

    sc = jnp.einsum('bqd,bkd->bqk', qh, kh,
                    preferred_element_type=jnp.float32) + bias
    sc = sc - jnp.max(sc, axis=-1, keepdims=True)
    e = jnp.exp(sc)                                      # f32 softmax
    p = e * pl.reciprocal(jnp.sum(e, axis=-1, keepdims=True), approx=True)
    o = jnp.einsum('bqk,bkd->bqd', p.astype(mxu_dtype), vh,
                   preferred_element_type=jnp.float32)
    attn = (o.reshape(nb, heads, s, dh)
             .transpose(0, 2, 1, 3)
             .reshape(m, d))                             # merge heads (1 relayout)

    x = x + mm(attn, wo_ref[0]) + bo_ref[0]              # residual 1

    # ---- position-wise feed-forward with Swish (rows = nb*s) ----
    hft = _layernorm(x, lnf_g_ref[0], lnf_b_ref[0])
    ff = mm(hft, w1_ref[0]) + b1_ref[0]
    ff = ff * jax.nn.sigmoid(ff)                         # Swish in f32
    x = x + mm(ff, w2_ref[0]) + b2_ref[0]                # residual 2

    xo_ref[...] = x.reshape(nb, s, d)

    @pl.when(layer == last_layer)
    def _final_ln():
        # fused final LayerNorm: keeps it out of the vocab-tiled head kernel.
        xo_ref[...] = _layernorm(x, lnh_g_ref[...], lnh_b_ref[...]).reshape(nb, s, d)


def head_kernel(x_ref, wt_ref, out_ref, *, mxu_dtype):
    """Tied-embedding logits tile: logits = h @ W_tok^T (LN already applied)."""
    out_ref[...] = jnp.dot(x_ref[...].astype(mxu_dtype), wt_ref[...],
                           preferred_element_type=jnp.float32)


# ---------------------------------------------------------------------------
# Sizing helpers (generation-aware)
# ---------------------------------------------------------------------------
def _vmem_budget_bytes():
    """~3/4 of physical VMEM (96 MiB on 128-MiB chips, 48 MiB on v7x),
    leaving headroom for compiler scratch."""
    try:
        cap = int(pltpu.get_tpu_info().vmem_capacity_bytes)
    except Exception:
        cap = 64 * 1024 * 1024      # conservative fallback (v7x-sized)
    return min((cap * 3) // 4, 112 * 1024 * 1024)


def _pick_batch_block(batch, seq, dims, heads, rate, w_bytes, budget):
    """Largest divisor of `batch` whose per-step footprint fits the budget."""
    # double-buffered per-layer matmul weights (q,k,v,o + w1,w2)
    fixed = 2 * (4 + 2 * rate) * dims * dims * w_bytes
    # rough per-(NB*S)-row f32 liveness: carried x + LN/q/k/v/attn temporaries
    # + FFN hidden (rate*D) + double-buffered k/v present windows + scores.
    per_row = 4 * ((11 + rate) * dims + heads * seq)
    nb = 1
    for cand in range(1, batch + 1):
        if batch % cand == 0 and fixed + cand * seq * per_row <= budget:
            nb = cand
    return nb


def _pick_tile(n, preferred, align):
    """Largest divisor of n that is a multiple of `align` and <= preferred;
    falls back to the full dim (always legal as a block dim)."""
    best = None
    t = align
    while t <= min(n, preferred):
        if n % t == 0:
            best = t
        t += align
    return best if best is not None else n


def _pick_head_tiles(rows, vocab, dims, w_bytes, budget):
    tr_pref, tv_pref = 1024, 2048
    while True:
        tr = _pick_tile(rows, tr_pref, 8)
        tv = _pick_tile(vocab, tv_pref, 128)
        foot = 2 * dims * tv * w_bytes + 2 * tr * tv * 4 + 2 * tr * dims * 4
        if foot <= budget or (tr_pref <= 128 and tv_pref <= 256):
            return tr, tv
        if tv_pref > 256:
            tv_pref //= 2
        else:
            tr_pref //= 2


# ---------------------------------------------------------------------------
# Wrapper
# ---------------------------------------------------------------------------
def run_transformer(tokens, params, *, heads, pad_idx, mxu_dtype=jnp.bfloat16):
    B, S = tokens.shape
    tok_w = params["tok_w"]                     # (V, D)
    pos_w = params["pos_w"]                     # (max_seq, D)
    V, D = tok_w.shape
    L = len(params["layers"])
    assert D % heads == 0, "dims must be divisible by heads"

    w_bytes = jnp.dtype(mxu_dtype).itemsize
    budget = _vmem_budget_bytes()

    # Glue: embedding lookup + pad row (tiny) stay in plain JAX.
    # TODO(synk): embedding gather (jnp.take) has no clean tiled Pallas form here.
    x = jnp.take(tok_w, tokens, axis=0).astype(jnp.float32) + pos_w[:S][None, :, :]
    pad = (tokens == pad_idx).astype(jnp.float32).reshape(B, 1, S)

    # Stack per-layer params along a leading 'layer' axis so a single
    # pallas_call streams them (layer l+1 prefetched while l computes).
    names = ["lna_g", "lna_b", "wq", "bq", "wk", "bk", "wv", "bv",
             "wo", "bo", "lnf_g", "lnf_b", "w1", "b1", "w2", "b2"]
    cast = {"wq", "wk", "wv", "wo", "w1", "w2"}          # matmul weights -> mxu dtype in HBM
    stacked = []
    for nm in names:
        w = jnp.stack([lp[nm] for lp in params["layers"]], axis=0)
        stacked.append(w.astype(mxu_dtype) if nm in cast else w.astype(jnp.float32))

    rate = params["layers"][0]["w1"].shape[1] // D
    NB = _pick_batch_block(B, S, D, heads, rate, w_bytes, budget)
    grid = (B // NB, L)

    def wspec(w):
        nd = w.ndim
        return pl.BlockSpec((1,) + w.shape[1:], lambda b, l: (l,) + (0,) * (nd - 1))

    x_spec = pl.BlockSpec((NB, S, D), lambda b, l: (b, 0, 0))
    pad_spec = pl.BlockSpec((NB, 1, S), lambda b, l: (b, 0, 0))
    xo_spec = pl.BlockSpec((NB, S, D), lambda b, l: (b, 0, 0))
    kv_spec = pl.BlockSpec((1, NB, S, D), lambda b, l: (l, b, 0, 0))
    ln_spec = pl.BlockSpec((1, D), lambda b, l: (0, 0))

    # NOTE(v7x): with 2 TCs the "parallel" batch axis doubles weight-DMA; HBM
    # at 3.2 TB/s normally absorbs it, but re-budget if B//NB per chip is 1-2.
    x_out, k_all, v_all = pl.pallas_call(
        functools.partial(transformer_stack_kernel, heads=heads, mxu_dtype=mxu_dtype),
        grid=grid,
        in_specs=[pad_spec, x_spec] + [wspec(w) for w in stacked] + [ln_spec, ln_spec],
        out_specs=(xo_spec, kv_spec, kv_spec),
        out_shape=(jax.ShapeDtypeStruct((B, S, D), jnp.float32),
                   jax.ShapeDtypeStruct((L, B, S, D), jnp.float32),
                   jax.ShapeDtypeStruct((L, B, S, D), jnp.float32)),
        input_output_aliases={1: 0},                     # embedded input buffer -> x_out
        compiler_params=pltpu.CompilerParams(
            dimension_semantics=("parallel", "arbitrary"),
            vmem_limit_bytes=budget),
    )(pad, x, *stacked,
      params["ln_g"].astype(jnp.float32), params["ln_b"].astype(jnp.float32))

    presents = [(k_all[l], v_all[l]) for l in range(L)]

    # Tied-embedding logits: LN already applied in the stack kernel; the head
    # kernel is a pure (TR,D)@(D,TV) matmul against the pre-transposed weight.
    rows = B * S
    TR, TV = _pick_head_tiles(rows, V, D, w_bytes, budget)
    wt = tok_w.astype(mxu_dtype).T                       # (D, V), transposed once
    logits = pl.pallas_call(
        functools.partial(head_kernel, mxu_dtype=mxu_dtype),
        grid=(rows // TR, V // TV),                      # vocab innermost: x tile stays resident
        in_specs=[pl.BlockSpec((TR, D), lambda r, c: (r, 0)),
                  pl.BlockSpec((D, TV), lambda r, c: (0, c))],
        out_specs=pl.BlockSpec((TR, TV), lambda r, c: (r, c)),
        out_shape=jax.ShapeDtypeStruct((rows, V), jnp.float32),
        compiler_params=pltpu.CompilerParams(
            dimension_semantics=("parallel", "parallel"),
            vmem_limit_bytes=budget),
    )(x_out.reshape(rows, D), wt)
    return logits.reshape(B, S, V), presents


def reference(tokens, params, *, heads, pad_idx):
    """Pure-JAX mirror of the PyTorch forward (eval mode), for verification."""
    B, S = tokens.shape
    tok_w, pos_w = params["tok_w"], params["pos_w"]
    D = tok_w.shape[1]
    dh = D // heads
    x = jnp.take(tok_w, tokens, axis=0) + pos_w[:S][None]
    mask = jnp.broadcast_to((tokens == pad_idx)[:, None, :], (B, S, S)).astype(jnp.float32)
    presents = []
    for lp in params["layers"]:
        a = _layernorm(x, lp["lna_g"], lp["lna_b"])
        q = a @ lp["wq"] + lp["bq"]
        k = a @ lp["wk"] + lp["bk"]
        v = a @ lp["wv"] + lp["bv"]
        presents.append((k, v))
        qh = q.reshape(B, S, heads, dh).transpose(0, 2, 1, 3)
        kh = k.reshape(B, S, heads, dh).transpose(0, 2, 1, 3)
        vh = v.reshape(B, S, heads, dh).transpose(0, 2, 1, 3)
        s = jnp.einsum("bhqd,bhkd->bhqk", qh, kh) / math.sqrt(dh)
        s = s + mask[:, None, :, :] * (-10000.0)
        p = jax.nn.softmax(s, axis=-1)
        o = jnp.einsum("bhqk,bhkd->bhqd", p, vh).transpose(0, 2, 1, 3).reshape(B, S, D)
        x = x + (o @ lp["wo"] + lp["bo"])
        hft = _layernorm(x, lp["lnf_g"], lp["lnf_b"])
        ff = hft @ lp["w1"] + lp["b1"]
        ff = ff * jax.nn.sigmoid(ff)
        x = x + (ff @ lp["w2"] + lp["b2"])
    h = _layernorm(x, params["ln_g"], params["ln_b"])
    return jnp.einsum("bsd,vd->bsv", h, tok_w), presents


def init_params(key, *, layers, words, seq_len, dims, rate):
    k_tok, k_pos, *k_layers = jax.random.split(key, 2 + layers)
    nrm = lambda k, shape: 0.02 * jax.random.normal(k, shape, jnp.float32)
    p = {
        "tok_w": nrm(k_tok, (words, dims)),
        "pos_w": nrm(k_pos, (seq_len, dims)),
        "ln_g": jnp.ones((1, dims), jnp.float32),
        "ln_b": jnp.zeros((1, dims), jnp.float32),
        "layers": [],
    }
    for lk in k_layers:
        ks = jax.random.split(lk, 12)
        p["layers"].append({
            "lna_g": jnp.ones((1, dims), jnp.float32),
            "lna_b": jnp.zeros((1, dims), jnp.float32),
            "wq": nrm(ks[0], (dims, dims)),        "bq": nrm(ks[1], (1, dims)),
            "wk": nrm(ks[2], (dims, dims)),        "bk": nrm(ks[3], (1, dims)),
            "wv": nrm(ks[4], (dims, dims)),        "bv": nrm(ks[5], (1, dims)),
            "wo": nrm(ks[6], (dims, dims)),        "bo": nrm(ks[7], (1, dims)),
            "lnf_g": jnp.ones((1, dims), jnp.float32),
            "lnf_b": jnp.zeros((1, dims), jnp.float32),
            "w1": nrm(ks[8], (dims, dims * rate)), "b1": nrm(ks[9], (1, dims * rate)),
            "w2": nrm(ks[10], (dims * rate, dims)), "b2": nrm(ks[11], (1, dims)),
        })
    return p


if __name__ == "__main__":
    LAYERS, PAD_IDX, WORDS, SEQ_LEN, HEADS, DIMS, RATE = 2, 0, 128, 16, 4, 128, 4
    B, S = 2, 8

    key = jax.random.PRNGKey(0)
    pkey, tkey = jax.random.split(key)
    params = init_params(pkey, layers=LAYERS, words=WORDS, seq_len=SEQ_LEN,
                         dims=DIMS, rate=RATE)
    tokens = jax.random.randint(tkey, (B, S), 1, WORDS, dtype=jnp.int32)
    tokens = tokens.at[0, -2:].set(PAD_IDX)     # exercise pad masking

    ref_logits, ref_presents = reference(tokens, params, heads=HEADS, pad_idx=PAD_IDX)

    # f32 MXU path (tight check against the pure-JAX reference)
    logits, presents = run_transformer(tokens, params, heads=HEADS, pad_idx=PAD_IDX,
                                       mxu_dtype=jnp.float32)
    logits = jax.block_until_ready(logits)
    assert logits.shape == (B, S, WORDS)
    assert len(presents) == LAYERS and presents[0][0].shape == (B, S, DIMS)
    max_err = float(jnp.max(jnp.abs(logits - ref_logits)))
    assert jnp.allclose(logits, ref_logits, atol=2e-2, rtol=2e-2), max_err
    for (k_p, v_p), (rk, rv) in zip(presents, ref_presents):
        assert jnp.allclose(k_p, rk, atol=1e-2, rtol=1e-2)
        assert jnp.allclose(v_p, rv, atol=1e-2, rtol=1e-2)

    # bf16 weights / bf16 MXU inputs with f32 accumulation (the default fast path)
    logits_bf16, _ = run_transformer(tokens, params, heads=HEADS, pad_idx=PAD_IDX,
                                     mxu_dtype=jnp.bfloat16)
    logits_bf16 = jax.block_until_ready(logits_bf16)
    max_err_bf16 = float(jnp.max(jnp.abs(logits_bf16 - ref_logits)))
    assert jnp.allclose(logits_bf16, ref_logits, atol=6e-2, rtol=6e-2), max_err_bf16

    print("KERNEL_OK")
</pallas_src>

<mosaic_0001>
module attributes {stable_mosaic.version = 11 : i64} {
  func.func @transformer_stack_kernel(%arg0: i32, %arg1: i32, %arg2: memref<2x1x8xf32, #tpu.memory_space<vmem>>, %arg3: memref<2x8x128xf32, #tpu.memory_space<vmem>>, %arg4: memref<1x1x128xf32, #tpu.memory_space<vmem>>, %arg5: memref<1x1x128xf32, #tpu.memory_space<vmem>>, %arg6: memref<1x128x128xf32, #tpu.memory_space<vmem>>, %arg7: memref<1x1x128xf32, #tpu.memory_space<vmem>>, %arg8: memref<1x128x128xf32, #tpu.memory_space<vmem>>, %arg9: memref<1x1x128xf32, #tpu.memory_space<vmem>>, %arg10: memref<1x128x128xf32, #tpu.memory_space<vmem>>, %arg11: memref<1x1x128xf32, #tpu.memory_space<vmem>>, %arg12: memref<1x128x128xf32, #tpu.memory_space<vmem>>, %arg13: memref<1x1x128xf32, #tpu.memory_space<vmem>>, %arg14: memref<1x1x128xf32, #tpu.memory_space<vmem>>, %arg15: memref<1x1x128xf32, #tpu.memory_space<vmem>>, %arg16: memref<1x128x512xf32, #tpu.memory_space<vmem>>, %arg17: memref<1x1x512xf32, #tpu.memory_space<vmem>>, %arg18: memref<1x512x128xf32, #tpu.memory_space<vmem>>, %arg19: memref<1x1x128xf32, #tpu.memory_space<vmem>>, %arg20: memref<1x128xf32, #tpu.memory_space<vmem>>, %arg21: memref<1x128xf32, #tpu.memory_space<vmem>>, %arg22: memref<2x8x128xf32, #tpu.memory_space<vmem>>, %arg23: memref<1x2x8x128xf32, #tpu.memory_space<vmem>>, %arg24: memref<1x2x8x128xf32, #tpu.memory_space<vmem>>) attributes {dimension_semantics = [#tpu.dimension_semantics<parallel>, #tpu.dimension_semantics<arbitrary>], iteration_bounds = array<i64: 1, 2>, scalar_prefetch = 0 : i64, scratch_operands = 0 : i64, tpu.core_type = #tpu.core_type<tc>, window_params = [{transform_indices = @transform_0, window_bounds = array<i64: 2, 1, 8>}, {transform_indices = @transform_1, window_bounds = array<i64: 2, 8, 128>}, {transform_indices = @transform_2, window_bounds = array<i64: 1, 1, 128>}, {transform_indices = @transform_3, window_bounds = array<i64: 1, 1, 128>}, {transform_indices = @transform_4, window_bounds = array<i64: 1, 128, 128>}, {transform_indices = @transform_5, window_bounds = array<i64: 1, 1, 128>}, {transform_indices = @transform_6, window_bounds = array<i64: 1, 128, 128>}, {transform_indices = @transform_7, window_bounds = array<i64: 1, 1, 128>}, {transform_indices = @transform_8, window_bounds = array<i64: 1, 128, 128>}, {transform_indices = @transform_9, window_bounds = array<i64: 1, 1, 128>}, {transform_indices = @transform_10, window_bounds = array<i64: 1, 128, 128>}, {transform_indices = @transform_11, window_bounds = array<i64: 1, 1, 128>}, {transform_indices = @transform_12, window_bounds = array<i64: 1, 1, 128>}, {transform_indices = @transform_13, window_bounds = array<i64: 1, 1, 128>}, {transform_indices = @transform_14, window_bounds = array<i64: 1, 128, 512>}, {transform_indices = @transform_15, window_bounds = array<i64: 1, 1, 512>}, {transform_indices = @transform_16, window_bounds = array<i64: 1, 512, 128>}, {transform_indices = @transform_17, window_bounds = array<i64: 1, 1, 128>}, {pipeline_mode = #tpu.pipeline_mode<synchronous>, transform_indices = @transform_18, window_bounds = array<i64: 1, 128>}, {pipeline_mode = #tpu.pipeline_mode<synchronous>, transform_indices = @transform_19, window_bounds = array<i64: 1, 128>}, {transform_indices = @transform_20, window_bounds = array<i64: 2, 8, 128>}, {transform_indices = @transform_21, window_bounds = array<i64: 1, 2, 8, 128>}, {transform_indices = @transform_22, window_bounds = array<i64: 1, 2, 8, 128>}]} {
    %c0_i32 = arith.constant 0 : i32
    %0 = arith.cmpi eq, %arg1, %c0_i32 : i32
    %1 = arith.extui %0 : i1 to i32
    %c0_i32_0 = arith.constant 0 : i32
    %2 = arith.cmpi ne, %1, %c0_i32_0 : i32
    scf.if %2 {
      %c0_88 = arith.constant 0 : index
      %c0_89 = arith.constant 0 : index
      %c0_90 = arith.constant 0 : index
      %151 = vector.load %arg3[%c0_88, %c0_89, %c0_90] : memref<2x8x128xf32, #tpu.memory_space<vmem>>, vector<2x8x128xf32>
      %c0_91 = arith.constant 0 : index
      %c0_92 = arith.constant 0 : index
      %c0_93 = arith.constant 0 : index
      %152 = vector.load %arg22[%c0_91, %c0_92, %c0_93] : memref<2x8x128xf32, #tpu.memory_space<vmem>>, vector<2x8x128xf32>
      tpu.vector_store %arg22[%c0_91, %c0_92, %c0_93], %151 {strides = array<i32>} : memref<2x8x128xf32, #tpu.memory_space<vmem>>, vector<2x8x128xf32>,
    } else {
    }
    %c0 = arith.constant 0 : index
    %c0_1 = arith.constant 0 : index
    %c0_2 = arith.constant 0 : index
    %3 = vector.load %arg22[%c0, %c0_1, %c0_2] : memref<2x8x128xf32, #tpu.memory_space<vmem>>, vector<2x8x128xf32>
    %4 = vector.shape_cast %3 : vector<2x8x128xf32> to vector<16x128xf32>
    %c0_3 = arith.constant 0 : index
    %c0_4 = arith.constant 0 : index
    %c0_5 = arith.constant 0 : index
    %5 = vector.load %arg4[%c0_3, %c0_4, %c0_5] : memref<1x1x128xf32, #tpu.memory_space<vmem>>, vector<1x1x128xf32>
    %6 = vector.shape_cast %5 : vector<1x1x128xf32> to vector<1x128xf32>
    %c0_6 = arith.constant 0 : index
    %c0_7 = arith.constant 0 : index
    %c0_8 = arith.constant 0 : index
    %7 = vector.load %arg5[%c0_6, %c0_7, %c0_8] : memref<1x1x128xf32, #tpu.memory_space<vmem>>, vector<1x1x128xf32>
    %8 = vector.shape_cast %7 : vector<1x1x128xf32> to vector<1x128xf32>
    %cst = arith.constant dense<0.000000e+00> : vector<16xf32>
    %9 = vector.multi_reduction <add>, %4, %cst [1] : vector<16x128xf32> to vector<16xf32>
    %10 = vector.shape_cast %9 : vector<16xf32> to vector<16x1xf32>
    %cst_9 = arith.constant 1.280000e+02 : f32
    %11 = vector.broadcast %cst_9 : f32 to vector<16x1xf32>
    %12 = arith.divf %10, %11 : vector<16x1xf32>
    %13 = vector.broadcast %12 : vector<16x1xf32> to vector<16x128xf32>
    %14 = arith.subf %4, %13 : vector<16x128xf32>
    %15 = arith.mulf %14, %14 : vector<16x128xf32>
    %cst_10 = arith.constant dense<0.000000e+00> : vector<16xf32>
    %16 = vector.multi_reduction <add>, %15, %cst_10 [1] : vector<16x128xf32> to vector<16xf32>
    %17 = vector.shape_cast %16 : vector<16xf32> to vector<16x1xf32>
    %cst_11 = arith.constant 1.280000e+02 : f32
    %18 = vector.broadcast %cst_11 : f32 to vector<16x1xf32>
    %19 = arith.divf %17, %18 : vector<16x1xf32>
    %20 = vector.broadcast %12 : vector<16x1xf32> to vector<16x128xf32>
    %21 = arith.subf %4, %20 : vector<16x128xf32>
    %cst_12 = arith.constant 9.99999974E-6 : f32
    %22 = vector.broadcast %cst_12 : f32 to vector<16x1xf32>
    %23 = arith.addf %19, %22 : vector<16x1xf32>
    %24 = math.rsqrt %23 : vector<16x1xf32>
    %25 = vector.broadcast %24 : vector<16x1xf32> to vector<16x128xf32>
    %26 = arith.mulf %21, %25 : vector<16x128xf32>
    %27 = vector.broadcast %6 : vector<1x128xf32> to vector<16x128xf32>
    %28 = arith.mulf %26, %27 : vector<16x128xf32>
    %29 = vector.broadcast %8 : vector<1x128xf32> to vector<16x128xf32>
    %30 = arith.addf %28, %29 : vector<16x128xf32>
    %c0_13 = arith.constant 0 : index
    %c0_14 = arith.constant 0 : index
    %c0_15 = arith.constant 0 : index
    %31 = vector.load %arg6[%c0_13, %c0_14, %c0_15] : memref<1x128x128xf32, #tpu.memory_space<vmem>>, vector<1x128x128xf32>
    %32 = vector.shape_cast %31 : vector<1x128x128xf32> to vector<128x128xf32>
    %cst_16 = arith.constant dense<0.000000e+00> : vector<16x128xf32>
    %33 = tpu.matmul %30, %32, %cst_16 {dimension_numbers = #tpu.dot_dimension_numbers<[1], [0], [0], [1], [0, 0, 1, 1], [], []>} : vector<16x128xf32>, vector<128x128xf32>, vector<16x128xf32> -> vector<16x128xf32>
    %c0_17 = arith.constant 0 : index
    %c0_18 = arith.constant 0 : index
    %c0_19 = arith.constant 0 : index
    %34 = vector.load %arg7[%c0_17, %c0_18, %c0_19] : memref<1x1x128xf32, #tpu.memory_space<vmem>>, vector<1x1x128xf32>
    %35 = vector.shape_cast %34 : vector<1x1x128xf32> to vector<1x128xf32>
    %36 = vector.broadcast %35 : vector<1x128xf32> to vector<16x128xf32>
    %37 = arith.addf %33, %36 : vector<16x128xf32>
    %c0_20 = arith.constant 0 : index
    %c0_21 = arith.constant 0 : index
    %c0_22 = arith.constant 0 : index
    %38 = vector.load %arg8[%c0_20, %c0_21, %c0_22] : memref<1x128x128xf32, #tpu.memory_space<vmem>>, vector<1x128x128xf32>
    %39 = vector.shape_cast %38 : vector<1x128x128xf32> to vector<128x128xf32>
    %cst_23 = arith.constant dense<0.000000e+00> : vector<16x128xf32>
    %40 = tpu.matmul %30, %39, %cst_23 {dimension_numbers = #tpu.dot_dimension_numbers<[1], [0], [0], [1], [0, 0, 1, 1], [], []>} : vector<16x128xf32>, vector<128x128xf32>, vector<16x128xf32> -> vector<16x128xf32>
    %c0_24 = arith.constant 0 : index
    %c0_25 = arith.constant 0 : index
    %c0_26 = arith.constant 0 : index
    %41 = vector.load %arg9[%c0_24, %c0_25, %c0_26] : memref<1x1x128xf32, #tpu.memory_space<vmem>>, vector<1x1x128xf32>
    %42 = vector.shape_cast %41 : vector<1x1x128xf32> to vector<1x128xf32>
    %43 = vector.broadcast %42 : vector<1x128xf32> to vector<16x128xf32>
    %44 = arith.addf %40, %43 : vector<16x128xf32>
    %45 = vector.shape_cast %44 : vector<16x128xf32> to vector<1x2x8x128xf32>
    %c0_27 = arith.constant 0 : index
    %c0_28 = arith.constant 0 : index
    %c0_29 = arith.constant 0 : index
    %c0_30 = arith.constant 0 : index
    %46 = vector.load %arg23[%c0_27, %c0_28, %c0_29, %c0_30] : memref<1x2x8x128xf32, #tpu.memory_space<vmem>>, vector<1x2x8x128xf32>
    tpu.vector_store %arg23[%c0_27, %c0_28, %c0_29, %c0_30], %45 {strides = array<i32>} : memref<1x2x8x128xf32, #tpu.memory_space<vmem>>, vector<1x2x8x128xf32>,
    %c0_31 = arith.constant 0 : index
    %c0_32 = arith.constant 0 : index
    %c0_33 = arith.constant 0 : index
    %47 = vector.load %arg10[%c0_31, %c0_32, %c0_33] : memref<1x128x128xf32, #tpu.memory_space<vmem>>, vector<1x128x128xf32>
    %48 = vector.shape_cast %47 : vector<1x128x128xf32> to vector<128x128xf32>
    %cst_34 = arith.constant dense<0.000000e+00> : vector<16x128xf32>
    %49 = tpu.matmul %30, %48, %cst_34 {dimension_numbers = #tpu.dot_dimension_numbers<[1], [0], [0], [1], [0, 0, 1, 1], [], []>} : vector<16x128xf32>, vector<128x128xf32>, vector<16x128xf32> -> vector<16x128xf32>
    %c0_35 = arith.constant 0 : index
    %c0_36 = arith.constant 0 : index
    %c0_37 = arith.constant 0 : index
    %50 = vector.load %arg11[%c0_35, %c0_36, %c0_37] : memref<1x1x128xf32, #tpu.memory_space<vmem>>, vector<1x1x128xf32>
    %51 = vector.shape_cast %50 : vector<1x1x128xf32> to vector<1x128xf32>
    %52 = vector.broadcast %51 : vector<1x128xf32> to vector<16x128xf32>
    %53 = arith.addf %49, %52 : vector<16x128xf32>
    %54 = vector.shape_cast %53 : vector<16x128xf32> to vector<1x2x8x128xf32>
    %c0_38 = arith.constant 0 : index
    %c0_39 = arith.constant 0 : index
    %c0_40 = arith.constant 0 : index
    %c0_41 = arith.constant 0 : index
    %55 = vector.load %arg24[%c0_38, %c0_39, %c0_40, %c0_41] : memref<1x2x8x128xf32, #tpu.memory_space<vmem>>, vector<1x2x8x128xf32>
    tpu.vector_store %arg24[%c0_38, %c0_39, %c0_40, %c0_41], %54 {strides = array<i32>} : memref<1x2x8x128xf32, #tpu.memory_space<vmem>>, vector<1x2x8x128xf32>,
    %cst_42 = arith.constant 0.176776692 : f32
    %56 = vector.broadcast %cst_42 : f32 to vector<16x128xf32>
    %57 = arith.mulf %37, %56 : vector<16x128xf32>
    %58 = vector.shape_cast %57 : vector<16x128xf32> to vector<2x8x4x32xf32>
    %59 = tpu.transpose %58, [0, 2, 1, 3] : vector<2x8x4x32xf32> -> vector<2x4x8x32xf32>
    %60 = vector.shape_cast %59 : vector<2x4x8x32xf32> to vector<8x8x32xf32>
    %61 = vector.shape_cast %44 : vector<16x128xf32> to vector<2x8x4x32xf32>
    %62 = tpu.transpose %61, [0, 2, 1, 3] : vector<2x8x4x32xf32> -> vector<2x4x8x32xf32>
    %63 = vector.shape_cast %62 : vector<2x4x8x32xf32> to vector<8x8x32xf32>
    %64 = vector.shape_cast %53 : vector<16x128xf32> to vector<2x8x4x32xf32>
    %65 = tpu.transpose %64, [0, 2, 1, 3] : vector<2x8x4x32xf32> -> vector<2x4x8x32xf32>
    %66 = vector.shape_cast %65 : vector<2x4x8x32xf32> to vector<8x8x32xf32>
    %c0_43 = arith.constant 0 : index
    %c0_44 = arith.constant 0 : index
    %c0_45 = arith.constant 0 : index
    %67 = vector.load %arg2[%c0_43, %c0_44, %c0_45] : memref<2x1x8xf32, #tpu.memory_space<vmem>>, vector<2x1x8xf32>
    %68 = vector.shape_cast %67 : vector<2x1x8xf32> to vector<2x1x1x8xf32>
    %cst_46 = arith.constant -1.000000e+04 : f32
    %69 = vector.broadcast %cst_46 : f32 to vector<2x1x1x8xf32>
    %70 = arith.mulf %68, %69 : vector<2x1x1x8xf32>
    %71 = vector.shape_cast %70 : vector<2x1x1x8xf32> to vector<2x1x1x8xf32>
    %72 = vector.broadcast %71 : vector<2x1x1x8xf32> to vector<2x4x1x8xf32>
    %73 = vector.shape_cast %72 : vector<2x4x1x8xf32> to vector<8x1x8xf32>
    "tpu.trace_start"() <{level = 10 : i32, message = "bqd,bkd->bqk"}> : () -> ()
    %cst_47 = arith.constant dense<0.000000e+00> : vector<8x8x8xf32>
    %74 = tpu.matmul %60, %63, %cst_47 {dimension_numbers = #tpu.dot_dimension_numbers<[2], [2], [1], [1], [0, 0, 0, 1, 1, 1], [0], [0]>} : vector<8x8x32xf32>, vector<8x8x32xf32>, vector<8x8x8xf32> -> vector<8x8x8xf32>
    "tpu.trace_stop"() : () -> ()
    %75 = vector.broadcast %73 : vector<8x1x8xf32> to vector<8x8x8xf32>
    %76 = arith.addf %74, %75 : vector<8x8x8xf32>
    %cst_48 = arith.constant dense<0xFF800000> : vector<8x8xf32>
    %77 = vector.multi_reduction <maximumf>, %76, %cst_48 [2] : vector<8x8x8xf32> to vector<8x8xf32>
    %78 = vector.shape_cast %77 : vector<8x8xf32> to vector<8x8x1xf32>
    %79 = vector.broadcast %78 : vector<8x8x1xf32> to vector<8x8x8xf32>
    %80 = arith.subf %76, %79 : vector<8x8x8xf32>
    %81 = math.exp %80 : vector<8x8x8xf32>
    %cst_49 = arith.constant dense<0.000000e+00> : vector<8x8xf32>
    %82 = vector.multi_reduction <add>, %81, %cst_49 [2] : vector<8x8x8xf32> to vector<8x8xf32>
    %83 = vector.shape_cast %82 : vector<8x8xf32> to vector<8x8x1xf32>
    %84 = tpu.reciprocal %83 {approx = true} : vector<8x8x1xf32> -> vector<8x8x1xf32>
    %85 = vector.broadcast %84 : vector<8x8x1xf32> to vector<8x8x8xf32>
    %86 = arith.mulf %81, %85 : vector<8x8x8xf32>
    "tpu.trace_start"() <{level = 10 : i32, message = "bqk,bkd->bqd"}> : () -> ()
    %cst_50 = arith.constant dense<0.000000e+00> : vector<8x8x32xf32>
    %87 = tpu.matmul %86, %66, %cst_50 {dimension_numbers = #tpu.dot_dimension_numbers<[2], [1], [1], [2], [0, 0, 0, 1, 1, 2], [0], [0]>} : vector<8x8x8xf32>, vector<8x8x32xf32>, vector<8x8x32xf32> -> vector<8x8x32xf32>
    "tpu.trace_stop"() : () -> ()
    %88 = vector.shape_cast %87 : vector<8x8x32xf32> to vector<2x4x8x32xf32>
    %89 = tpu.transpose %88, [0, 2, 1, 3] : vector<2x4x8x32xf32> -> vector<2x8x4x32xf32>
    %90 = vector.shape_cast %89 : vector<2x8x4x32xf32> to vector<16x128xf32>
    %c0_51 = arith.constant 0 : index
    %c0_52 = arith.constant 0 : index
    %c0_53 = arith.constant 0 : index
    %91 = vector.load %arg12[%c0_51, %c0_52, %c0_53] : memref<1x128x128xf32, #tpu.memory_space<vmem>>, vector<1x128x128xf32>
    %92 = vector.shape_cast %91 : vector<1x128x128xf32> to vector<128x128xf32>
    %cst_54 = arith.constant dense<0.000000e+00> : vector<16x128xf32>
    %93 = tpu.matmul %90, %92, %cst_54 {dimension_numbers = #tpu.dot_dimension_numbers<[1], [0], [0], [1], [0, 0, 1, 1], [], []>} : vector<16x128xf32>, vector<128x128xf32>, vector<16x128xf32> -> vector<16x128xf32>
    %94 = arith.addf %4, %93 : vector<16x128xf32>
    %c0_55 = arith.constant 0 : index
    %c0_56 = arith.constant 0 : index
    %c0_57 = arith.constant 0 : index
    %95 = vector.load %arg13[%c0_55, %c0_56, %c0_57] : memref<1x1x128xf32, #tpu.memory_space<vmem>>, vector<1x1x128xf32>
    %96 = vector.shape_cast %95 : vector<1x1x128xf32> to vector<1x128xf32>
    %97 = vector.broadcast %96 : vector<1x128xf32> to vector<16x128xf32>
    %98 = arith.addf %94, %97 : vector<16x128xf32>
    %c0_58 = arith.constant 0 : index
    %c0_59 = arith.constant 0 : index
    %c0_60 = arith.constant 0 : index
    %99 = vector.load %arg14[%c0_58, %c0_59, %c0_60] : memref<1x1x128xf32, #tpu.memory_space<vmem>>, vector<1x1x128xf32>
    %100 = vector.shape_cast %99 : vector<1x1x128xf32> to vector<1x128xf32>
    %c0_61 = arith.constant 0 : index
    %c0_62 = arith.constant 0 : index
    %c0_63 = arith.constant 0 : index
    %101 = vector.load %arg15[%c0_61, %c0_62, %c0_63] : memref<1x1x128xf32, #tpu.memory_space<vmem>>, vector<1x1x128xf32>
    %102 = vector.shape_cast %101 : vector<1x1x128xf32> to vector<1x128xf32>
    %cst_64 = arith.constant dense<0.000000e+00> : vector<16xf32>
    %103 = vector.multi_reduction <add>, %98, %cst_64 [1] : vector<16x128xf32> to vector<16xf32>
    %104 = vector.shape_cast %103 : vector<16xf32> to vector<16x1xf32>
    %cst_65 = arith.constant 1.280000e+02 : f32
    %105 = vector.broadcast %cst_65 : f32 to vector<16x1xf32>
    %106 = arith.divf %104, %105 : vector<16x1xf32>
    %107 = vector.broadcast %106 : vector<16x1xf32> to vector<16x128xf32>
    %108 = arith.subf %98, %107 : vector<16x128xf32>
    %109 = arith.mulf %108, %108 : vector<16x128xf32>
    %cst_66 = arith.constant dense<0.000000e+00> : vector<16xf32>
    %110 = vector.multi_reduction <add>, %109, %cst_66 [1] : vector<16x128xf32> to vector<16xf32>
    %111 = vector.shape_cast %110 : vector<16xf32> to vector<16x1xf32>
    %cst_67 = arith.constant 1.280000e+02 : f32
    %112 = vector.broadcast %cst_67 : f32 to vector<16x1xf32>
    %113 = arith.divf %111, %112 : vector<16x1xf32>
    %114 = vector.broadcast %106 : vector<16x1xf32> to vector<16x128xf32>
    %115 = arith.subf %98, %114 : vector<16x128xf32>
    %cst_68 = arith.constant 9.99999974E-6 : f32
    %116 = vector.broadcast %cst_68 : f32 to vector<16x1xf32>
    %117 = arith.addf %113, %116 : vector<16x1xf32>
    %118 = math.rsqrt %117 : vector<16x1xf32>
    %119 = vector.broadcast %118 : vector<16x1xf32> to vector<16x128xf32>
    %120 = arith.mulf %115, %119 : vector<16x128xf32>
    %121 = vector.broadcast %100 : vector<1x128xf32> to vector<16x128xf32>
    %122 = arith.mulf %120, %121 : vector<16x128xf32>
    %123 = vector.broadcast %102 : vector<1x128xf32> to vector<16x128xf32>
    %124 = arith.addf %122, %123 : vector<16x128xf32>
    %c0_69 = arith.constant 0 : index
    %c0_70 = arith.constant 0 : index
    %c0_71 = arith.constant 0 : index
    %125 = vector.load %arg16[%c0_69, %c0_70, %c0_71] : memref<1x128x512xf32, #tpu.memory_space<vmem>>, vector<1x128x512xf32>
    %126 = vector.shape_cast %125 : vector<1x128x512xf32> to vector<128x512xf32>
    %cst_72 = arith.constant dense<0.000000e+00> : vector<16x512xf32>
    %127 = tpu.matmul %124, %126, %cst_72 {dimension_numbers = #tpu.dot_dimension_numbers<[1], [0], [0], [1], [0, 0, 1, 1], [], []>} : vector<16x128xf32>, vector<128x512xf32>, vector<16x512xf32> -> vector<16x512xf32>
    %c0_73 = arith.constant 0 : index
    %c0_74 = arith.constant 0 : index
    %c0_75 = arith.constant 0 : index
    %128 = vector.load %arg17[%c0_73, %c0_74, %c0_75] : memref<1x1x512xf32, #tpu.memory_space<vmem>>, vector<1x1x512xf32>
    %129 = vector.shape_cast %128 : vector<1x1x512xf32> to vector<1x512xf32>
    %130 = vector.broadcast %129 : vector<1x512xf32> to vector<16x512xf32>
    %131 = arith.addf %127, %130 : vector<16x512xf32>
    %132 = arith.negf %131 : vector<16x512xf32>
    %133 = math.exp %132 : vector<16x512xf32>
    %cst_76 = arith.constant 1.000000e+00 : f32
    %134 = vector.broadcast %cst_76 : f32 to vector<16x512xf32>
    %135 = arith.addf %134, %133 : vector<16x512xf32>
    %136 = arith.divf %134, %135 : vector<16x512xf32>
    %137 = arith.mulf %131, %136 : vector<16x512xf32>
    %c0_77 = arith.constant 0 : index
    %c0_78 = arith.constant 0 : index
    %c0_79 = arith.constant 0 : index
    %138 = vector.load %arg18[%c0_77, %c0_78, %c0_79] : memref<1x512x128xf32, #tpu.memory_space<vmem>>, vector<1x512x128xf32>
    %139 = vector.shape_cast %138 : vector<1x512x128xf32> to vector<512x128xf32>
    %cst_80 = arith.constant dense<0.000000e+00> : vector<16x128xf32>
    %140 = tpu.matmul %137, %139, %cst_80 {dimension_numbers = #tpu.dot_dimension_numbers<[1], [0], [0], [1], [0, 0, 1, 1], [], []>} : vector<16x512xf32>, vector<512x128xf32>, vector<16x128xf32> -> vector<16x128xf32>
    %141 = arith.addf %98, %140 : vector<16x128xf32>
    %c0_81 = arith.constant 0 : index
    %c0_82 = arith.constant 0 : index
    %c0_83 = arith.constant 0 : index
    %142 = vector.load %arg19[%c0_81, %c0_82, %c0_83] : memref<1x1x128xf32, #tpu.memory_space<vmem>>, vector<1x1x128xf32>
    %143 = vector.shape_cast %142 : vector<1x1x128xf32> to vector<1x128xf32>
    %144 = vector.broadcast %143 : vector<1x128xf32> to vector<16x128xf32>
    %145 = arith.addf %141, %144 : vector<16x128xf32>
    %146 = vector.shape_cast %145 : vector<16x128xf32> to vector<2x8x128xf32>
    %c0_84 = arith.constant 0 : index
    %c0_85 = arith.constant 0 : index
    %c0_86 = arith.constant 0 : index
    %147 = vector.load %arg22[%c0_84, %c0_85, %c0_86] : memref<2x8x128xf32, #tpu.memory_space<vmem>>, vector<2x8x128xf32>
    tpu.vector_store %arg22[%c0_84, %c0_85, %c0_86], %146 {strides = array<i32>} : memref<2x8x128xf32, #tpu.memory_space<vmem>>, vector<2x8x128xf32>,
    %c1_i32 = arith.constant 1 : i32
    %148 = arith.cmpi eq, %arg1, %c1_i32 : i32
    %149 = arith.extui %148 : i1 to i32
    %c0_i32_87 = arith.constant 0 : i32
    %150 = arith.cmpi ne, %149, %c0_i32_87 : i32
    scf.if %150 {
      %c0_88 = arith.constant 0 : index
      %c0_89 = arith.constant 0 : index
      %151 = vector.load %arg20[%c0_88, %c0_89] : memref<1x128xf32, #tpu.memory_space<vmem>>, vector<1x128xf32>
      %c0_90 = arith.constant 0 : index
      %c0_91 = arith.constant 0 : index
      %152 = vector.load %arg21[%c0_90, %c0_91] : memref<1x128xf32, #tpu.memory_space<vmem>>, vector<1x128xf32>
      %cst_92 = arith.constant dense<0.000000e+00> : vector<16xf32>
      %153 = vector.multi_reduction <add>, %145, %cst_92 [1] : vector<16x128xf32> to vector<16xf32>
      %154 = vector.shape_cast %153 : vector<16xf32> to vector<16x1xf32>
      %cst_93 = arith.constant 1.280000e+02 : f32
      %155 = vector.broadcast %cst_93 : f32 to vector<16x1xf32>
      %156 = arith.divf %154, %155 : vector<16x1xf32>
      %157 = vector.broadcast %156 : vector<16x1xf32> to vector<16x128xf32>
      %158 = arith.subf %145, %157 : vector<16x128xf32>
      %159 = arith.mulf %158, %158 : vector<16x128xf32>
      %cst_94 = arith.constant dense<0.000000e+00> : vector<16xf32>
      %160 = vector.multi_reduction <add>, %159, %cst_94 [1] : vector<16x128xf32> to vector<16xf32>
      %161 = vector.shape_cast %160 : vector<16xf32> to vector<16x1xf32>
      %cst_95 = arith.constant 1.280000e+02 : f32
      %162 = vector.broadcast %cst_95 : f32 to vector<16x1xf32>
      %163 = arith.divf %161, %162 : vector<16x1xf32>
      %164 = vector.broadcast %156 : vector<16x1xf32> to vector<16x128xf32>
      %165 = arith.subf %145, %164 : vector<16x128xf32>
      %cst_96 = arith.constant 9.99999974E-6 : f32
      %166 = vector.broadcast %cst_96 : f32 to vector<16x1xf32>
      %167 = arith.addf %163, %166 : vector<16x1xf32>
      %168 = math.rsqrt %167 : vector<16x1xf32>
      %169 = vector.broadcast %168 : vector<16x1xf32> to vector<16x128xf32>
      %170 = arith.mulf %165, %169 : vector<16x128xf32>
      %171 = vector.broadcast %151 : vector<1x128xf32> to vector<16x128xf32>
      %172 = arith.mulf %170, %171 : vector<16x128xf32>
      %173 = vector.broadcast %152 : vector<1x128xf32> to vector<16x128xf32>
      %174 = arith.addf %172, %173 : vector<16x128xf32>
      %175 = vector.shape_cast %174 : vector<16x128xf32> to vector<2x8x128xf32>
      %c0_97 = arith.constant 0 : index
      %c0_98 = arith.constant 0 : index
      %c0_99 = arith.constant 0 : index
      %176 = vector.load %arg22[%c0_97, %c0_98, %c0_99] : memref<2x8x128xf32, #tpu.memory_space<vmem>>, vector<2x8x128xf32>
      tpu.vector_store %arg22[%c0_97, %c0_98, %c0_99], %175 {strides = array<i32>} : memref<2x8x128xf32, #tpu.memory_space<vmem>>, vector<2x8x128xf32>,
    } else {
    }
    return
  }
  func.func @transform_0(%arg0: i32, %arg1: i32) -> (i32, i32, i32) {
    %c0_i32 = arith.constant 0 : i32
    %c0_i32_0 = arith.constant 0 : i32
    %c0_i32_1 = arith.constant 0 : i32
    return %arg0, %c0_i32, %c0_i32_0 : i32, i32, i32
  }
  func.func @transform_1(%arg0: i32, %arg1: i32) -> (i32, i32, i32) {
    %c0_i32 = arith.constant 0 : i32
    %c0_i32_0 = arith.constant 0 : i32
    %c0_i32_1 = arith.constant 0 : i32
    return %arg0, %c0_i32, %c0_i32_0 : i32, i32, i32
  }
  func.func @transform_2(%arg0: i32, %arg1: i32) -> (i32, i32, i32) {
    %c0_i32 = arith.constant 0 : i32
    %c0_i32_0 = arith.constant 0 : i32
    %c0_i32_1 = arith.constant 0 : i32
    return %arg1, %c0_i32, %c0_i32_0 : i32, i32, i32
  }
  func.func @transform_3(%arg0: i32, %arg1: i32) -> (i32, i32, i32) {
    %c0_i32 = arith.constant 0 : i32
    %c0_i32_0 = arith.constant 0 : i32
    %c0_i32_1 = arith.constant 0 : i32
    return %arg1, %c0_i32, %c0_i32_0 : i32, i32, i32
  }
  func.func @transform_4(%arg0: i32, %arg1: i32) -> (i32, i32, i32) {
    %c0_i32 = arith.constant 0 : i32
    %c0_i32_0 = arith.constant 0 : i32
    %c0_i32_1 = arith.constant 0 : i32
    return %arg1, %c0_i32, %c0_i32_0 : i32, i32, i32
  }
  func.func @transform_5(%arg0: i32, %arg1: i32) -> (i32, i32, i32) {
    %c0_i32 = arith.constant 0 : i32
    %c0_i32_0 = arith.constant 0 : i32
    %c0_i32_1 = arith.constant 0 : i32
    return %arg1, %c0_i32, %c0_i32_0 : i32, i32, i32
  }
  func.func @transform_6(%arg0: i32, %arg1: i32) -> (i32, i32, i32) {
    %c0_i32 = arith.constant 0 : i32
    %c0_i32_0 = arith.constant 0 : i32
    %c0_i32_1 = arith.constant 0 : i32
    return %arg1, %c0_i32, %c0_i32_0 : i32, i32, i32
  }
  func.func @transform_7(%arg0: i32, %arg1: i32) -> (i32, i32, i32) {
    %c0_i32 = arith.constant 0 : i32
    %c0_i32_0 = arith.constant 0 : i32
    %c0_i32_1 = arith.constant 0 : i32
    return %arg1, %c0_i32, %c0_i32_0 : i32, i32, i32
  }
  func.func @transform_8(%arg0: i32, %arg1: i32) -> (i32, i32, i32) {
    %c0_i32 = arith.constant 0 : i32
    %c0_i32_0 = arith.constant 0 : i32
    %c0_i32_1 = arith.constant 0 : i32
    return %arg1, %c0_i32, %c0_i32_0 : i32, i32, i32
  }
  func.func @transform_9(%arg0: i32, %arg1: i32) -> (i32, i32, i32) {
    %c0_i32 = arith.constant 0 : i32
    %c0_i32_0 = arith.constant 0 : i32
    %c0_i32_1 = arith.constant 0 : i32
    return %arg1, %c0_i32, %c0_i32_0 : i32, i32, i32
  }
  func.func @transform_10(%arg0: i32, %arg1: i32) -> (i32, i32, i32) {
    %c0_i32 = arith.constant 0 : i32
    %c0_i32_0 = arith.constant 0 : i32
    %c0_i32_1 = arith.constant 0 : i32
    return %arg1, %c0_i32, %c0_i32_0 : i32, i32, i32
  }
  func.func @transform_11(%arg0: i32, %arg1: i32) -> (i32, i32, i32) {
    %c0_i32 = arith.constant 0 : i32
    %c0_i32_0 = arith.constant 0 : i32
    %c0_i32_1 = arith.constant 0 : i32
    return %arg1, %c0_i32, %c0_i32_0 : i32, i32, i32
  }
  func.func @transform_12(%arg0: i32, %arg1: i32) -> (i32, i32, i32) {
    %c0_i32 = arith.constant 0 : i32
    %c0_i32_0 = arith.constant 0 : i32
    %c0_i32_1 = arith.constant 0 : i32
    return %arg1, %c0_i32, %c0_i32_0 : i32, i32, i32
  }
  func.func @transform_13(%arg0: i32, %arg1: i32) -> (i32, i32, i32) {
    %c0_i32 = arith.constant 0 : i32
    %c0_i32_0 = arith.constant 0 : i32
    %c0_i32_1 = arith.constant 0 : i32
    return %arg1, %c0_i32, %c0_i32_0 : i32, i32, i32
  }
  func.func @transform_14(%arg0: i32, %arg1: i32) -> (i32, i32, i32) {
    %c0_i32 = arith.constant 0 : i32
    %c0_i32_0 = arith.constant 0 : i32
    %c0_i32_1 = arith.constant 0 : i32
    return %arg1, %c0_i32, %c0_i32_0 : i32, i32, i32
  }
  func.func @transform_15(%arg0: i32, %arg1: i32) -> (i32, i32, i32) {
    %c0_i32 = arith.constant 0 : i32
    %c0_i32_0 = arith.constant 0 : i32
    %c0_i32_1 = arith.constant 0 : i32
    return %arg1, %c0_i32, %c0_i32_0 : i32, i32, i32
  }
  func.func @transform_16(%arg0: i32, %arg1: i32) -> (i32, i32, i32) {
    %c0_i32 = arith.constant 0 : i32
    %c0_i32_0 = arith.constant 0 : i32
    %c0_i32_1 = arith.constant 0 : i32
    return %arg1, %c0_i32, %c0_i32_0 : i32, i32, i32
  }
  func.func @transform_17(%arg0: i32, %arg1: i32) -> (i32, i32, i32) {
    %c0_i32 = arith.constant 0 : i32
    %c0_i32_0 = arith.constant 0 : i32
    %c0_i32_1 = arith.constant 0 : i32
    return %arg1, %c0_i32, %c0_i32_0 : i32, i32, i32
  }
  func.func @transform_18(%arg0: i32, %arg1: i32) -> (i32, i32) {
    %c0_i32 = arith.constant 0 : i32
    %c0_i32_0 = arith.constant 0 : i32
    %c0_i32_1 = arith.constant 0 : i32
    return %c0_i32, %c0_i32_0 : i32, i32
  }
  func.func @transform_19(%arg0: i32, %arg1: i32) -> (i32, i32) {
    %c0_i32 = arith.constant 0 : i32
    %c0_i32_0 = arith.constant 0 : i32
    %c0_i32_1 = arith.constant 0 : i32
    return %c0_i32, %c0_i32_0 : i32, i32
  }
  func.func @transform_20(%arg0: i32, %arg1: i32) -> (i32, i32, i32) {
    %c0_i32 = arith.constant 0 : i32
    %c0_i32_0 = arith.constant 0 : i32
    %c0_i32_1 = arith.constant 0 : i32
    return %arg0, %c0_i32, %c0_i32_0 : i32, i32, i32
  }
  func.func @transform_21(%arg0: i32, %arg1: i32) -> (i32, i32, i32, i32) {
    %c0_i32 = arith.constant 0 : i32
    %c0_i32_0 = arith.constant 0 : i32
    %c0_i32_1 = arith.constant 0 : i32
    return %arg1, %arg0, %c0_i32, %c0_i32_0 : i32, i32, i32, i32
  }
  func.func @transform_22(%arg0: i32, %arg1: i32) -> (i32, i32, i32, i32) {
    %c0_i32 = arith.constant 0 : i32
    %c0_i32_0 = arith.constant 0 : i32
    %c0_i32_1 = arith.constant 0 : i32
    return %arg1, %arg0, %c0_i32, %c0_i32_0 : i32, i32, i32, i32
  }
}

</mosaic_0001>

<bundles_post_ra>
// kernel: tpu_custom_call.1
= control target key start
LH: loop header
LB: loop body
LE: loop exit
PB: predicated region body
PF: predicated region fallthrough
CT: control target
= control target key end

     0   :  { %s7380_s0 = inlined_call_operand.vmem [shape: f32[2,1,8], index: 0, kind: input, shape index: {}]   ;;  %s7381_s1 = inlined_call_operand.hbm [shape: f32[2,8,128], index: 1, kind: input, shape index: {}, may-alias: {1,20}]   ;;  %s7382_s2 = inlined_call_operand.vmem [shape: f32[2,1,128], index: 2, kind: input, shape index: {}]   ;;  %s7383_s3 = inlined_call_operand.vmem [shape: f32[2,1,128], index: 3, kind: input, shape index: {}]   ;;  %s7384_s4 = inlined_call_operand.hbm [shape: f32[2,128,128], index: 4, kind: input, shape index: {}]   ;;  %s7385_s5 = inlined_call_operand.vmem [shape: f32[2,1,128], index: 5, kind: input, shape index: {}]   ;;  %s7386_s6 = inlined_call_operand.hbm [shape: f32[2,128,128], index: 6, kind: input, shape index: {}]   ;;  %s7387_s7 = inlined_call_operand.vmem [shape: f32[2,1,128], index: 7, kind: input, shape index: {}]   ;;  %s7388_s8 = inlined_call_operand.hbm [shape: f32[2,128,128], index: 8, kind: input, shape index: {}]   ;;  %s7389_s9 = inlined_call_operand.vmem [shape: f32[2,1,128], index: 9, kind: input, shape index: {}]   ;;  %s7390_s10 = inlined_call_operand.hbm [shape: f32[2,128,128], index: 10, kind: input, shape index: {}]   ;;  %s7391_s11 = inlined_call_operand.vmem [shape: f32[2,1,128], index: 11, kind: input, shape index: {}]   ;;  %s7392_s12 = inlined_call_operand.vmem [shape: f32[2,1,128], index: 12, kind: input, shape index: {}]   ;;  %s7393_s13 = inlined_call_operand.vmem [shape: f32[2,1,128], index: 13, kind: input, shape index: {}]   ;;  %s7394_s14 = inlined_call_operand.hbm [shape: f32[2,128,512], index: 14, kind: input, shape index: {}]   ;;  %s7395_s15 = inlined_call_operand.vmem [shape: f32[2,1,512], index: 15, kind: input, shape index: {}]   ;;  %s7396_s16 = inlined_call_operand.hbm [shape: f32[2,512,128], index: 16, kind: input, shape index: {}]   ;;  %s7397_s17 = inlined_call_operand.vmem [shape: f32[2,1,128], index: 17, kind: input, shape index: {}]   ;;  %s7398_s18 = inlined_call_operand.vmem [shape: f32[1,128], index: 18, kind: input, shape index: {}]   ;;  %s7399_s19 = inlined_call_operand.vmem [shape: f32[1,128], index: 19, kind: input, shape index: {}]   ;;  %s7400_s20 = inlined_call_operand.hbm [shape: f32[2,8,128], index: 20, kind: output, shape index: {0}, may-alias: {1,20}]   ;;  %s7401_s21 = inlined_call_operand.hbm [shape: f32[2,2,8,128], index: 21, kind: output, shape index: {1}]   ;;  %s7402_s22 = inlined_call_operand.hbm [shape: f32[2,2,8,128], index: 22, kind: output, shape index: {2}]  }
   0x1   :  { %7430 = sst [smem:[#allocation34_spill]] %s7380_s0 }
   0x2   :  { %7431 = sst [smem:[#allocation35_spill]] %s7381_s1 }
   0x3   :  { %7432 = sst [smem:[#allocation36_spill]] %s7382_s2 }
   0x4   :  { %7433 = sst [smem:[#allocation37_spill]] %s7383_s3 }
   0x5   :  { %7434 = sst [smem:[#allocation38_spill]] %s7384_s4 }
   0x6   :  { %7435 = sst [smem:[#allocation39_spill]] %s7385_s5 }
   0x7   :  { %7436 = sst [smem:[#allocation40_spill]] %s7386_s6 }
   0x8   :  { %7437 = sst [smem:[#allocation41_spill]] %s7387_s7 }
   0x9   :  { %7438 = sst [smem:[#allocation42_spill]] %s7388_s8 }
   0xa   :  { %7439 = sst [smem:[#allocation43_spill]] %s7389_s9 }
   0xb   :  { %7440 = sst [smem:[#allocation44_spill]] %s7390_s10 }
   0xc   :  { %7441 = sst [smem:[#allocation45_spill]] %s7391_s11 }
   0xd   :  { %7442 = sst [smem:[#allocation46_spill]] %s7392_s12 }
   0xe   :  { %7443 = sst [smem:[#allocation47_spill]] %s7393_s13 }
   0xf   :  { %7444 = sst [smem:[#allocation48_spill]] %s7394_s14 }
  0x10   :  { %7445 = sst [smem:[#allocation49_spill]] %s7395_s15 }
  0x11   :  { %7446 = sst [smem:[#allocation50_spill]] %s7396_s16 }
  0x12   :  { %7447 = sst [smem:[#allocation51_spill]] %s7397_s17 }
  0x13   :  { %7448 = sst [smem:[#allocation52_spill]] %s7398_s18 }
  0x14   :  { %7449 = sst [smem:[#allocation53_spill]] %s7399_s19 }
  0x15   :  { %7450 = sst [smem:[#allocation54_spill]] %s7400_s20 }
  0x16   :  { %7451 = sst [smem:[#allocation55_spill]] %s7401_s21 }
  0x17   :  { %7452 = sst [smem:[#allocation56_spill]] %s7402_s22 }
  0x18   :  { %28 = vsyncpa [#allocation3], 0 }
  0x19   :  { %29 = vsyncpa [#allocation6], 0 }
  0x1a   :  { %31 = vsyncpa [#allocation6 + $0x1], 0 }
  0x1b   :  { %32 = vsyncpa [#allocation9], 0 }
  0x1c   :  { %34 = vsyncpa [#allocation9 + $0x1], 0 }
  0x1d   :  { %35 = vsyncpa [#allocation12], 0 }
  0x1e   :  { %37 = vsyncpa [#allocation12 + $0x1], 0 }
  0x1f   :  { %38 = vsyncpa [#allocation4], 0 }
  0x20   :  { %39 = vsyncpa [#allocation16], 0 }
  0x21   :  { %41 = vsyncpa [#allocation16 + $0x1], 0  ;;  %s6270_s3 = smov 0   ;;  %s6272_s28 = smov 0  }
  0x22   :  { %s6274_s29 = smov 0   ;;  %s6276_s30 = smov 0  }
  0x23   :  { %s6278_s4 = smov 0   ;;  %s6280_s0 = smov 0  }
  0x24 LB: > { %7453 = sst [smem:[#allocation24_spill]] %s6114_s28  ;;  %s56_s23 = sadd.s32 1, %s6126_s4  ;;  %s6130_s0 = sphi %s6280_s0, %s47_s0   ;;  %s6126_s4 = sphi %s6278_s4, %s7533_s4   ;;  %s6122_s30 = sphi %s6276_s30, %s7532_s30   ;;  %s6118_s29 = sphi %s6274_s29, %s7531_s29   ;;  %s6114_s28 = sphi %s6272_s28, %s7530_s28   ;;  %s6110_s3 = sphi %s6270_s3, %s7529_s3  }
  0x25   : > { %7454 = sst [smem:[#allocation25_spill]] %s6118_s29  ;;  %s170_s1 = sadd.s32 1, %s6118_s29 }
  0x26   : > { %7455 = sst [smem:[#allocation26_spill]] %s6126_s4  ;;  %p57_p0 = scmp.ge.s32.totalorder %s56_s23, 2 }
  0x27   : > { %7456 = sst [smem:[#allocation27_spill]] %s6130_s0  ;;  %p177_p1 = scmp.ne.s32.totalorder %s6118_s29, %s6114_s28 }
  0x28   : > { %p178_p2 = scmp.eq.s32.totalorder %s6130_s0, 0  ;;  %s7535_s23 = smov (%p57_p0, %s56_s23), 0 }
  0x29   : > { %7457 = sst [smem:[#allocation28_spill]] %s7535_s23  ;;  %s167_s24 = ssub.s32 %s6126_s4, %s7535_s23 }
  0x2a   : > { %p6310_p3 = por %p178_p2, %p177_p1  ;;  %p168_p5 = scmp.eq.s32.totalorder %s167_s24, 0 }
  0x2b   : > { %p5629_p6 = scmp.lt.s32.totalorder %s6130_s0, 2  ;;  %s6319_s6 = sand.u32 1, %s6130_s0  }
  0x2c   : > { %s7407_s25 = sand.u32 1, %s6118_s29   ;;  %s6330_s27 = sshll.u32 %s6126_s4, 11 }
  0x2d   : > { %s6323_s26 = scalar_select %p168_p5, %s6118_s29, %s170_s1  }
  0x2e   : > { %s6327_s2 = sshll.u32 %s7407_s25, 7  ;;  %s7460_s21 = sld [smem:[#allocation38_spill]] }
  0x2f   : > { %7459 = sst [smem:[#allocation29_spill]] %s6323_s26  ;;  %s715_s24 = scalar_lea.vmem [#allocation5], %s6327_s2 }
  0x30   : > { %s722_s19 = sshll.u32 %s715_s24, 4  ;;  %p6339_p7 = pnand %p5629_p6, %p6310_p3  ;;  %s723_s19 = int_to_ptr.vmem [resolvable:$true] %s722_s19 }
  0x31   : > { %s7462_s8 = sld [smem:[#allocation42_spill]]  ;;  %s7408_s15 = scalar_lea.sflag [#allocation6], %s6319_s6 }
  0x32   : > { %p6350_p8 = pneg %p6339_p7  ;;  %s5803_s20 = scalar_lea.vmem %s723_s19, 2048 }
  0x33   : > { %p5804_p9 = scmp.ne.s32.totalorder %s723_s19, %s5803_s20 }
  0x34   : > { %s721_s23 = scalar_lea.hbm %s7460_s21, %s6330_s27  ;;  %s6132_s21 = smov [#allocation5]  }
  0x35   : > { %p5806_p10 = pnand %p5804_p9, %p6350_p8  ;;  %s5808_s22 = sshll.u32 %s6132_s21, 4  ;;  %s5809_s22 = int_to_ptr.vmem [resolvable:$false] %s5808_s22 }
  0x36   : > { %s5810_s5 = scalar_lea.vmem %s5809_s22, 4096  ;;  %p5811_p12 = scmp.lt.s32.totalorder %s723_s19, %s5809_s22 }
  0x37   : > { %p5807_p11 = pneg %p5806_p10  ;;  %p5812_p13 = scmp.lt.s32.totalorder %s5810_s5, %s5803_s20 }
  0x39   : > { %p5813_p0 = por %p5812_p13, %p5811_p12 }
  0x3b   : > { %p5814_p2 = pnand %p5813_p0, %p5807_p11 }
  0x3d   : > { %5817 = shalt.err (!%p5814_p2)
}
  0x3e   : > { %s7412_s25 = smov 128   ;;  %s7414_s24 = smov 8  }
  0x3f   : > { %5605 = dma.hbm_to_vmem [thread:$0]  (!%p6339_p7), %s721_s23, 2048, %s723_s19, %s7408_s15, %s7412_s25, %s7412_s25, %s7414_s24  }
  0x40   : > { %s769_s1 = scalar_lea.vmem [#allocation8], %s6327_s2  ;;  %s7464_s20 = sand.u32 1, %s6118_s29  }
  0x41   : > { %s776_s21 = sshll.u32 %s769_s1, 4  ;;  %s6366_s22 = sshll.u32 %s7464_s20, 9  ;;  %s777_s21 = int_to_ptr.vmem [resolvable:$true] %s776_s21 }
  0x42   : > { %s7411_s5 = scalar_lea.sflag [#allocation9], %s6319_s6  ;;  %s5831_s26 = scalar_lea.vmem %s777_s21, 2048 }
  0x43   : > { %p5832_p3 = scmp.ne.s32.totalorder %s777_s21, %s5831_s26  ;;  %s6135_s13 = smov [#allocation8]  }
  0x44   : > { %s5836_s12 = sshll.u32 %s6135_s13, 4  ;;  %s5837_s12 = int_to_ptr.vmem [resolvable:$false] %s5836_s12 }
  0x45   : > { %p5834_p5 = pnand %p5832_p3, %p6350_p8  ;;  %s5838_s11 = scalar_lea.vmem %s5837_s12, 4096 }
  0x46   : > { %p5839_p9 = scmp.lt.s32.totalorder %s777_s21, %s5837_s12  ;;  %p5840_p10 = scmp.lt.s32.totalorder %s5838_s11, %s5831_s26 }
  0x47   : > { %p5835_p6 = pneg %p5834_p5 }
  0x48   : > { %p5841_p11 = por %p5840_p10, %p5839_p9 }
  0x4a   : > { %p5842_p12 = pnand %p5841_p11, %p5835_p6 }
  0x4c   : > { %5845 = shalt.err (!%p5842_p12)
}
  0x4d   : > { %s7465_s1 = scalar_lea.hbm %s7462_s8, %s6330_s27  ;;  %s5170_s11 = sshll.u32 %s6126_s4, 13 }
  0x4e   : > { %5611 = dma.hbm_to_vmem [thread:$0]  (!%p6339_p7), %s7465_s1, 2048, %s777_s21, %s7411_s5, %s7412_s25, %s7412_s25, %s7414_s24  }
  0x4f   : > { %s7466_s14 = sld [smem:[#allocation48_spill]]  ;;  %s835_s20 = scalar_lea.vmem [#allocation11], %s6366_s22 }
  0x50   : > { %s842_s15 = sshll.u32 %s835_s20, 4  ;;  %s7410_s9 = scalar_lea.sflag [#allocation12], %s6319_s6  ;;  %s843_s15 = int_to_ptr.vmem [resolvable:$true] %s842_s15 }
  0x51   : > { %s5859_s7 = scalar_lea.vmem %s843_s15, 8192  ;;  %s6136_s19 = smov [#allocation11]  }
  0x52   : > { %p5860_p13 = scmp.ne.s32.totalorder %s843_s15, %s5859_s7  ;;  %s5864_s23 = sshll.u32 %s6136_s19, 4  ;;  %s5865_s23 = int_to_ptr.vmem [resolvable:$false] %s5864_s23 }
  0x53   : > { %s5866_s8 = scalar_lea.vmem %s5865_s23, 16384  ;;  %p5867_p3 = scmp.lt.s32.totalorder %s843_s15, %s5865_s23 }
  0x54   : > { %p5862_p0 = pnand %p5860_p13, %p6350_p8  ;;  %p5868_p5 = scmp.lt.s32.totalorder %s5866_s8, %s5859_s7 }
  0x55   : > { %s841_s26 = scalar_lea.hbm %s7466_s14, %s5170_s11 }
  0x56   : > { %p5863_p2 = pneg %p5862_p0  ;;  %p5869_p6 = por %p5868_p5, %p5867_p3 }
  0x58   : > { %p5870_p9 = pnand %p5869_p6, %p5863_p2 }
  0x5a   : > { %5873 = shalt.err (!%p5870_p9)
}
  0x5b   : > { %s6137_s21 = smov 512   ;;  %s6138_s1 = smov 32  }
  0x5c   : > { %5617 = dma.hbm_to_vmem [thread:$0]  (!%p6339_p7), %s841_s26, 8192, %s843_s15, %s7410_s9, %s6137_s21, %s6137_s21, %s6138_s1  }
  0x5d   : > { %s7467_s16 = sld [smem:[#allocation50_spill]]  ;;  %s863_s13 = scalar_lea.vmem [#allocation13], %s6366_s22 }
  0x5e   : > { %s6401_s20 = sshll.u32 %s863_s13, 4  ;;  %s6404_s19 = sadd.s32 4294967295, %s6130_s0   ;;  %s6482_s20 = int_to_ptr.vmem [resolvable:$true] %s6401_s20 }
  0x5f   : > { %7468 = sst [smem:[#allocation30_spill]] %s6404_s19  ;;  %s7409_s23 = sadd.s32 4294967294, %s6130_s0  }
  0x60   : > { %p183_p10 = scmp.ne.s32.totalorder %s6114_s28, %s6110_s3  ;;  %p184_p11 = scmp.eq.s32.totalorder %s6404_s19, 0 }
  0x61   : > { %p7416_p12 = scmp.eq.s32.totalorder %s6404_s19, 1  ;;  %p621_p13 = scmp.eq.s32.totalorder %s7409_s23, 1 }
  0x62   : > { %p5062_p0 = scmp.ge.s32.totalorder %s6130_s0, 1  ;;  %p6416_p2 = por %p184_p11, %p183_p10 }
  0x63   : > { %s6398_s12 = scalar_lea.hbm %s7467_s16, %s5170_s11  ;;  %p6425_p3 = por %p7416_p12, %p177_p1 }
  0x64   : > { %p6429_p5 = por %p621_p13, %p183_p10  ;;  %p656_p6 = scmp.lt.s32.totalorder %s6130_s0, 3 }
  0x65   : > { %s7470_s22 = scalar_select %p6425_p3, 1, 0 }
  0x66   : > { %s7472_s3 = scalar_select %p6429_p5, 1, 0 }
  0x67   : > { %7471 = sst [smem:[#allocation31_spill]] %s7470_s22  ;;  %p6434_p9 = pnand %p5062_p0, %p656_p6 }
  0x68   : > { %7473 = sst [smem:[#allocation32_spill]] %s7472_s3  ;;  %s6139_s26 = smov [#allocation2]  }
  0x69   : > { %s679_s21 = sshll.u32 %s6139_s26, 4  ;;  %p5598_p4 = pneg %p6434_p9  ;;  %s6438_s21 = int_to_ptr.vmem [resolvable:$true] %s679_s21 }
  0x6a   : > { %s7475_s8 = sld [smem:[#allocation40_spill]]  ;;  %s742_s23 = scalar_lea.vmem [#allocation7], %s6327_s2 }
  0x6b   : > { %s749_s9 = sshll.u32 %s742_s23, 4  ;;  %p6449_p1 = pnand %p5598_p4, %p184_p11  ;;  %s750_s9 = int_to_ptr.vmem [resolvable:$true] %s749_s9 }
  0x6c   : > { %s5887_s25 = scalar_lea.vmem %s750_s9, 2048  ;;  %s6140_s26 = smov [#allocation7]  }
  0x6d   : > { %p5888_p10 = scmp.ne.s32.totalorder %s750_s9, %s5887_s25  ;;  %s5892_s24 = sshll.u32 %s6140_s26, 4  ;;  %s5893_s24 = int_to_ptr.vmem [resolvable:$false] %s5892_s24 }
  0x6e   : > { %s5894_s14 = scalar_lea.vmem %s5893_s24, 4096  ;;  %p5895_p6 = scmp.lt.s32.totalorder %s750_s9, %s5893_s24 }
  0x6f   : > { %p5890_p13 = pnand %p5888_p10, %p6350_p8  ;;  %p5896_p12 = scmp.lt.s32.totalorder %s5894_s14, %s5887_s25 }
  0x70   : > { %s748_s13 = scalar_lea.hbm %s7475_s8, %s6330_s27 }
  0x71   : > { %p5891_p0 = pneg %p5890_p13  ;;  %p5897_p5 = por %p5896_p12, %p5895_p6 }
  0x73   : > { %p5898_p3 = pnand %p5897_p5, %p5891_p0 }
  0x75   : > { %5901 = shalt.err (!%p5898_p3)
}
  0x76   : > { %s7477_s23 = smov 8   ;;  %s7478_s1 = smov 128  }
  0x77   : > { %s7479_s7 = scalar_lea.sflag [#allocation6], %s6319_s6  ;;  %s7480_s10 = sld [smem:[#allocation44_spill]] }
  0x78   : > { %5608 = dma.hbm_to_vmem [thread:$0]  (!%p6339_p7), %s748_s13, 2048, %s750_s9, %s7479_s7, %s7478_s1, %s7478_s1, %s7477_s23  }
  0x79   : > { %p5904_p4 = pneg %p6449_p1  ;;  %s5913_s25 = scalar_lea.vmem %s6438_s21, 256 }
  0x7a   : > { %p5914_p12 = scmp.ne.s32.totalorder %s6438_s21, %s5913_s25  ;;  %p5921_p10 = scmp.lt.s32.totalorder %s6438_s21, %s6438_s21 }
  0x7b   : > { %p5922_p13 = scmp.lt.s32.totalorder %s5913_s25, %s5913_s25 }
  0x7c   : > { %p5916_p3 = pnand %p5914_p12, %p5904_p4 }
  0x7d   : > { %p5923_p0 = por %p5922_p13, %p5921_p10 }
  0x7e   : > { %p5917_p5 = pneg %p5916_p3 }
  0x80   : > { %p5924_p6 = pnand %p5923_p0, %p5917_p5 }
  0x82   : > { %5927 = shalt.err (!%p5924_p6)
}
  0x83   : > { %s7481_s13 = sld [smem:[#allocation35_spill]]  ;;  %s796_s7 = scalar_lea.vmem [#allocation10], %s6327_s2 }
  0x84   : > { %s803_s8 = sshll.u32 %s796_s7, 4  ;;  %s6141_s5 = smov [#allocation10]   ;;  %s804_s8 = int_to_ptr.vmem [resolvable:$true] %s803_s8 }
  0x85   : > { %s5941_s26 = scalar_lea.vmem %s804_s8, 2048  ;;  %s5946_s25 = sshll.u32 %s6141_s5, 4  ;;  %s5947_s25 = int_to_ptr.vmem [resolvable:$false] %s5946_s25 }
  0x86   : > { %p5942_p4 = scmp.ne.s32.totalorder %s804_s8, %s5941_s26  ;;  %s5948_s14 = scalar_lea.vmem %s5947_s25, 4096 }
  0x87   : > { %p5949_p5 = scmp.lt.s32.totalorder %s804_s8, %s5947_s25  ;;  %p5950_p10 = scmp.lt.s32.totalorder %s5948_s14, %s5941_s26 }
  0x88   : > { %p5944_p12 = pnand %p5942_p4, %p6350_p8 }
  0x89   : > { %5601 = dma.hbm_to_vmem [thread:$0]  (!%p6449_p1), %s7481_s13, 256, %s6438_s21, [#allocation3], %s7478_s1, %s7478_s1, %s7477_s23  }
  0x8a   : > { %p5945_p3 = pneg %p5944_p12  ;;  %p5951_p13 = por %p5950_p10, %p5949_p5 }
  0x8c   : > { %p5952_p0 = pnand %p5951_p13, %p5945_p3 }
  0x8e   : > { %5955 = shalt.err (!%p5952_p0)
}
  0x8f   : > { %s7482_s2 = scalar_lea.sflag [#allocation9], %s6319_s6  ;;  %s7483_s24 = scalar_lea.hbm %s7480_s10, %s6330_s27 }
  0x90   : > { %5614 = dma.hbm_to_vmem [thread:$0]  (!%p6339_p7), %s7483_s24, 2048, %s804_s8, %s7482_s2, %s7478_s1, %s7478_s1, %s7477_s23  }
  0x91   : > { %s5969_s14 = scalar_lea.vmem %s6482_s20, 8192  ;;  %s6142_s13 = smov [#allocation13]  }
  0x92   : > { %p5970_p1 = scmp.ne.s32.totalorder %s6482_s20, %s5969_s14  ;;  %s5974_s7 = sshll.u32 %s6142_s13, 4  ;;  %s5975_s7 = int_to_ptr.vmem [resolvable:$false] %s5974_s7 }
  0x93   : > { %s5976_s26 = scalar_lea.vmem %s5975_s7, 16384  ;;  %p5977_p12 = scmp.lt.s32.totalorder %s6482_s20, %s5975_s7 }
  0x94   : > { %p5972_p6 = pnand %p5970_p1, %p6350_p8  ;;  %p5978_p3 = scmp.lt.s32.totalorder %s5976_s26, %s5969_s14 }
  0x96   : > { %p5973_p4 = pneg %p5972_p6  ;;  %p5979_p5 = por %p5978_p3, %p5977_p12 }
  0x98   : > { %p5980_p10 = pnand %p5979_p5, %p5973_p4 }
  0x9a   : > { %5983 = shalt.err (!%p5980_p10)
}
  0x9b   : > { %s7484_s27 = scalar_lea.sflag [#allocation12], %s6319_s6  ;;  %888 = sbr.rel (%p6434_p9) target bundleno = 3099 (0xc1b), region = 100 }
  0x9c   : > { %5620 = dma.hbm_to_vmem [thread:$0]  (!%p6339_p7), %s6398_s12, 8192, %s6482_s20, %s7484_s27, %s7478_s1, %s7478_s1, %s7477_s23  }
  0xa0   : > { %6085 = dma.done.wait (%p184_p11), [#allocation3], 256  }
  0xa1   : > { %6087 = vsyncadd (%p184_p11), [#allocation3], 4294967040  ;;  %s6520_s17 = sand.u32 1, %s6404_s19   ;;  %s6523_s18 = sand.u32 1, %s6114_s28  }
  0xa2   : > { %7485 = sst [smem:[#allocation33_spill]] %s6520_s17  ;;  %s5086_s6 = sshll.u32 %s6523_s18, 7 }
  0xa3   : > { %s895_s12 = scalar_lea.sflag [#allocation6], %s6520_s17  ;;  %s6527_s20 = scalar_lea.vmem [#allocation5], %s5086_s6 }
  0xa4   : > { %6089 = dma.done.wait (%p6416_p2), %s895_s12, 4096  }
  0xa5   : > { %6091 = vsyncadd (%p6416_p2), %s895_s12, 4294963200  ;;  %s6533_s11 = scalar_lea.vmem [#allocation7], %s5086_s6  ;;  %s913_s23 = scalar_lea.sflag [#allocation9], %s6520_s17 }
  0xa6   : > { %s6536_s1 = scalar_lea.vmem [#allocation8], %s5086_s6 }
  0xa7   : > { %6093 = dma.done.wait (%p6416_p2), %s913_s23, 4096  }
  0xa8   : > { %6095 = vsyncadd (%p6416_p2), %s913_s23, 4294963200  ;;  %s5090_s8 = sshll.u32 %s6523_s18, 9  ;;  %s6543_s5 = scalar_lea.vmem [#allocation10], %s5086_s6 }
  0xa9   : > { %s931_s25 = scalar_lea.sflag [#allocation12], %s6520_s17  ;;  %s6546_s2 = scalar_lea.vmem [#allocation11], %s5090_s8 }
  0xaa   : > { %6097 = dma.done.wait (%p6416_p2), %s931_s25, 16384  }
  0xab   : > { %6099 = vsyncadd (%p6416_p2), %s931_s25, 4294950912  ;;  %s5092_s21 = sshll.u32 %s6523_s18, 4  ;;  %p1075_p7 = scmp.lt.s32.totalorder %s6122_s30, 1 }
  0xac   : > { %s7490_s28 = sld [smem:[#allocation43_spill]]  ;;  %s6599_s0 = scalar_lea.vmem [#allocation13], %s5090_s8 }
  0xad   : > { %s6555_s9 = scalar_select %p1075_p7, %s6122_s30, 1 }
  0xae   : > { %s7491_s22 = sld [smem:[#allocation45_spill]]  ;;  %s6601_s19 = scalar_lea.vmem [#allocation15], %s5092_s21 }
  0xaf   : > { %s7492_s7 = sld [smem:[#allocation46_spill]]  ;;  %s5094_s23 = sshll.u32 %s6555_s9, 2 }
  0xb0   : > { %s7493_s6 = sld [smem:[#allocation47_spill]]  ;;  %p5095_p8 = scmp.ne.s32.totalorder %s6122_s30, 0 }
  0xb1   : > { %s7494_s24 = sld [smem:[#allocation51_spill]] }
  0xb2   : > { %s1089_s3 = scalar_lea.vmem %s7490_s28, %s6555_s9  ;;  %s7495_s28 = sld [smem:[#allocation49_spill]] }
  0xb4   : > { %s1092_s13 = scalar_lea.vmem %s7491_s22, %s6555_s9  ;;  %s6603_s22 = scalar_lea.vmem [#allocation17], %s5092_s21 }
  0xb5   : > { %s1095_s26 = scalar_lea.vmem %s7492_s7, %s6555_s9  ;;  %1112 = sbr.rel (%p5095_p8) target bundleno = 188 (0xbc), region = 132 }
  0xb6   : > { %s1098_s12 = scalar_lea.vmem %s7493_s6, %s6555_s9 }
  0xb7   : > { %s1105_s14 = scalar_lea.vmem %s7494_s24, %s6555_s9 }
  0xb8   : > { %s6597_s4 = scalar_lea.vmem %s7495_s28, %s5094_s23 }
  0xba   : > { %v1113_v0 = vld [vmem:[#allocation2] sm:$0xff]  ;;  %v1114_v1 = vld [vmem:[#allocation2 + $0x8] sm:$0xff] }
  0xbb   : > { %1115 = vst [vmem:[#allocation14] sm:$0xff] %v1113_v0  ;;  %1116 = vst [vmem:[#allocation14 + $0x8] sm:$0xff] %v1114_v1 }
  0xbc PF: > { %v1175_v4 = vld [vmem:[%s6527_s20 + $0x78] sm:$0xff]  ;;  %v1174_v6 = vld [vmem:[%s6527_s20 + $0x70] sm:$0xff]  ;;  %v1173_v8 = vld [vmem:[%s6527_s20 + $0x68] sm:$0xff]  ;;  %s7498_s15 = sld [smem:[#allocation37_spill]]  ;;  %s6144_s28 = smov 96   ;;  %vm6147_vm0 = vmmov 0  }
  0xbd   : > { %v1273_v5 = vld [vmem:[%s6533_s11 + $0x78] sm:$0xff]  ;;  %5354 = vmatprep.subr.mxu0 %v1175_v4  ;;  %v1272_v7 = vld [vmem:[%s6533_s11 + $0x70] sm:$0xff]  ;;  %v1271_v17 = vld [vmem:[%s6533_s11 + $0x68] sm:$0xff]  ;;  %s7500_s27 = sld [smem:[#allocation41_spill]]  ;;  %s6145_s16 = smov 32   ;;  %vm2352_vm1 = vcmask 261120  }
  0xbe   : > { %5389 = vmatprep.subr.mxu1 %v1273_v5  ;;  %5355 = vmatpush3.msra.mxu0 %v1175_v4  ;;  %v1172_v18 = vld [vmem:[%s6527_s20 + $0x60] sm:$0xff]  ;;  %v1171_v20 = vld [vmem:[%s6527_s20 + $0x58] sm:$0xff]  ;;  %v1170_v22 = vld [vmem:[%s6527_s20 + $0x50] sm:$0xff]  ;;  %s7502_s24 = sld [smem:[#allocation39_spill]]  ;;  %vm2961_vm2 = vcmask 64512   ;;  %vm3932_vm3 = vcmask 523264  }
  0xbf   : > { %5390 = vmatpush3.msra.mxu1 %v1273_v5  ;;  %5356 = vmatprep.subr.mxu0 %v1174_v6  ;;  %v1270_v19 = vld [vmem:[%s6533_s11 + $0x60] sm:$0xff]  ;;  %v1269_v21 = vld [vmem:[%s6533_s11 + $0x58] sm:$0xff]  ;;  %v1268_v23 = vld [vmem:[%s6533_s11 + $0x50] sm:$0xff]  ;;  %s7505_s21 = sld [smem:[#allocation34_spill]]  ;;  %vm3935_vm4 = vcmask 785408   ;;  %p5153_p11 = scmp.ne.s32.totalorder %s6122_s30, 1 }
  0xc0   : > { %5391 = vmatprep.subr.mxu1 %v1272_v7  ;;  %5357 = vmatpush3.msra.mxu0 %v1174_v6  ;;  %v1169_v24 = vld [vmem:[%s6527_s20 + $0x48] sm:$0xff]  ;;  %v1168_v26 = vld [vmem:[%s6527_s20 + $0x40] sm:$0xff]  ;;  %v1167_v28 = vld [vmem:[%s6527_s20 + $0x38] sm:$0xff] }
  0xc1   : > { %5392 = vmatpush3.msra.mxu1 %v1272_v7  ;;  %5358 = vmatprep.subr.mxu0 %v1173_v8  ;;  %v1267_v25 = vld [vmem:[%s6533_s11 + $0x48] sm:$0xff]  ;;  %v1266_v27 = vld [vmem:[%s6533_s11 + $0x40] sm:$0xff]  ;;  %v1265_v29 = vld [vmem:[%s6533_s11 + $0x38] sm:$0xff] }
  0xc2   : > { %v1117_v2 = vld [vmem:[#allocation14] sm:$0xff]  ;;  %v1118_v3 = vld [vmem:[#allocation14 + $0x8] sm:$0xff]  ;;  %5359 = vmatpush3.msra.mxu0 %v1173_v8  ;;  %5393 = vmatprep.subr.mxu1 %v1271_v17  ;;  %v1166_v30 = vld [vmem:[%s6527_s20 + $0x30] sm:$0xff]  ;;  %s7499_s18 = scalar_lea.vmem %s7498_s15, %s6555_s9 }
  0xc3   : > { %1121 = vadd.xlane.f32.xlu0 %v1117_v2  ;;  %5360 = vmatprep.subr.mxu0 %v1172_v18  ;;  %v1264_v31 = vld [vmem:[%s6533_s11 + $0x30] sm:$0xff]  ;;  %v1165_v32 = vld [vmem:[%s6527_s20 + $0x28] sm:$0xff]  ;;  %v1164_v34 = vld [vmem:[%s6527_s20 + $0x20] sm:$0xff]  ;;  %s7501_s6 = scalar_lea.vmem %s7500_s27, %s6555_s9 }
  0xc4   : > { %5394 = vmatpush3.msra.mxu1 %v1271_v17  ;;  %5361 = vmatpush3.msra.mxu0 %v1172_v18  ;;  %v1263_v33 = vld [vmem:[%s6533_s11 + $0x28] sm:$0xff]  ;;  %v1262_v35 = vld [vmem:[%s6533_s11 + $0x20] sm:$0xff]  ;;  %v1163_v36 = vld [vmem:[%s6527_s20 + $0x18] sm:$0xff]  ;;  %s7503_s29 = scalar_lea.vmem %s7502_s24, %s6555_s9 }
  0xc5   : > { %5395 = vmatprep.subr.mxu1 %v1270_v19  ;;  %5362 = vmatprep.subr.mxu0 %v1171_v20  ;;  %v1261_v37 = vld [vmem:[%s6533_s11 + $0x18] sm:$0xff]  ;;  %v1162_v38 = vld [vmem:[%s6527_s20 + $0x10] sm:$0xff]  ;;  %v1161_v40 = vld [vmem:[%s6527_s20 + $0x8] sm:$0xff] }
  0xc6   : > { %5396 = vmatpush3.msra.mxu1 %v1270_v19  ;;  %5363 = vmatpush3.msra.mxu0 %v1171_v20  ;;  %v1260_v39 = vld [vmem:[%s6533_s11 + $0x10] sm:$0xff]  ;;  %v1259_v41 = vld [vmem:[%s6533_s11 + $0x8] sm:$0xff]  ;;  %v1160_v42 = vld [vmem:[%s6527_s20] sm:$0xff]  ;;  %s7496_s20 = sld [smem:[#allocation36_spill]] }
  0xc7   : > { %1123 = vadd.xlane.f32.xlu0 %v1118_v3  ;;  %5397 = vmatprep.subr.mxu1 %v1269_v21  ;;  %v1258_v43 = vld [vmem:[%s6533_s11] sm:$0xff]  ;;  %v1373_v44 = vld [vmem:[%s6536_s1 + $0x78] sm:$0xff]  ;;  %v5097_v54 = vld [vmem:[%s7499_s18] ss:$0 sm:$0xff] }
  0xc8   : > { %5364 = vmatprep.subr.mxu0 %v1170_v22  ;;  %5398 = vmatpush3.msra.mxu1 %v1269_v21  ;;  %v1372_v61 = vld [vmem:[%s6536_s1 + $0x70] sm:$0xff]  ;;  %v1371_v62 = vld [vmem:[%s6536_s1 + $0x68] sm:$0xff]  ;;  %v1370_v63 = vld [vmem:[%s6536_s1 + $0x60] sm:$0xff] }
  0xc9   : > { %5365 = vmatpush3.msra.mxu0 %v1170_v22  ;;  %5399 = vmatprep.subr.mxu1 %v1268_v23  ;;  %v1369_v0 = vld [vmem:[%s6536_s1 + $0x58] sm:$0xff]  ;;  %v1368_v1 = vld [vmem:[%s6536_s1 + $0x50] sm:$0xff]  ;;  %v1363_v6 = vld [vmem:[%s6536_s1 + $0x28] sm:$0xff] }
  0xca   : > { %5366 = vmatprep.subr.mxu0 %v1169_v24  ;;  %5400 = vmatpush3.msra.mxu1 %v1268_v23  ;;  %v1365_v4 = vld [vmem:[%s6536_s1 + $0x38] sm:$0xff]  ;;  %v1364_v5 = vld [vmem:[%s6536_s1 + $0x30] sm:$0xff]  ;;  %v1362_v7 = vld [vmem:[%s6536_s1 + $0x20] sm:$0xff]  ;;  %v6146_v23 = vmov 0.0  }
  0xcb   : > { %5367 = vmatpush3.msra.mxu0 %v1169_v24  ;;  %5401 = vmatprep.subr.mxu1 %v1267_v25  ;;  %v1361_v8 = vld [vmem:[%s6536_s1 + $0x18] sm:$0xff] }
  0xcc   : > { %5368 = vmatprep.subr.mxu0 %v1168_v26  ;;  %5402 = vmatpush3.msra.mxu1 %v1267_v25  ;;  %s7497_s11 = scalar_lea.vmem %s7496_s20, %s6555_s9  ;;  %v5100_v25 = vld [vmem:[%s1089_s3] ss:$0 sm:$0xff] }
  0xcd   : > { %5369 = vmatpush3.msra.mxu0 %v1168_v26  ;;  %5403 = vmatprep.subr.mxu1 %v1266_v27  ;;  %v5096_v52 = vld [vmem:[%s7497_s11] ss:$0 sm:$0xff] }
  0xce   : > { %5370 = vmatprep.subr.mxu0 %v1167_v28  ;;  %5404 = vmatpush3.msra.mxu1 %v1266_v27 }
  0xcf   : > { %5371 = vmatpush3.msra.mxu0 %v1167_v28  ;;  %5405 = vmatprep.subr.mxu1 %v1265_v29 }
  0xd0   : > { %5372 = vmatprep.subr.mxu0 %v1166_v30  ;;  %5406 = vmatpush3.msra.mxu1 %v1265_v29 }
  0xd1   : > { %5373 = vmatpush3.msra.mxu0 %v1166_v30  ;;  %5407 = vmatprep.subr.mxu1 %v1264_v31  ;;  %v6148_v30 = vmov 1983009808  }
  0xd2   : > { %5374 = vmatprep.subr.mxu0 %v1165_v32  ;;  %5408 = vmatpush3.msra.mxu1 %v1264_v31  ;;  %v1483_v31 = vunpack.c.l.s4 %v6148_v30 }
  0xd3   : > { %5375 = vmatpush3.msra.mxu0 %v1165_v32  ;;  %5409 = vmatprep.subr.mxu1 %v1263_v33  ;;  %v1485_v32 = vlaneseq }
  0xd4   : > { %5376 = vmatprep.subr.mxu0 %v1164_v34  ;;  %5410 = vmatpush3.msra.mxu1 %v1263_v33  ;;  %v6149_v33 = vmov 1934713408  }
  0xd5   : > { %5377 = vmatpush3.msra.mxu0 %v1164_v34  ;;  %5411 = vmatprep.subr.mxu1 %v1262_v35  ;;  %v1515_v34 = vunpack.c.l.s4 %v6149_v33 }
  0xd6   : > { %5378 = vmatprep.subr.mxu0 %v1163_v36  ;;  %5412 = vmatpush3.msra.mxu1 %v1262_v35  ;;  %v1484_v35 = vunpack.c.0.s8 %v1483_v31 }
  0xd7   : > { %5379 = vmatpush3.msra.mxu0 %v1163_v36  ;;  %5413 = vmatprep.subr.mxu1 %v1261_v37  ;;  %v6732_v36 = vshrl.u32 %v1485_v32, 7 }
  0xd8   : > { %5380 = vmatprep.subr.mxu0 %v1162_v38  ;;  %5414 = vmatpush3.msra.mxu1 %v1261_v37 }
  0xd9   : > { %5381 = vmatpush3.msra.mxu0 %v1162_v38  ;;  %5415 = vmatprep.subr.mxu1 %v1260_v39 }
  0xda   : > { %5382 = vmatprep.subr.mxu0 %v1161_v40  ;;  %5416 = vmatpush3.msra.mxu1 %v1260_v39  ;;  %v1516_v39 = vunpack.c.0.s8 %v1515_v34 }
  0xdb   : > { %5383 = vmatpush3.msra.mxu0 %v1161_v40  ;;  %5417 = vmatprep.subr.mxu1 %v1259_v41  ;;  %v6735_v40 = vsub.s32 %v1484_v35, %v6732_v36 }
  0xdc   : > { %5384 = vmatprep.subr.mxu0 %v1160_v42  ;;  %5418 = vmatpush3.msra.mxu1 %v1259_v41 }
  0xdd   : > { %5385 = vmatpush3.msra.mxu0 %v1160_v42  ;;  %5419 = vmatprep.subr.mxu1 %v1258_v43 }
  0xde   : > { %5420 = vmatpush3.msra.mxu1 %v1258_v43  ;;  %5424 = vmatprep.subr.mxu0 %v1373_v44 }
  0xdf   : > { %5459 = vmatprep.subr.mxu1 %v6146_v23 }
 0x14c   : > { %v1122_v9 = vpop.xlane.xlu0 %1121 }
 0x14d   : > { %v1126_v10 = vmul.f32 0.0078125, %v1122_v9  ;;  %v1360_v9 = vld [vmem:[%s6536_s1 + $0x10] sm:$0xff] }
 0x14f   : > { %v6611_v11 = vsub.f32 %v1117_v2, %v1126_v10  ;;  %v1367_v2 = vld [vmem:[%s6536_s1 + $0x48] sm:$0xff] }
 0x150   : > { %v1124_v12 = vpop.xlane.xlu0 %1123  ;;  %v1359_v10 = vld [vmem:[%s6536_s1 + $0x8] sm:$0xff] }
 0x151   : > { %v1127_v13 = vmul.f32 0.0078125, %v1124_v12  ;;  %v1130_v14 = vmul.f32 %v6611_v11, %v6611_v11  ;;  %v5099_v12 = vld [vmem:[%s7501_s6] ss:$0 sm:$0xff] }
 0x153   : > { %v6615_v15 = vsub.f32 %v1118_v3, %v1127_v13  ;;  %1132 = vadd.xlane.f32.xlu1 %v1130_v14  ;;  %v1366_v3 = vld [vmem:[%s6536_s1 + $0x40] sm:$0xff] }
 0x155   : > { %v1131_v16 = vmul.f32 %v6615_v15, %v6615_v15 }
 0x157   : > { %1134 = vadd.xlane.f32.xlu1 %v1131_v16  ;;  %v5098_v16 = vld [vmem:[%s7503_s29] ss:$0 sm:$0xff] }
 0x1dc   : > { %v1133_v45 = vpop.xlane.xlu1 %1132 }
 0x1dd   : > { %v1136_v46 = vmul.f32 0.0078125, %v1133_v45 }
 0x1df   : > { %v1138_v47 = vadd.f32 1e-05, %v1136_v46 }
 0x1e0   : > { %v1135_v48 = vpop.xlane.xlu1 %1134 }
 0x1e1   : > { %5712 = vrsqrt.f32 %v1138_v47  ;;  %v1137_v49 = vmul.f32 0.0078125, %v1135_v48  ;;  %v6738_v47 = vsub.s32 %v1516_v39, %v6732_v36 }
 0x1e3   : > { %v1139_v50 = vadd.f32 1e-05, %v1137_v49 }
 0x1e5   : > { %5714 = vrsqrt.f32 %v1139_v50 }
 0x1ee   : > { %v5713_v51 = vpop.eup %5712 }
 0x1ef   : > { %v1142_v53 = vmul.f32 %v5713_v51, %v6611_v11  ;;  %v1358_v11 = vld [vmem:[%s6536_s1] sm:$0xff]  ;;  %s6143_s1 = smov 64  }
 0x1f1   : > { %v1150_v55 = vmul.f32 %v5096_v52, %v1142_v53 }
 0x1f2   : > { %v5715_v56 = vpop.eup %5714 }
 0x1f3   : > { %v1158_v57 = vadd.f32 %v5097_v54, %v1150_v55  ;;  %v1143_v58 = vmul.f32 %v5715_v56, %v6615_v15 }
 0x1f5   : > { %5386 = vmatprep.mubr.f32.mxu0 %v1158_v57  ;;  %5421 = vmatprep.mubr.f32.mxu1 %v1158_v57  ;;  %v1151_v59 = vmul.f32 %v5096_v52, %v1143_v58 }
 0x1f7   : > { %v1159_v60 = vadd.f32 %v5097_v54, %v1151_v59 }
 0x1f9   : > { %5387 = vmatmul.mubr.f32.vlgmr.msra.gmra.mxu0 %v1159_v60  ;;  %5422 = vmatmul.mubr.f32.vlgmr.msra.gmra.mxu1 %v1159_v60 }
 0x1fa   : > { %5425 = vmatpush3.msra.mxu0 %v1373_v44  ;;  %5456 = vmatprep.mubr.f32.mxu0 %v1158_v57 }
 0x1fb   : > { %5426 = vmatprep.subr.mxu0 %v1372_v61  ;;  %5461 = vmatprep.mubr.msk.f32.mxu1 %vm6147_vm0, %v6146_v23 }
 0x1fc   : > { %5427 = vmatpush3.msra.mxu0 %v1372_v61 }
 0x1fd   : > { %5428 = vmatprep.subr.mxu0 %v1371_v62 }
 0x1fe   : > { %5429 = vmatpush3.msra.mxu0 %v1371_v62 }
 0x1ff   : > { %5430 = vmatprep.subr.mxu0 %v1370_v63 }
 0x200   : > { %5431 = vmatpush3.msra.mxu0 %v1370_v63 }
 0x201   : > { %5432 = vmatprep.subr.mxu0 %v1369_v0 }
 0x202   : > { %5433 = vmatpush3.msra.mxu0 %v1369_v0 }
 0x203   : > { %5434 = vmatprep.subr.mxu0 %v1368_v1 }
 0x204   : > { %5435 = vmatpush3.msra.mxu0 %v1368_v1 }
 0x205   : > { %5436 = vmatprep.subr.mxu0 %v1367_v2 }
 0x206   : > { %5437 = vmatpush3.msra.mxu0 %v1367_v2 }
 0x207   : > { %5438 = vmatprep.subr.mxu0 %v1366_v3 }
 0x208   : > { %5439 = vmatpush3.msra.mxu0 %v1366_v3 }
 0x209   : > { %5440 = vmatprep.subr.mxu0 %v1365_v4 }
 0x20a   : > { %5441 = vmatpush3.msra.mxu0 %v1365_v4 }
 0x20b   : > { %5442 = vmatprep.subr.mxu0 %v1364_v5 }
 0x20c   : > { %5443 = vmatpush3.msra.mxu0 %v1364_v5 }
 0x20d   : > { %5444 = vmatprep.subr.mxu0 %v1363_v6 }
 0x20e   : > { %5445 = vmatpush3.msra.mxu0 %v1363_v6 }
 0x20f   : > { %5446 = vmatprep.subr.mxu0 %v1362_v7 }
 0x210   : > { %5447 = vmatpush3.msra.mxu0 %v1362_v7 }
 0x211   : > { %5448 = vmatprep.subr.mxu0 %v1361_v8 }
 0x212   : > { %5449 = vmatpush3.msra.mxu0 %v1361_v8 }
 0x213   : > { %5450 = vmatprep.subr.mxu0 %v1360_v9 }
 0x214   : > { %5451 = vmatpush3.msra.mxu0 %v1360_v9 }
 0x215   : > { %5452 = vmatprep.subr.mxu0 %v1359_v10 }
 0x216   : > { %5453 = vmatpush3.msra.mxu0 %v1359_v10 }
 0x217   : > { %5454 = vmatprep.subr.mxu0 %v1358_v11 }
 0x218   : > { %5455 = vmatpush3.msra.mxu0 %v1358_v11 }
 0x219   : > { %5457 = vmatmul.mubr.f32.vlgmr.msra.gmra.mxu0 %v1159_v60 }
 0x2b9   : > { %v5388_v13 = vpop.f32.mrf.mxu0  ;;  %v5423_v14 = vpop.f32.mrf.mxu1 }
 0x2ba   : > { %v6679_v15 = vadd.f32 %v5423_v14, %v5099_v12  ;;  %v1255_v22 = vadd.f32 %v5388_v13, %v5098_v16 }
 0x2bb   : > { %v1249_v17 = vpop.f32.mrf.mxu0  ;;  %v1347_v18 = vpop.f32.mrf.mxu1 }
 0x2bc   : > { %1357 = vst [vmem:[%s6601_s19 + $0x8] sm:$0xff] %v6679_v15  ;;  %v1250_v19 = vadd.f32 %v5098_v16, %v1249_v17  ;;  %v1348_v20 = vadd.f32 %v5099_v12, %v1347_v18  ;;  %v6705_v24 = vmul.f32 0.17677669, %v1255_v22 }
 0x2be   : > { %1356 = vst [vmem:[%s6601_s19] sm:$0xff] %v1348_v20  ;;  %1760 = vrot.lane.b32.xlu1 %v1348_v20, %s6143_s1  ;;  %1754 = vrot.lane.b32.xlu0 %v1348_v20, %s6144_s28  ;;  %v6691_v21 = vmul.f32 0.17677669, %v1250_v19 }
 0x2c2   : > { %1766 = vrot.lane.b32.xlu1 %v1348_v20, %s6145_s16  ;;  %1468 = vrot.lane.b32.xlu0 %v6691_v21, %s6143_s1 }
 0x2c6   : > { %1756 = vrot.lane.b32.xlu0 %v6679_v15, %s6144_s28  ;;  %1462 = vrot.lane.b32.xlu1 %v6691_v21, %s6144_s28 }
 0x2ca   : > { %1768 = vrot.lane.b32.xlu0 %v6679_v15, %s6145_s16  ;;  %1474 = vrot.lane.b32.xlu1 %v6691_v21, %s6145_s16 }
 0x2ce   : > { %1470 = vrot.lane.b32.xlu0 %v6705_v24, %s6143_s1  ;;  %1762 = vrot.lane.b32.xlu1 %v6679_v15, %s6143_s1 }
 0x2d2   : > { %1464 = vrot.lane.b32.xlu1 %v6705_v24, %s6144_s28 }
 0x2d6   : > { %1476 = vrot.lane.b32.xlu1 %v6705_v24, %s6145_s16 }
 0x2d9   : > { %v5458_v26 = vpop.f32.mrf.mxu0 }
 0x2da   : > { %v6722_v27 = vadd.f32 %v5458_v26, %v5100_v25 }
 0x2db   : > { %v1447_v28 = vpop.f32.mrf.mxu0 }
 0x2dc   : > { %1457 = vst [vmem:[%s6603_s22 + $0x8] sm:$0xff] %v6722_v27  ;;  %v6726_v29 = vadd.f32 %v5100_v25, %v1447_v28 }
 0x2de   : > { %1456 = vst [vmem:[%s6603_s22] sm:$0xff] %v6726_v29  ;;  %2046 = vrot.lane.b32.xlu1 %v6726_v29, %s6144_s28 }
 0x330   : > { %v1761_v37 = vpop.permute.xlu1 %1760  ;;  %v1755_v38 = vpop.permute.xlu0 %1754 }
 0x331   : > { %v1772_v41 = vcombine.low %v1348_v20, %v1761_v37  ;;  %v1773_v42 = vcombine.high %v1348_v20, %v1761_v37 }
 0x333   : > { %v1780_v48 = vrot.slane %v1772_v41, %v6735_v40  ;;  %v1787_v49 = vrot.slane %v1773_v42, %v6735_v40 }
 0x334   : > { %v1767_v43 = vpop.permute.xlu1 %1766  ;;  %v1469_v44 = vpop.permute.xlu0 %1468 }
 0x335   : > { %v1788_v45 = vcombine.low %v1755_v38, %v1767_v43  ;;  %v1789_v46 = vcombine.high %v1755_v38, %v1767_v43  ;;  %v1480_v62 = vcombine.low %v6691_v21, %v1469_v44  ;;  %v1481_v63 = vcombine.high %v6691_v21, %v1469_v44 }
 0x337   : > { %v1796_v50 = vrot.slane %v1788_v45, %v6735_v40  ;;  %v1803_v51 = vrot.slane %v1789_v46, %v6735_v40  ;;  %v1488_v12 = vrot.slane %v1480_v62, %v6735_v40  ;;  %v1495_v13 = vrot.slane %v1481_v63, %v6735_v40 }
 0x338   : > { %v1757_v52 = vpop.permute.xlu0 %1756  ;;  %v1463_v53 = vpop.permute.xlu1 %1462 }
 0x339   : > { %v1804_v54 = vcombine.low %v1780_v48, %v1796_v50  ;;  %v1805_v55 = vcombine.high %v1780_v48, %v1796_v50  ;;  %v1820_v56 = vcombine.low %v1787_v49, %v1803_v51  ;;  %v1821_v57 = vcombine.high %v1787_v49, %v1803_v51 }
 0x33b   : > { %v1812_v58 = vrot.slane %v1804_v54, %v6738_v47  ;;  %v1819_v59 = vrot.slane %v1805_v55, %v6738_v47  ;;  %v1828_v60 = vrot.slane %v1820_v56, %v6738_v47  ;;  %v1835_v61 = vrot.slane %v1821_v57, %v6738_v47 }
 0x33c   : > { %v1769_v0 = vpop.permute.xlu0 %1768  ;;  %v1475_v1 = vpop.permute.xlu1 %1474 }
 0x33d   : > { %v1908_v2 = vcombine.low %v1812_v58, %v1819_v59  ;;  %v5105_v3 = vcombine.high %v1812_v58, %v1819_v59  ;;  %v1924_v4 = vcombine.low %v1828_v60, %v1835_v61  ;;  %v5106_v5 = vcombine.high %v1828_v60, %v1835_v61 }
 0x33e   : > { %v1856_v6 = vcombine.low %v1757_v52, %v1769_v0  ;;  %v1496_v7 = vcombine.low %v1463_v53, %v1475_v1  ;;  %v1497_v8 = vcombine.high %v1463_v53, %v1475_v1  ;;  %v1857_v11 = vcombine.high %v1757_v52, %v1769_v0 }
 0x33f   : > { %v6751_v9 = vrot.slane %v1908_v2, %v6735_v40  ;;  %v6754_v10 = vrot.slane %v5105_v3, %v6735_v40  ;;  %v6761_v18 = vrot.slane %v1924_v4, %v6735_v40  ;;  %v6764_v19 = vrot.slane %v5106_v5, %v6735_v40 }
 0x340   : > { %v1504_v14 = vrot.slane %v1496_v7, %v6735_v40  ;;  %v1511_v16 = vrot.slane %v1497_v8, %v6735_v40  ;;  %v1763_v17 = vpop.permute.xlu1 %1762  ;;  %v1864_v20 = vrot.slane %v1856_v6, %v6735_v40  ;;  %v1471_v28 = vpop.permute.xlu0 %1470  ;;  %v1871_v31 = vrot.slane %v1857_v11, %v6735_v40 }
 0x341   : > { %v1940_v30 = vcombine.low %v6751_v9, %v6754_v10  ;;  %v1840_v32 = vcombine.low %v6679_v15, %v1763_v17  ;;  %v1841_v33 = vcombine.high %v6679_v15, %v1763_v17  ;;  %v1956_v41 = vcombine.low %v6761_v18, %v6764_v19 }
 0x342   : > { %v1512_v21 = vcombine.low %v1488_v12, %v1504_v14  ;;  %v1513_v22 = vcombine.high %v1488_v12, %v1504_v14  ;;  %v1528_v25 = vcombine.low %v1495_v13, %v1511_v16  ;;  %v1529_v26 = vcombine.high %v1495_v13, %v1511_v16 }
 0x343   : > { %v1548_v42 = vcombine.low %v6705_v24, %v1471_v28  ;;  %v1848_v43 = vrot.slane %v1840_v32, %v6735_v40  ;;  %v1855_v44 = vrot.slane %v1841_v33, %v6735_v40  ;;  %v1941_v62 = vcombine.high %v6751_v9, %v6754_v10 }
 0x344   : > { %v1520_v34 = vrot.slane %v1512_v21, %v6738_v47  ;;  %v1527_v35 = vrot.slane %v1513_v22, %v6738_v47  ;;  %v1536_v37 = vrot.slane %v1528_v25, %v6738_v47  ;;  %v1543_v38 = vrot.slane %v1529_v26, %v6738_v47  ;;  %v1465_v39 = vpop.permute.xlu1 %1464 }
 0x345   : > { %v1872_v49 = vcombine.low %v1848_v43, %v1864_v20  ;;  %v1873_v50 = vcombine.high %v1848_v43, %v1864_v20  ;;  %v1888_v51 = vcombine.low %v1855_v44, %v1871_v31  ;;  %v1889_v52 = vcombine.high %v1855_v44, %v1871_v31 }
 0x346   : > { %v1616_v45 = vcombine.low %v1520_v34, %v1527_v35  ;;  %v5101_v15 = vcombine.high %v1520_v34, %v1527_v35  ;;  %v1632_v46 = vcombine.low %v1536_v37, %v1543_v38  ;;  %v5102_v48 = vcombine.high %v1536_v37, %v1543_v38 }
 0x347   : > { %v1880_v57 = vrot.slane %v1872_v49, %v6738_v47  ;;  %v1887_v58 = vrot.slane %v1873_v50, %v6738_v47  ;;  %v1896_v59 = vrot.slane %v1888_v51, %v6738_v47  ;;  %v1903_v60 = vrot.slane %v1889_v52, %v6738_v47 }
 0x348   : > { %v1623_v53 = vrot.slane %v1616_v45, %v6735_v40  ;;  %v1631_v54 = vrot.slane %v5101_v15, %v6735_v40  ;;  %v1639_v55 = vrot.slane %v1632_v46, %v6735_v40  ;;  %v1647_v56 = vrot.slane %v5102_v48, %v6735_v40  ;;  %v1477_v61 = vpop.permute.xlu1 %1476 }
 0x349   : > { %v1549_v63 = vcombine.high %v6705_v24, %v1471_v28  ;;  %v1957_v0 = vcombine.high %v6761_v18, %v6764_v19  ;;  %v1556_v2 = vrot.slane %v1548_v42, %v6735_v40  ;;  %v1976_v3 = vcombine.low %v1880_v57, %v1887_v58 }
 0x34a   : > { %v1648_v1 = vcombine.low %v1623_v53, %v1631_v54  ;;  %v1948_v4 = vrot.slane %v1940_v30, %v6738_v47  ;;  %v1964_v5 = vrot.slane %v1956_v41, %v6738_v47  ;;  %v1564_v6 = vcombine.low %v1465_v39, %v1477_v61 }
 0x34b   : > { %v1565_v7 = vcombine.high %v1465_v39, %v1477_v61  ;;  %v1664_v8 = vcombine.low %v1639_v55, %v1647_v56  ;;  %v5107_v11 = vcombine.high %v1880_v57, %v1887_v58  ;;  %v1992_v12 = vcombine.low %v1896_v59, %v1903_v60 }
 0x34c   : > { %v5108_v9 = vcombine.high %v1896_v59, %v1903_v60  ;;  %v1563_v24 = vrot.slane %v1549_v63, %v6735_v40  ;;  %v1972_v10 = vcombine.low %v1948_v4, %v1964_v5  ;;  %v1572_v13 = vrot.slane %v1564_v6, %v6735_v40 }
 0x34d   : > { %v1579_v14 = vrot.slane %v1565_v7, %v6735_v40  ;;  %v1649_v16 = vcombine.high %v1623_v53, %v1631_v54  ;;  %v1665_v17 = vcombine.high %v1639_v55, %v1647_v56  ;;  %v6801_v18 = vrot.slane %v1976_v3, %v6735_v40 }
 0x34e   : > { %v1656_v19 = vrot.slane %v1648_v1, %v6738_v47  ;;  %5460 = vmatpush3.xpose.msk.msra.mxu1 %vm2352_vm1, %v1972_v10  ;;  %v1580_v20 = vcombine.low %v1556_v2, %v1572_v13  ;;  %v1581_v21 = vcombine.high %v1556_v2, %v1572_v13  ;;  %v1991_v26 = vrot.slane %v5107_v11, %v6735_v40 }
 0x34f   : > { %v1596_v22 = vcombine.low %v1563_v24, %v1579_v14  ;;  %v1597_v25 = vcombine.high %v1563_v24, %v1579_v14  ;;  %v1999_v28 = vrot.slane %v1992_v12, %v6735_v40  ;;  %v2007_v30 = vrot.slane %v5108_v9, %v6735_v40  ;;  %5464 = vmatprep.subr.mxu1 %v6146_v23 }
 0x350   : > { %v1672_v31 = vrot.slane %v1664_v8, %v6738_v47  ;;  %v1588_v32 = vrot.slane %v1580_v20, %v6738_v47  ;;  %v1595_v33 = vrot.slane %v1581_v21, %v6738_v47  ;;  %v1973_v38 = vcombine.high %v1948_v4, %v1964_v5 }
 0x351   : > { %v1604_v34 = vrot.slane %v1596_v22, %v6738_v47  ;;  %v1611_v35 = vrot.slane %v1597_v25, %v6738_v47  ;;  %v1955_v39 = vrot.slane %v1941_v62, %v6738_v47  ;;  %v1971_v41 = vrot.slane %v1957_v0, %v6738_v47 }
 0x352   : > { %v1680_v37 = vcombine.low %v1656_v19, %v1672_v31  ;;  %v1684_v42 = vcombine.low %v1588_v32, %v1595_v33  ;;  %v5103_v43 = vcombine.high %v1588_v32, %v1595_v33  ;;  %v1681_v46 = vcombine.high %v1656_v19, %v1672_v31  ;;  %v2337_v32 = vld [vmem:[%s7505_s21 + $0x1] sm:$0x1] }
 0x353   : > { %v1700_v44 = vcombine.low %v1604_v34, %v1611_v35  ;;  %v5104_v45 = vcombine.high %v1604_v34, %v1611_v35  ;;  %v1663_v48 = vrot.slane %v1649_v16, %v6738_v47  ;;  %v1679_v49 = vrot.slane %v1665_v17, %v6738_v47  ;;  %v2336_v17 = vld [vmem:[%s7505_s21] sm:$0x1] }
 0x354   : > { %5462 = vmatmul.mubr.msk.f32.vlgmr.msra.gmra.mxu1 %vm2352_vm1, %v1680_v37  ;;  %v1691_v15 = vrot.slane %v1684_v42, %v6735_v40  ;;  %v1699_v50 = vrot.slane %v5103_v43, %v6735_v40  ;;  %v2008_v53 = vcombine.low %v6801_v18, %v1991_v26  ;;  %v2024_v54 = vcombine.low %v1999_v28, %v2007_v30 }
 0x355   : > { %5465 = vmatpush3.xpose.msk.msra.mxu1 %vm2352_vm1, %v1973_v38  ;;  %v1707_v51 = vrot.slane %v1700_v44, %v6735_v40  ;;  %v1715_v52 = vrot.slane %v5104_v45, %v6735_v40  ;;  %5466 = vmatprep.mubr.msk.f32.mxu1 %vm6147_vm0, %v6146_v23  ;;  %v1974_v55 = vcombine.low %v1955_v39, %v1971_v41  ;;  %v6874_v19 = vsub.s32 0, %v6732_v36 }
 0x356   : > { %5469 = vmatprep.subr.mxu1 %v6146_v23  ;;  %v1716_v56 = vcombine.low %v1691_v15, %v1699_v50  ;;  %v1682_v58 = vcombine.low %v1663_v48, %v1679_v49  ;;  %v1975_v59 = vcombine.high %v1955_v39, %v1971_v41  ;;  %v2016_v60 = vrot.slane %v2008_v53, %v6738_v47 }
 0x357   : > { %v1732_v57 = vcombine.low %v1707_v51, %v1715_v52  ;;  %v2032_v61 = vrot.slane %v2024_v54, %v6738_v47  ;;  %v1683_v62 = vcombine.high %v1663_v48, %v1679_v49  ;;  %v2009_v1 = vcombine.high %v6801_v18, %v1991_v26 }
 0x358   : > { %5467 = vmatmul.mubr.msk.f32.vlgmr.msra.gmra.mxu1 %vm2352_vm1, %v1681_v46  ;;  %v1724_v63 = vrot.slane %v1716_v56, %v6738_v47  ;;  %v2025_v2 = vcombine.high %v1999_v28, %v2007_v30  ;;  %v1717_v4 = vcombine.high %v1691_v15, %v1699_v50  ;;  %v1733_v5 = vcombine.high %v1707_v51, %v1715_v52 }
 0x359   : > { %5470 = vmatpush3.xpose.msk.msra.mxu1 %vm2352_vm1, %v1974_v55  ;;  %5471 = vmatprep.mubr.msk.f32.mxu1 %vm6147_vm0, %v6146_v23  ;;  %v1740_v0 = vrot.slane %v1732_v57, %v6738_v47  ;;  %v2040_v3 = vcombine.low %v2016_v60, %v2032_v61  ;;  %v2041_v7 = vcombine.high %v2016_v60, %v2032_v61  ;;  %v2338_v18 = vmul.f32 -10000.0, %v2336_v17 }
 0x35a   : > { %5474 = vmatprep.subr.mxu1 %v6146_v23  ;;  %v2023_v8 = vrot.slane %v2009_v1, %v6738_v47  ;;  %v2039_v11 = vrot.slane %v2025_v2, %v6738_v47  ;;  %v1731_v9 = vrot.slane %v1717_v4, %v6738_v47  ;;  %v1747_v24 = vrot.slane %v1733_v5, %v6738_v47 }
 0x35b   : > { %v1748_v6 = vcombine.low %v1724_v63, %v1740_v0  ;;  %v1749_v12 = vcombine.high %v1724_v63, %v1740_v0  ;;  %v2345_v20 = vrot.slane %v2338_v18, %v6874_v19  ;;  %v2339_v37 = vmul.f32 -10000.0, %v2337_v32 }
 0x35c   : > { %5472 = vmatmul.mubr.msk.f32.vlgmr.msra.gmra.mxu1 %vm2352_vm1, %v1682_v58  ;;  %v2042_v10 = vcombine.low %v2023_v8, %v2039_v11  ;;  %v1750_v13 = vcombine.low %v1731_v9, %v1747_v24  ;;  %v2043_v14 = vcombine.high %v2023_v8, %v2039_v11  ;;  %v1751_v16 = vcombine.high %v1731_v9, %v1747_v24 }
 0x35d   : > { %5475 = vmatpush3.xpose.msk.msra.mxu1 %vm2352_vm1, %v1975_v59  ;;  %5476 = vmatprep.mubr.msk.f32.mxu1 %vm6147_vm0, %v6146_v23  ;;  %v2349_v43 = vrot.slane %v2339_v37, %v6874_v19 }
 0x35e   : > { %5479 = vmatprep.subr.mxu1 %v6146_v23 }
 0x360   : > { %5477 = vmatmul.mubr.msk.f32.vlgmr.msra.gmra.mxu1 %vm2352_vm1, %v1683_v62  ;;  %v2047_v62 = vpop.permute.xlu1 %2046 }
 0x361   : > { %5480 = vmatpush3.xpose.msk.msra.mxu1 %vm2352_vm1, %v2040_v3  ;;  %5481 = vmatprep.mubr.msk.f32.mxu1 %vm6147_vm0, %v6146_v23 }
 0x362   : > { %5484 = vmatprep.subr.mxu1 %v6146_v23 }
 0x364   : > { %5482 = vmatmul.mubr.msk.f32.vlgmr.msra.gmra.mxu1 %vm2352_vm1, %v1748_v6 }
 0x365   : > { %5485 = vmatpush3.xpose.msk.msra.mxu1 %vm2352_vm1, %v2041_v7  ;;  %5486 = vmatprep.mubr.msk.f32.mxu1 %vm6147_vm0, %v6146_v23 }
 0x366   : > { %5489 = vmatprep.subr.mxu1 %v6146_v23 }
 0x368   : > { %5487 = vmatmul.mubr.msk.f32.vlgmr.msra.gmra.mxu1 %vm2352_vm1, %v1749_v12 }
 0x369   : > { %5490 = vmatpush3.xpose.msk.msra.mxu1 %vm2352_vm1, %v2042_v10  ;;  %5491 = vmatprep.mubr.msk.f32.mxu1 %vm6147_vm0, %v6146_v23 }
 0x36a   : > { %5494 = vmatprep.subr.mxu1 %v6146_v23 }
 0x36c   : > { %5492 = vmatmul.mubr.msk.f32.vlgmr.msra.gmra.mxu1 %vm2352_vm1, %v1750_v13 }
 0x36d   : > { %5495 = vmatpush3.xpose.msk.msra.mxu1 %vm2352_vm1, %v2043_v14  ;;  %5496 = vmatprep.mubr.msk.f32.mxu1 %vm6147_vm0, %v6146_v23 }
 0x36e   : > { %5499 = vmatprep.subr.mxu1 %v6146_v23 }
 0x370   : > { %5497 = vmatmul.mubr.msk.f32.vlgmr.msra.gmra.mxu1 %vm2352_vm1, %v1751_v16 }
 0x371   : > { %5501 = vmatprep.mubr.msk.f32.mxu1 %vm6147_vm0, %v6146_v23 }
 0x414   : > { %v2425_v21 = vpop.f32.mrf.mxu1 }
 0x415   : > { %v2426_v22 = vadd.f32 %v2425_v21, %v2345_v20 }
 0x416   : > { %v5463_v25 = vpop.f32.mrf.mxu1 }
 0x417   : > { %v2962_v26 = vsel %vm2961_vm2, %v2426_v22, -inf }
 0x418   : > { %2963 = vmax.xlane.f32.xlu0 %v2962_v26  ;;  %v2501_v28 = vpop.f32.mrf.mxu1 }
 0x419   : > { %v2502_v30 = vadd.f32 %v2501_v28, %v2345_v20 }
 0x41a   : > { %v5468_v31 = vpop.f32.mrf.mxu1 }
 0x41b   : > { %v2965_v33 = vsel %vm2961_vm2, %v2502_v30, -inf }
 0x41c   : > { %2966 = vmax.xlane.f32.xlu1 %v2965_v33  ;;  %v2577_v34 = vpop.f32.mrf.mxu1 }
 0x41d   : > { %v2578_v35 = vadd.f32 %v2577_v34, %v2345_v20 }
 0x41e   : > { %v5473_v38 = vpop.f32.mrf.mxu1 }
 0x41f   : > { %v2968_v39 = vsel %vm2961_vm2, %v2578_v35, -inf }
 0x420   : > { %2969 = vmax.xlane.f32.xlu0 %v2968_v39  ;;  %v2653_v41 = vpop.f32.mrf.mxu1 }
 0x421   : > { %v2654_v42 = vadd.f32 %v2653_v41, %v2345_v20 }
 0x422   : > { %v5478_v44 = vpop.f32.mrf.mxu1 }
 0x423   : > { %v2971_v45 = vsel %vm2961_vm2, %v2654_v42, -inf }
 0x424   : > { %2972 = vmax.xlane.f32.xlu0 %v2971_v45  ;;  %v2729_v15 = vpop.f32.mrf.mxu1 }
 0x425   : > { %v2730_v46 = vadd.f32 %v2729_v15, %v2349_v43 }
 0x426   : > { %v5483_v48 = vpop.f32.mrf.mxu1 }
 0x427   : > { %v2974_v49 = vsel %vm2961_vm2, %v2730_v46, -inf }
 0x428   : > { %2975 = vmax.xlane.f32.xlu0 %v2974_v49  ;;  %v2805_v50 = vpop.f32.mrf.mxu1 }
 0x429   : > { %v2806_v51 = vadd.f32 %v2805_v50, %v2349_v43 }
 0x42a   : > { %v5488_v52 = vpop.f32.mrf.mxu1 }
 0x42b   : > { %v2977_v53 = vsel %vm2961_vm2, %v2806_v51, -inf }
 0x42c   : > { %2978 = vmax.xlane.f32.xlu1 %v2977_v53  ;;  %v2881_v54 = vpop.f32.mrf.mxu1 }
 0x42d   : > { %v6887_v55 = vadd.f32 %v2881_v54, %v2349_v43 }
 0x42e   : > { %v5493_v56 = vpop.f32.mrf.mxu1 }
 0x42f   : > { %v2980_v57 = vsel %vm2961_vm2, %v6887_v55, -inf }
 0x430   : > { %2981 = vmax.xlane.f32.xlu0 %v2980_v57  ;;  %v2957_v58 = vpop.f32.mrf.mxu1 }
 0x431   : > { %v6891_v59 = vadd.f32 %v2957_v58, %v2349_v43 }
 0x432   : > { %v5498_v60 = vpop.f32.mrf.mxu1 }
 0x433   : > { %v2983_v61 = vsel %vm2961_vm2, %v6891_v59, -inf }
 0x434   : > { %2984 = vmax.xlane.f32.xlu1 %v2983_v61 }
 0x445   : > { %2058 = vrot.lane.b32.xlu1 %v6726_v29, %s6145_s16 }
 0x446   : > { %2052 = vrot.lane.b32.xlu0 %v6726_v29, %s6143_s1 }
 0x4a1   : > { %v2964_v63 = vpop.xlane.xlu0 %2963 }
 0x4a2   : > { %v2986_v0 = vsub.f32 %v2426_v22, %v2964_v63 }
 0x4a4   : > { %v2994_v1 = vmul.f32 1.442695, %v2986_v0 }
 0x4a5   : > { %v2967_v2 = vpop.xlane.xlu1 %2966 }
 0x4a6   : > { %5716 = vpow2.f32 %v2994_v1  ;;  %v2987_v3 = vsub.f32 %v2502_v30, %v2967_v2 }
 0x4a8   : > { %v2996_v4 = vmul.f32 1.442695, %v2987_v3 }
 0x4a9   : > { %v2970_v5 = vpop.xlane.xlu0 %2969 }
 0x4aa   : > { %5718 = vpow2.f32 %v2996_v4  ;;  %v2988_v6 = vsub.f32 %v2578_v35, %v2970_v5 }
 0x4ac   : > { %v2998_v7 = vmul.f32 1.442695, %v2988_v6 }
 0x4ad   : > { %v2973_v8 = vpop.xlane.xlu0 %2972 }
 0x4ae   : > { %5720 = vpow2.f32 %v2998_v7  ;;  %v2989_v11 = vsub.f32 %v2654_v42, %v2973_v8 }
 0x4b0   : > { %v3000_v12 = vmul.f32 1.442695, %v2989_v11 }
 0x4b1   : > { %v2976_v9 = vpop.xlane.xlu0 %2975 }
 0x4b2   : > { %5722 = vpow2.f32 %v3000_v12  ;;  %v2990_v24 = vsub.f32 %v2730_v46, %v2976_v9 }
 0x4b3   : > { %v6899_v10 = vpop.eup %5716 }
 0x4b4   : > { %v3002_v13 = vmul.f32 1.442695, %v2990_v24  ;;  %v3010_v14 = vsel %vm2961_vm2, %v6899_v10, 0.0 }
 0x4b5   : > { %3011 = vadd.xlane.f32.xlu0 %v3010_v14  ;;  %v2979_v16 = vpop.xlane.xlu1 %2978 }
 0x4b6   : > { %5724 = vpow2.f32 %v3002_v13  ;;  %v2991_v17 = vsub.f32 %v2806_v51, %v2979_v16 }
 0x4b7   : > { %v6903_v18 = vpop.eup %5718 }
 0x4b8   : > { %v3004_v20 = vmul.f32 1.442695, %v2991_v17  ;;  %v3013_v21 = vsel %vm2961_vm2, %v6903_v18, 0.0 }
 0x4b9   : > { %v2982_v22 = vpop.xlane.xlu0 %2981  ;;  %3014 = vadd.xlane.f32.xlu1 %v3013_v21 }
 0x4ba   : > { %5726 = vpow2.f32 %v3004_v20  ;;  %v2992_v13 = vsub.f32 %v6887_v55, %v2982_v22 }
 0x4bb   : > { %v6907_v25 = vpop.eup %5720 }
 0x4bc   : > { %v3016_v26 = vsel %vm2961_vm2, %v6907_v25, 0.0  ;;  %v3006_v14 = vmul.f32 1.442695, %v2992_v13 }
 0x4bd   : > { %3017 = vadd.xlane.f32.xlu0 %v3016_v26  ;;  %v2053_v28 = vpop.permute.xlu0 %2052  ;;  %v2985_v30 = vpop.xlane.xlu1 %2984 }
 0x4be   : > { %v2064_v32 = vcombine.low %v6726_v29, %v2053_v28  ;;  %v2065_v33 = vcombine.high %v6726_v29, %v2053_v28  ;;  %v2993_v16 = vsub.f32 %v6891_v59, %v2985_v30  ;;  %5728 = vpow2.f32 %v3006_v14 }
 0x4bf   : > { %v6911_v31 = vpop.eup %5722 }
 0x4c0   : > { %v3019_v34 = vsel %vm2961_vm2, %v6911_v31, 0.0  ;;  %v2072_v41 = vrot.slane %v2064_v32, %v6735_v40  ;;  %v2079_v42 = vrot.slane %v2065_v33, %v6735_v40  ;;  %v3008_v17 = vmul.f32 1.442695, %v2993_v16 }
 0x4c1   : > { %3020 = vadd.xlane.f32.xlu1 %v3019_v34  ;;  %v2059_v35 = vpop.permute.xlu1 %2058 }
 0x4c2   : > { %v2080_v37 = vcombine.low %v2047_v62, %v2059_v35  ;;  %v2081_v38 = vcombine.high %v2047_v62, %v2059_v35  ;;  %5730 = vpow2.f32 %v3008_v17 }
 0x4c3   : > { %v6917_v39 = vpop.eup %5724 }
 0x4c4   : > { %v2088_v43 = vrot.slane %v2080_v37, %v6735_v40  ;;  %v2095_v44 = vrot.slane %v2081_v38, %v6735_v40  ;;  %v3022_v29 = vsel %vm2961_vm2, %v6917_v39, 0.0 }
 0x4c5   : > { %3023 = vadd.xlane.f32.xlu0 %v3022_v29 }
 0x4c6   : > { %v2096_v45 = vcombine.low %v2072_v41, %v2088_v43  ;;  %v2097_v15 = vcombine.high %v2072_v41, %v2088_v43  ;;  %v2112_v46 = vcombine.low %v2079_v42, %v2095_v44  ;;  %v2113_v48 = vcombine.high %v2079_v42, %v2095_v44 }
 0x4c7   : > { %v6925_v49 = vpop.eup %5726 }
 0x4c8   : > { %v2104_v50 = vrot.slane %v2096_v45, %v6738_v47  ;;  %v2111_v51 = vrot.slane %v2097_v15, %v6738_v47  ;;  %v2120_v52 = vrot.slane %v2112_v46, %v6738_v47  ;;  %v2127_v53 = vrot.slane %v2113_v48, %v6738_v47 }
 0x4c9   : > { %v3025_v54 = vsel %vm2961_vm2, %v6925_v49, 0.0 }
 0x4ca   : > { %v2200_v56 = vcombine.low %v2104_v50, %v2111_v51  ;;  %v5109_v57 = vcombine.high %v2104_v50, %v2111_v51  ;;  %v2216_v58 = vcombine.low %v2120_v52, %v2127_v53  ;;  %v5110_v60 = vcombine.high %v2120_v52, %v2127_v53  ;;  %3026 = vadd.xlane.f32.xlu0 %v3025_v54 }
 0x4cb   : > { %v6950_v20 = vpop.eup %5728 }
 0x4cc   : > { %v2207_v61 = vrot.slane %v2200_v56, %v6735_v40  ;;  %v2215_v62 = vrot.slane %v5109_v57, %v6735_v40  ;;  %v2223_v63 = vrot.slane %v2216_v58, %v6735_v40  ;;  %v2231_v0 = vrot.slane %v5110_v60, %v6735_v40 }
 0x4cd   : > { %v3028_v21 = vsel %vm2961_vm2, %v6950_v20, 0.0 }
 0x4ce   : > { %v2232_v1 = vcombine.low %v2207_v61, %v2215_v62  ;;  %v2248_v2 = vcombine.low %v2223_v63, %v2231_v0  ;;  %v2233_v3 = vcombine.high %v2207_v61, %v2215_v62  ;;  %v2249_v4 = vcombine.high %v2223_v63, %v2231_v0 }
 0x4cf   : > { %v6954_v26 = vpop.eup %5730 }
 0x4d0   : > { %v2240_v5 = vrot.slane %v2232_v1, %v6738_v47  ;;  %v2256_v6 = vrot.slane %v2248_v2, %v6738_v47  ;;  %v2247_v7 = vrot.slane %v2233_v3, %v6738_v47  ;;  %v2263_v8 = vrot.slane %v2249_v4, %v6738_v47 }
 0x4d1   : > { %v3031_v28 = vsel %vm2961_vm2, %v6954_v26, 0.0 }
 0x4d2   : > { %2054 = vrot.lane.b32.xlu1 %v6722_v27, %s6143_s1  ;;  %v2264_v11 = vcombine.low %v2240_v5, %v2256_v6  ;;  %v2265_v12 = vcombine.high %v2240_v5, %v2256_v6  ;;  %v2266_v9 = vcombine.low %v2247_v7, %v2263_v8  ;;  %v2267_v24 = vcombine.high %v2247_v7, %v2263_v8 }
 0x4d4   : > { %5500 = vmatpush3.msra.mxu1 %v2264_v11 }
 0x4d5   : > { %5504 = vmatprep.subr.mxu1 %v6146_v23 }
 0x4d6   : > { %2060 = vrot.lane.b32.xlu1 %v6722_v27, %s6145_s16 }
 0x4e0   : > { %2048 = vrot.lane.b32.xlu0 %v6722_v27, %s6144_s28 }
 0x4fa   : > { %3029 = vadd.xlane.f32.xlu1 %v3028_v21 }
 0x4fe   : > { %3032 = vadd.xlane.f32.xlu1 %v3031_v28 }
 0x53e   : > { %v3012_v32 = vpop.xlane.xlu0 %3011 }
 0x53f   : > { %5732 = vrcp.f32 %v3012_v32 }
 0x542   : > { %v3015_v55 = vpop.xlane.xlu1 %3014 }
 0x543   : > { %5734 = vrcp.f32 %v3015_v55 }
 0x546   : > { %v3018_v59 = vpop.xlane.xlu0 %3017 }
 0x547   : > { %5736 = vrcp.f32 %v3018_v59 }
 0x54a   : > { %v3021_v22 = vpop.xlane.xlu1 %3020 }
 0x54b   : > { %5738 = vrcp.f32 %v3021_v22 }
 0x54c   : > { %v5733_v30 = vpop.eup %5732 }
 0x54d   : > { %v3042_v33 = vmul.f32 %v5733_v30, %v6899_v10 }
 0x54e   : > { %v3024_v34 = vpop.xlane.xlu0 %3023  ;;  %v2055_v37 = vpop.permute.xlu1 %2054 }
 0x54f   : > { %5502 = vmatmul.mubr.msk.f32.vlgmr.msra.gmra.mxu1 %vm2961_vm2, %v3042_v33  ;;  %v2132_v43 = vcombine.low %v6722_v27, %v2055_v37  ;;  %v2133_v44 = vcombine.high %v6722_v27, %v2055_v37  ;;  %5740 = vrcp.f32 %v3024_v34  ;;  %v3953_v34 = vld [vmem:[%s6543_s5 + $0x78] sm:$0xff]  ;;  %v3950_v37 = vld [vmem:[%s6543_s5 + $0x60] sm:$0xff] }
 0x550   : > { %v5735_v35 = vpop.eup %5734  ;;  %5505 = vmatpush3.msra.mxu1 %v2265_v12  ;;  %5506 = vmatprep.mubr.msk.f32.mxu1 %vm6147_vm0, %v6146_v23 }
 0x551   : > { %5509 = vmatprep.subr.mxu1 %v6146_v23  ;;  %v3043_v38 = vmul.f32 %v5735_v35, %v6903_v18  ;;  %v2147_v27 = vrot.slane %v2133_v44, %v6735_v40  ;;  %5539 = vmatprep.subr.mxu0 %v3953_v34  ;;  %v3951_v35 = vld [vmem:[%s6543_s5 + $0x68] sm:$0xff] }
 0x552   : > { %v2061_v29 = vpop.permute.xlu1 %2060  ;;  %5540 = vmatpush3.msra.mxu0 %v3953_v34 }
 0x553   : > { %v3027_v41 = vpop.xlane.xlu0 %3026  ;;  %5507 = vmatmul.mubr.msk.f32.vlgmr.msra.gmra.mxu1 %vm2961_vm2, %v3043_v38  ;;  %v3948_v38 = vld [vmem:[%s6543_s5 + $0x50] sm:$0xff] }
 0x554   : > { %v5737_v42 = vpop.eup %5736  ;;  %5510 = vmatpush3.msra.mxu1 %v2266_v9  ;;  %5511 = vmatprep.mubr.msk.f32.mxu1 %vm6147_vm0, %v6146_v23  ;;  %5742 = vrcp.f32 %v3027_v41  ;;  %v3947_v41 = vld [vmem:[%s6543_s5 + $0x48] sm:$0xff] }
 0x555   : > { %5514 = vmatprep.subr.mxu1 %v6146_v23  ;;  %v3044_v10 = vmul.f32 %v5737_v42, %v6907_v25  ;;  %v2140_v25 = vrot.slane %v2132_v43, %v6735_v40  ;;  %v3946_v42 = vld [vmem:[%s6543_s5 + $0x40] sm:$0xff]  ;;  %v3944_v43 = vld [vmem:[%s6543_s5 + $0x30] sm:$0xff] }
 0x557   : > { %v2049_v45 = vpop.permute.xlu0 %2048  ;;  %5512 = vmatmul.mubr.msk.f32.vlgmr.msra.gmra.mxu1 %vm2961_vm2, %v3044_v10  ;;  %v3945_v10 = vld [vmem:[%s6543_s5 + $0x38] sm:$0xff] }
 0x558   : > { %v5739_v18 = vpop.eup %5738  ;;  %v2148_v15 = vcombine.low %v2049_v45, %v2061_v29  ;;  %v2149_v46 = vcombine.high %v2049_v45, %v2061_v29  ;;  %5515 = vmatpush3.msra.mxu1 %v2267_v24  ;;  %5516 = vmatprep.mubr.msk.f32.mxu1 %vm6147_vm0, %v6146_v23 }
 0x559   : > { %v3045_v48 = vmul.f32 %v5739_v18, %v6911_v31  ;;  %5519 = vmatprep.subr.mxu1 %v6146_v23 }
 0x55a   : > { %v2156_v50 = vrot.slane %v2148_v15, %v6735_v40  ;;  %v2163_v51 = vrot.slane %v2149_v46, %v6735_v40 }
 0x55b   : > { %5517 = vmatmul.mubr.msk.f32.vlgmr.msra.gmra.mxu1 %vm2961_vm2, %v3045_v48 }
 0x55c   : > { %v2164_v52 = vcombine.low %v2140_v25, %v2156_v50  ;;  %v2165_v53 = vcombine.high %v2140_v25, %v2156_v50  ;;  %v2180_v54 = vcombine.low %v2147_v27, %v2163_v51  ;;  %v2181_v56 = vcombine.high %v2147_v27, %v2163_v51  ;;  %5521 = vmatprep.mubr.msk.f32.mxu1 %vm6147_vm0, %v6146_v23  ;;  %v5741_v7 = vpop.eup %5740 }
 0x55d   : > { %v3046_v13 = vmul.f32 %v5741_v7, %v6917_v39 }
 0x55e   : > { %v2172_v31 = vrot.slane %v2164_v52, %v6738_v47  ;;  %v2179_v57 = vrot.slane %v2165_v53, %v6738_v47  ;;  %v2188_v58 = vrot.slane %v2180_v54, %v6738_v47  ;;  %v2195_v60 = vrot.slane %v2181_v56, %v6738_v47 }
 0x560   : > { %v2268_v61 = vcombine.low %v2172_v31, %v2179_v57  ;;  %v5111_v62 = vcombine.high %v2172_v31, %v2179_v57  ;;  %v2284_v63 = vcombine.low %v2188_v58, %v2195_v60  ;;  %v5112_v0 = vcombine.high %v2188_v58, %v2195_v60 }
 0x561   : > { %v5743_v14 = vpop.eup %5742 }
 0x562   : > { %v2275_v1 = vrot.slane %v2268_v61, %v6735_v40  ;;  %v2283_v2 = vrot.slane %v5111_v62, %v6735_v40  ;;  %v2291_v3 = vrot.slane %v2284_v63, %v6735_v40  ;;  %v2299_v4 = vrot.slane %v5112_v0, %v6735_v40 }
 0x563   : > { %v3047_v28 = vmul.f32 %v5743_v14, %v6925_v49 }
 0x564   : > { %v2300_v5 = vcombine.low %v2275_v1, %v2283_v2  ;;  %v2316_v6 = vcombine.low %v2291_v3, %v2299_v4  ;;  %v2301_v12 = vcombine.high %v2275_v1, %v2283_v2  ;;  %v2317_v9 = vcombine.high %v2291_v3, %v2299_v4 }
 0x566   : > { %v2308_v8 = vrot.slane %v2300_v5, %v6738_v47  ;;  %v2324_v11 = vrot.slane %v2316_v6, %v6738_v47  ;;  %v2315_v17 = vrot.slane %v2301_v12, %v6738_v47  ;;  %v2331_v21 = vrot.slane %v2317_v9, %v6738_v47 }
 0x568   : > { %v2332_v24 = vcombine.low %v2308_v8, %v2324_v11  ;;  %v2333_v16 = vcombine.high %v2308_v8, %v2324_v11  ;;  %v2334_v39 = vcombine.low %v2315_v17, %v2331_v21  ;;  %v2335_v49 = vcombine.high %v2315_v17, %v2331_v21 }
 0x56a   : > { %5520 = vmatpush3.msra.mxu1 %v2332_v24 }
 0x56b   : > { %5522 = vmatmul.mubr.msk.f32.vlgmr.msra.gmra.mxu1 %vm2961_vm2, %v3046_v13  ;;  %5524 = vmatprep.subr.mxu1 %v6146_v23 }
 0x56c   : > { %5525 = vmatpush3.msra.mxu1 %v2333_v16  ;;  %5526 = vmatprep.mubr.msk.f32.mxu1 %vm6147_vm0, %v6146_v23 }
 0x56d   : > { %5529 = vmatprep.subr.mxu1 %v6146_v23 }
 0x56f   : > { %5527 = vmatmul.mubr.msk.f32.vlgmr.msra.gmra.mxu1 %vm2961_vm2, %v3047_v28 }
 0x570   : > { %5530 = vmatpush3.msra.mxu1 %v2334_v39  ;;  %5531 = vmatprep.mubr.msk.f32.mxu1 %vm6147_vm0, %v6146_v23 }
 0x571   : > { %5534 = vmatprep.subr.mxu1 %v6146_v23 }
 0x583   : > { %v3030_v32 = vpop.xlane.xlu1 %3029 }
 0x584   : > { %5744 = vrcp.f32 %v3030_v32 }
 0x587   : > { %v3033_v55 = vpop.xlane.xlu1 %3032 }
 0x588   : > { %5746 = vrcp.f32 %v3033_v55 }
 0x591   : > { %v5745_v59 = vpop.eup %5744 }
 0x592   : > { %v3048_v22 = vmul.f32 %v5745_v59, %v6950_v20  ;;  %v3952_v20 = vld [vmem:[%s6543_s5 + $0x70] sm:$0xff] }
 0x593   : > { %5541 = vmatprep.subr.mxu0 %v3952_v20 }
 0x594   : > { %5532 = vmatmul.mubr.msk.f32.vlgmr.msra.gmra.mxu1 %vm2961_vm2, %v3048_v22  ;;  %5542 = vmatpush3.msra.mxu0 %v3952_v20 }
 0x595   : > { %v5747_v30 = vpop.eup %5746  ;;  %5535 = vmatpush3.msra.mxu1 %v2335_v49  ;;  %5536 = vmatprep.mubr.msk.f32.mxu1 %vm6147_vm0, %v6146_v23 }
 0x596   : > { %v3049_v33 = vmul.f32 %v5747_v30, %v6954_v26  ;;  %5543 = vmatprep.subr.mxu0 %v3951_v35  ;;  %v3949_v26 = vld [vmem:[%s6543_s5 + $0x58] sm:$0xff] }
 0x597   : > { %5544 = vmatpush3.msra.mxu0 %v3951_v35 }
 0x598   : > { %5537 = vmatmul.mubr.msk.f32.vlgmr.msra.gmra.mxu1 %vm2961_vm2, %v3049_v33  ;;  %5545 = vmatprep.subr.mxu0 %v3950_v37 }
 0x599   : > { %4230 = vmatprep.mubr.f32.mxu1 %v6146_v23  ;;  %5546 = vmatpush3.msra.mxu0 %v3950_v37 }
 0x59a   : > { %5547 = vmatprep.subr.mxu0 %v3949_v26 }
 0x59b   : > { %5548 = vmatpush3.msra.mxu0 %v3949_v26 }
 0x59c   : > { %5549 = vmatprep.subr.mxu0 %v3948_v38 }
 0x59d   : > { %5550 = vmatpush3.msra.mxu0 %v3948_v38 }
 0x59e   : > { %5551 = vmatprep.subr.mxu0 %v3947_v41 }
 0x59f   : > { %5552 = vmatpush3.msra.mxu0 %v3947_v41 }
 0x5a0   : > { %5553 = vmatprep.subr.mxu0 %v3946_v42 }
 0x5a1   : > { %5554 = vmatpush3.msra.mxu0 %v3946_v42 }
 0x5a2   : > { %5555 = vmatprep.subr.mxu0 %v3945_v10 }
 0x5a3   : > { %5556 = vmatpush3.msra.mxu0 %v3945_v10 }
 0x5a4   : > { %5557 = vmatprep.subr.mxu0 %v3944_v43 }
 0x5a5   : > { %5558 = vmatpush3.msra.mxu0 %v3944_v43 }
 0x60f   : > { %v3119_v44 = vpop.f32.mrf.mxu1 }
 0x611   : > { %v5503_v29 = vpop.f32.mrf.mxu1 }
 0x613   : > { %v3192_v45 = vpop.f32.mrf.mxu1 }
 0x615   : > { %v5508_v18 = vpop.f32.mrf.mxu1 }
 0x617   : > { %v3265_v15 = vpop.f32.mrf.mxu1 }
 0x618   : > { %v3634_v46 = vcombine.low %v3119_v44, %v3265_v15  ;;  %v3635_v48 = vcombine.high %v3119_v44, %v3265_v15 }
 0x619   : > { %v5513_v25 = vpop.f32.mrf.mxu1 }
 0x61a   : > { %v3642_v53 = vrot.slane %v3634_v46, %v6735_v40  ;;  %v3649_v54 = vrot.slane %v3635_v48, %v6735_v40 }
 0x61b   : > { %v3338_v27 = vpop.f32.mrf.mxu1 }
 0x61c   : > { %v3650_v50 = vcombine.low %v3192_v45, %v3338_v27  ;;  %v3651_v51 = vcombine.high %v3192_v45, %v3338_v27 }
 0x61d   : > { %v5518_v52 = vpop.f32.mrf.mxu1 }
 0x61e   : > { %v3658_v56 = vrot.slane %v3650_v50, %v6735_v40  ;;  %v3665_v31 = vrot.slane %v3651_v51, %v6735_v40 }
 0x620   : > { %v3666_v57 = vcombine.low %v3642_v53, %v3658_v56  ;;  %v3667_v58 = vcombine.high %v3642_v53, %v3658_v56  ;;  %v3682_v60 = vcombine.low %v3649_v54, %v3665_v31  ;;  %v3683_v61 = vcombine.high %v3649_v54, %v3665_v31  ;;  %v3943_v54 = vld [vmem:[%s6543_s5 + $0x28] sm:$0xff]  ;;  %v3942_v56 = vld [vmem:[%s6543_s5 + $0x20] sm:$0xff] }
 0x621   : > { %5559 = vmatprep.subr.mxu0 %v3943_v54 }
 0x622   : > { %v3674_v62 = vrot.slane %v3666_v57, %v6738_v47  ;;  %v3681_v63 = vrot.slane %v3667_v58, %v6738_v47  ;;  %v3690_v0 = vrot.slane %v3682_v60, %v6738_v47  ;;  %v3697_v1 = vrot.slane %v3683_v61, %v6738_v47  ;;  %5560 = vmatpush3.msra.mxu0 %v3943_v54  ;;  %v3941_v61 = vld [vmem:[%s6543_s5 + $0x18] sm:$0xff] }
 0x623   : > { %5561 = vmatprep.subr.mxu0 %v3942_v56 }
 0x624   : > { %v3770_v2 = vcombine.low %v3674_v62, %v3681_v63  ;;  %v5137_v3 = vcombine.high %v3674_v62, %v3681_v63  ;;  %v3786_v4 = vcombine.low %v3690_v0, %v3697_v1  ;;  %v5138_v5 = vcombine.high %v3690_v0, %v3697_v1  ;;  %5562 = vmatpush3.msra.mxu0 %v3942_v56 }
 0x625   : > { %5563 = vmatprep.subr.mxu0 %v3941_v61 }
 0x626   : > { %v3777_v6 = vrot.slane %v3770_v2, %v6735_v40  ;;  %v3785_v7 = vrot.slane %v5137_v3, %v6735_v40  ;;  %v3793_v8 = vrot.slane %v3786_v4, %v6735_v40  ;;  %v3801_v11 = vrot.slane %v5138_v5, %v6735_v40  ;;  %v3940_v2 = vld [vmem:[%s6543_s5 + $0x10] sm:$0xff]  ;;  %5564 = vmatpush3.msra.mxu0 %v3941_v61 }
 0x627   : > { %5565 = vmatprep.subr.mxu0 %v3940_v2 }
 0x628   : > { %v3802_v12 = vcombine.low %v3777_v6, %v3785_v7  ;;  %v3818_v9 = vcombine.low %v3793_v8, %v3801_v11  ;;  %v3803_v24 = vcombine.high %v3777_v6, %v3785_v7  ;;  %v3819_v13 = vcombine.high %v3793_v8, %v3801_v11  ;;  %v3939_v6 = vld [vmem:[%s6543_s5 + $0x8] sm:$0xff]  ;;  %5566 = vmatpush3.msra.mxu0 %v3940_v2  ;;  %v3938_v11 = vld [vmem:[%s6543_s5] sm:$0xff]  ;;  %v4130_v2 = vld [vmem:[%s6546_s2 + $0x190] sm:$0xff] }
 0x629   : > { %5567 = vmatprep.subr.mxu0 %v3939_v6 }
 0x62a   : > { %v7036_v14 = vrot.slane %v3802_v12, %v6738_v47  ;;  %v7039_v16 = vrot.slane %v3818_v9, %v6738_v47  ;;  %v7042_v17 = vrot.slane %v3803_v24, %v6738_v47  ;;  %v7045_v21 = vrot.slane %v3819_v13, %v6738_v47  ;;  %5568 = vmatpush3.msra.mxu0 %v3939_v6  ;;  %v4121_v6 = vld [vmem:[%s6546_s2 + $0x148] sm:$0xff] }
 0x62b   : > { %v3411_v28 = vpop.f32.mrf.mxu1  ;;  %5569 = vmatprep.subr.mxu0 %v3938_v11 }
 0x62c   : > { %v3834_v39 = vcombine.low %v7036_v14, %v7039_v16  ;;  %v3835_v32 = vcombine.high %v7036_v14, %v7039_v16  ;;  %v3836_v55 = vcombine.low %v7042_v17, %v7045_v21  ;;  %v3837_v59 = vcombine.high %v7042_v17, %v7045_v21  ;;  %5570 = vmatpush3.msra.mxu0 %v3938_v11  ;;  %v5141_v14 = vld [vmem:[%s1092_s13] ss:$0 sm:$0xff]  ;;  %v5784_v16 = vld [vmem:[#allocation14 + $0x8] sm:$0xff] }
 0x62d   : > { %v5523_v22 = vpop.f32.mrf.mxu1  ;;  %v4122_v11 = vld [vmem:[%s6546_s2 + $0x150] sm:$0xff] }
 0x62f   : > { %v3484_v49 = vpop.f32.mrf.mxu1 }
 0x631   : > { %v5528_v30 = vpop.f32.mrf.mxu1 }
 0x654   : > { %v3557_v33 = vpop.f32.mrf.mxu1 }
 0x655   : > { %v3702_v20 = vcombine.low %v3411_v28, %v3557_v33  ;;  %v3703_v35 = vcombine.high %v3411_v28, %v3557_v33 }
 0x656   : > { %v5533_v34 = vpop.f32.mrf.mxu1 }
 0x657   : > { %v3710_v42 = vrot.slane %v3702_v20, %v6735_v40  ;;  %v3717_v10 = vrot.slane %v3703_v35, %v6735_v40 }
 0x658   : > { %v3630_v37 = vpop.f32.mrf.mxu1 }
 0x659   : > { %v3718_v26 = vcombine.low %v3484_v49, %v3630_v37  ;;  %v3719_v38 = vcombine.high %v3484_v49, %v3630_v37 }
 0x65a   : > { %v5538_v41 = vpop.f32.mrf.mxu1 }
 0x65b   : > { %v3726_v43 = vrot.slane %v3718_v26, %v6735_v40  ;;  %v3733_v44 = vrot.slane %v3719_v38, %v6735_v40 }
 0x65d   : > { %v3734_v29 = vcombine.low %v3710_v42, %v3726_v43  ;;  %v3735_v45 = vcombine.high %v3710_v42, %v3726_v43  ;;  %v3750_v18 = vcombine.low %v3717_v10, %v3733_v44  ;;  %v3751_v15 = vcombine.high %v3717_v10, %v3733_v44  ;;  %v5785_v10 = vld [vmem:[#allocation14] sm:$0xff] }
 0x65f   : > { %v3742_v46 = vrot.slane %v3734_v29, %v6738_v47  ;;  %v3749_v48 = vrot.slane %v3735_v45, %v6738_v47  ;;  %v3758_v25 = vrot.slane %v3750_v18, %v6738_v47  ;;  %v3765_v27 = vrot.slane %v3751_v15, %v6738_v47  ;;  %v4141_v29 = vld [vmem:[%s6546_s2 + $0x1e8] sm:$0xff]  ;;  %v4143_v45 = vld [vmem:[%s6546_s2 + $0x1f8] sm:$0xff]  ;;  %v4140_v18 = vld [vmem:[%s6546_s2 + $0x1e0] sm:$0xff] }
 0x660   : > { %4166 = vmatprep.subr.mxu1 %v4141_v29  ;;  %4243 = vmatprep.subr.mxu0 %v4143_v45  ;;  %v4142_v15 = vld [vmem:[%s6546_s2 + $0x1f0] sm:$0xff]  ;;  %v4089_v45 = vld [vmem:[%s6546_s2 + $0x48] sm:$0xff] }
 0x661   : > { %v3838_v50 = vcombine.low %v3742_v46, %v3749_v48  ;;  %v5139_v51 = vcombine.high %v3742_v46, %v3749_v48  ;;  %v3854_v52 = vcombine.low %v3758_v25, %v3765_v27  ;;  %v5140_v53 = vcombine.high %v3758_v25, %v3765_v27  ;;  %v4137_v46 = vld [vmem:[%s6546_s2 + $0x1c8] sm:$0xff]  ;;  %v4139_v48 = vld [vmem:[%s6546_s2 + $0x1d8] sm:$0xff]  ;;  %4167 = vmatpush1.msra.mxu1 %v4140_v18  ;;  %v4136_v25 = vld [vmem:[%s6546_s2 + $0x1c0] sm:$0xff] }
 0x662   : > { %v4138_v27 = vld [vmem:[%s6546_s2 + $0x1d0] sm:$0xff]  ;;  %4168 = vmatprep.subr.mxu1 %v4137_v46  ;;  %v4091_v18 = vld [vmem:[%s6546_s2 + $0x58] sm:$0xff] }
 0x663   : > { %v3845_v31 = vrot.slane %v3838_v50, %v6735_v40  ;;  %v3853_v57 = vrot.slane %v5139_v51, %v6735_v40  ;;  %v3861_v58 = vrot.slane %v3854_v52, %v6735_v40  ;;  %v3869_v60 = vrot.slane %v5140_v53, %v6735_v40  ;;  %v4133_v50 = vld [vmem:[%s6546_s2 + $0x1a8] sm:$0xff]  ;;  %v4135_v51 = vld [vmem:[%s6546_s2 + $0x1b8] sm:$0xff]  ;;  %v4132_v52 = vld [vmem:[%s6546_s2 + $0x1a0] sm:$0xff]  ;;  %4169 = vmatpush1.msra.mxu1 %v4136_v25 }
 0x664   : > { %v4134_v53 = vld [vmem:[%s6546_s2 + $0x1b0] sm:$0xff]  ;;  %4170 = vmatprep.subr.mxu1 %v4133_v50  ;;  %v4087_v25 = vld [vmem:[%s6546_s2 + $0x38] sm:$0xff] }
 0x665   : > { %v3870_v62 = vcombine.low %v3845_v31, %v3853_v57  ;;  %v3886_v63 = vcombine.low %v3861_v58, %v3869_v60  ;;  %v3871_v0 = vcombine.high %v3845_v31, %v3853_v57  ;;  %v3887_v1 = vcombine.high %v3861_v58, %v3869_v60  ;;  %4171 = vmatpush1.msra.mxu1 %v4132_v52  ;;  %v4094_v29 = vld [vmem:[%s6546_s2 + $0x70] sm:$0xff]  ;;  %v4083_v52 = vld [vmem:[%s6546_s2 + $0x18] sm:$0xff] }
 0x666   : > { %v4090_v46 = vld [vmem:[%s6546_s2 + $0x50] sm:$0xff] }
 0x667   : > { %v3878_v3 = vrot.slane %v3870_v62, %v6738_v47  ;;  %v3894_v4 = vrot.slane %v3886_v63, %v6738_v47  ;;  %v3885_v5 = vrot.slane %v3871_v0, %v6738_v47  ;;  %v3901_v40 = vrot.slane %v3887_v1, %v6738_v47  ;;  %v4129_v63 = vld [vmem:[%s6546_s2 + $0x188] sm:$0xff]  ;;  %v4131_v0 = vld [vmem:[%s6546_s2 + $0x198] sm:$0xff]  ;;  %v4128_v1 = vld [vmem:[%s6546_s2 + $0x180] sm:$0xff] }
 0x668   : > { %4172 = vmatprep.subr.mxu1 %v4129_v63  ;;  %v4086_v50 = vld [vmem:[%s6546_s2 + $0x30] sm:$0xff] }
 0x669   : > { %v3903_v7 = vcombine.high %v3878_v3, %v3894_v4  ;;  %v3902_v8 = vcombine.low %v3878_v3, %v3894_v4  ;;  %v3904_v9 = vcombine.low %v3885_v5, %v3901_v40  ;;  %v3905_v24 = vcombine.high %v3885_v5, %v3901_v40  ;;  %4173 = vmatpush1.msra.mxu1 %v4128_v1  ;;  %v4125_v3 = vld [vmem:[%s6546_s2 + $0x168] sm:$0xff]  ;;  %v4127_v4 = vld [vmem:[%s6546_s2 + $0x178] sm:$0xff]  ;;  %v4124_v5 = vld [vmem:[%s6546_s2 + $0x160] sm:$0xff] }
 0x66a   : > { %4174 = vmatprep.subr.mxu1 %v4125_v3  ;;  %v4126_v40 = vld [vmem:[%s6546_s2 + $0x170] sm:$0xff] }
 0x66b   : > { %v5697_v12 = vpack.i.bf16 %v3903_v7, %v3835_v32  ;;  %v5702_v47 = vpack.i.bf16 %v3904_v9, %v3836_v55  ;;  %v5707_v13 = vpack.i.bf16 %v3905_v24, %v3837_v59  ;;  %v4123_v7 = vld [vmem:[%s6546_s2 + $0x158] sm:$0xff]  ;;  %4175 = vmatpush1.msra.mxu1 %v4124_v5  ;;  %v4118_v24 = vld [vmem:[%s6546_s2 + $0x130] sm:$0xff] }
 0x66c   : > { %4176 = vmatprep.subr.mxu1 %v4121_v6  ;;  %v4119_v9 = vld [vmem:[%s6546_s2 + $0x138] sm:$0xff] }
 0x66d   : > { %5698 = vrot.lane.b32.xlu0 %v5697_v12, %s6145_s16  ;;  %v4117_v12 = vld [vmem:[%s6546_s2 + $0x128] sm:$0xff] }
 0x671   : > { %5703 = vrot.lane.b32.xlu0 %v5702_v47, %s6143_s1  ;;  %v4116_v47 = vld [vmem:[%s6546_s2 + $0x120] sm:$0xff]  ;;  %s7511_s1 = sld [smem:[#allocation53_spill]] (!%p5153_p11) }
 0x675   : > { %5708 = vrot.lane.b32.xlu0 %v5707_v13, %s6144_s28  ;;  %v4113_v13 = vld [vmem:[%s6546_s2 + $0x108] sm:$0xff] }
 0x6df   : > { %v5699_v28 = vpop.permute.xlu0 %5698 }
 0x6e0   : > { %v5701_v22 = vunpack.i.h.bf16 %v5699_v28  ;;  %v5700_v49 = vunpack.i.l.bf16 %v5699_v28  ;;  %v4115_v28 = vld [vmem:[%s6546_s2 + $0x118] sm:$0xff] }
 0x6e2   : > { %v3931_v55 = vsel %vm2352_vm1, %v3902_v8, %v5701_v22  ;;  %v3930_v17 = vsel %vm2352_vm1, %v3834_v39, %v5700_v49  ;;  %v4120_v8 = vld [vmem:[%s6546_s2 + $0x140] sm:$0xff]  ;;  %v4114_v22 = vld [vmem:[%s6546_s2 + $0x110] sm:$0xff]  ;;  %v4109_v49 = vld [vmem:[%s6546_s2 + $0xe8] sm:$0xff] }
 0x6e3   : > { %v5704_v32 = vpop.permute.xlu0 %5703  ;;  %4177 = vmatpush1.msra.mxu1 %v4120_v8  ;;  %v4439_v8 = vld [vmem:[%s6599_s0 + $0x1f8] sm:$0xff] }
 0x6e4   : > { %v5706_v30 = vunpack.i.h.bf16 %v5704_v32  ;;  %v5705_v33 = vunpack.i.l.bf16 %v5704_v32  ;;  %4178 = vmatprep.subr.mxu1 %v4117_v12  ;;  %v4112_v32 = vld [vmem:[%s6546_s2 + $0x100] sm:$0xff]  ;;  %v4423_v12 = vld [vmem:[%s6599_s0 + $0x178] sm:$0xff] }
 0x6e5   : > { %4179 = vmatpush1.msra.mxu1 %v4116_v47  ;;  %v4390_v47 = vld [vmem:[%s6599_s0 + $0x70] sm:$0xff] }
 0x6e6   : > { %v3933_v21 = vsel %vm3932_vm3, %v3930_v17, %v5705_v33  ;;  %v3934_v59 = vsel %vm3932_vm3, %v3931_v55, %v5706_v30  ;;  %v4111_v30 = vld [vmem:[%s6546_s2 + $0xf8] sm:$0xff]  ;;  %4180 = vmatprep.subr.mxu1 %v4113_v13  ;;  %v4108_v33 = vld [vmem:[%s6546_s2 + $0xe0] sm:$0xff]  ;;  %v4105_v55 = vld [vmem:[%s6546_s2 + $0xc8] sm:$0xff] }
 0x6e7   : > { %v5709_v34 = vpop.permute.xlu0 %5708  ;;  %4181 = vmatpush1.msra.mxu1 %v4112_v32  ;;  %v4106_v17 = vld [vmem:[%s6546_s2 + $0xd0] sm:$0xff]  ;;  %v4405_v13 = vld [vmem:[%s6599_s0 + $0xe8] sm:$0xff] }
 0x6e8   : > { %v5711_v20 = vunpack.i.h.bf16 %v5709_v34  ;;  %v5710_v35 = vunpack.i.l.bf16 %v5709_v34  ;;  %v4110_v34 = vld [vmem:[%s6546_s2 + $0xf0] sm:$0xff]  ;;  %4182 = vmatprep.subr.mxu1 %v4109_v49  ;;  %v4389_v32 = vld [vmem:[%s6599_s0 + $0x68] sm:$0xff]  ;;  %v4404_v49 = vld [vmem:[%s6599_s0 + $0xe0] sm:$0xff] }
 0x6e9   : > { %4183 = vmatpush1.msra.mxu1 %v4108_v33  ;;  %v4388_v33 = vld [vmem:[%s6599_s0 + $0x60] sm:$0xff] }
 0x6ea   : > { %v3936_v37 = vsel %vm3935_vm4, %v3933_v21, %v5710_v35  ;;  %v3937_v26 = vsel %vm3935_vm4, %v3934_v59, %v5711_v20  ;;  %v4107_v20 = vld [vmem:[%s6546_s2 + $0xd8] sm:$0xff]  ;;  %v4104_v35 = vld [vmem:[%s6546_s2 + $0xc0] sm:$0xff]  ;;  %v4101_v21 = vld [vmem:[%s6546_s2 + $0xa8] sm:$0xff]  ;;  %4184 = vmatprep.subr.mxu1 %v4105_v55 }
 0x6eb   : > { %5571 = vmatprep.mubr.f32.mxu0 %v3936_v37  ;;  %v4103_v59 = vld [vmem:[%s6546_s2 + $0xb8] sm:$0xff]  ;;  %v4100_v37 = vld [vmem:[%s6546_s2 + $0xa0] sm:$0xff]  ;;  %4185 = vmatpush1.msra.mxu1 %v4104_v35 }
 0x6ec   : > { %5572 = vmatmul.mubr.f32.vlgmr.msra.gmra.mxu0 %v3937_v26  ;;  %v4102_v26 = vld [vmem:[%s6546_s2 + $0xb0] sm:$0xff]  ;;  %4186 = vmatprep.subr.mxu1 %v4101_v21  ;;  %v4403_v55 = vld [vmem:[%s6599_s0 + $0xd8] sm:$0xff] }
 0x6ed   : > { %4307 = vmatprep.mubr.f32.mxu0 %v6146_v23  ;;  %4244 = vmatpush1.msra.mxu0 %v4142_v15  ;;  %v4088_v15 = vld [vmem:[%s6546_s2 + $0x40] sm:$0xff]  ;;  %v4387_v35 = vld [vmem:[%s6599_s0 + $0x58] sm:$0xff]  ;;  %v4402_v21 = vld [vmem:[%s6599_s0 + $0xd0] sm:$0xff] }
 0x6ee   : > { %4245 = vmatprep.subr.mxu0 %v4139_v48  ;;  %4187 = vmatpush1.msra.mxu1 %v4100_v37  ;;  %v4085_v48 = vld [vmem:[%s6546_s2 + $0x28] sm:$0xff]  ;;  %v4386_v37 = vld [vmem:[%s6599_s0 + $0x50] sm:$0xff] }
 0x6ef   : > { %4246 = vmatpush1.msra.mxu0 %v4138_v27  ;;  %v4084_v27 = vld [vmem:[%s6546_s2 + $0x20] sm:$0xff] }
 0x6f0   : > { %4247 = vmatprep.subr.mxu0 %v4135_v51  ;;  %v4081_v51 = vld [vmem:[%s6546_s2 + $0x8] sm:$0xff] }
 0x6f1   : > { %4248 = vmatpush1.msra.mxu0 %v4134_v53  ;;  %v4080_v53 = vld [vmem:[%s6546_s2] sm:$0xff] }
 0x6f2   : > { %4249 = vmatprep.subr.mxu0 %v4131_v0 }
 0x6f3   : > { %4250 = vmatpush1.msra.mxu0 %v4130_v2 }
 0x6f4   : > { %4251 = vmatprep.subr.mxu0 %v4127_v4  ;;  %v5142_v4 = vld [vmem:[%s1095_s26] ss:$0 sm:$0xff] }
 0x6f5   : > { %4252 = vmatpush1.msra.mxu0 %v4126_v40  ;;  %v5143_v40 = vld [vmem:[%s1098_s12] ss:$0 sm:$0xff] }
 0x6f6   : > { %4253 = vmatprep.subr.mxu0 %v4123_v7 }
 0x6f7   : > { %4254 = vmatpush1.msra.mxu0 %v4122_v11  ;;  %v4391_v11 = vld [vmem:[%s6599_s0 + $0x78] sm:$0xff] }
 0x6f8   : > { %4255 = vmatprep.subr.mxu0 %v4119_v9  ;;  %v4406_v9 = vld [vmem:[%s6599_s0 + $0xf0] sm:$0xff] }
 0x6f9   : > { %4256 = vmatpush1.msra.mxu0 %v4118_v24  ;;  %v4422_v24 = vld [vmem:[%s6599_s0 + $0x170] sm:$0xff] }
 0x6fa   : > { %4257 = vmatprep.subr.mxu0 %v4115_v28  ;;  %v4437_v28 = vld [vmem:[%s6599_s0 + $0x1e8] sm:$0xff] }
 0x6fb   : > { %4258 = vmatpush1.msra.mxu0 %v4114_v22  ;;  %v4421_v22 = vld [vmem:[%s6599_s0 + $0x168] sm:$0xff] }
 0x6fc   : > { %4259 = vmatprep.subr.mxu0 %v4111_v30  ;;  %v4436_v30 = vld [vmem:[%s6599_s0 + $0x1e0] sm:$0xff] }
 0x6fd   : > { %4260 = vmatpush1.msra.mxu0 %v4110_v34  ;;  %v4420_v34 = vld [vmem:[%s6599_s0 + $0x160] sm:$0xff] }
 0x6fe   : > { %4261 = vmatprep.subr.mxu0 %v4107_v20  ;;  %v4435_v20 = vld [vmem:[%s6599_s0 + $0x1d8] sm:$0xff] }
 0x6ff   : > { %4262 = vmatpush1.msra.mxu0 %v4106_v17  ;;  %v4419_v17 = vld [vmem:[%s6599_s0 + $0x158] sm:$0xff] }
 0x700   : > { %4263 = vmatprep.subr.mxu0 %v4103_v59  ;;  %v4434_v59 = vld [vmem:[%s6599_s0 + $0x1d0] sm:$0xff] }
 0x701   : > { %4264 = vmatpush1.msra.mxu0 %v4102_v26  ;;  %v4418_v26 = vld [vmem:[%s6599_s0 + $0x150] sm:$0xff] }
 0x7ac   : > { %v5573_v38 = vpop.f32.mrf.mxu0 }
 0x7ad   : > { %v4030_v39 = vadd.f32 %v5784_v16, %v5573_v38  ;;  %v4097_v38 = vld [vmem:[%s6546_s2 + $0x88] sm:$0xff]  ;;  %v4096_v16 = vld [vmem:[%s6546_s2 + $0x80] sm:$0xff] }
 0x7ae   : > { %v4020_v41 = vpop.f32.mrf.mxu0  ;;  %4188 = vmatprep.subr.mxu1 %v4097_v38  ;;  %v4401_v38 = vld [vmem:[%s6599_s0 + $0xc8] sm:$0xff] }
 0x7af   : > { %v7097_v42 = vadd.f32 %v5141_v14, %v4030_v39  ;;  %v4029_v43 = vadd.f32 %v5785_v10, %v4020_v41  ;;  %v4098_v39 = vld [vmem:[%s6546_s2 + $0x90] sm:$0xff]  ;;  %v4093_v41 = vld [vmem:[%s6546_s2 + $0x68] sm:$0xff]  ;;  %v4095_v10 = vld [vmem:[%s6546_s2 + $0x78] sm:$0xff]  ;;  %4189 = vmatpush1.msra.mxu1 %v4096_v16 }
 0x7b0   : > { %4190 = vmatprep.subr.mxu1 %v4093_v41  ;;  %v4385_v16 = vld [vmem:[%s6599_s0 + $0x48] sm:$0xff]  ;;  %v4400_v41 = vld [vmem:[%s6599_s0 + $0xc0] sm:$0xff] }
 0x7b1   : > { %v7099_v44 = vadd.f32 %v5141_v14, %v4029_v43  ;;  %4044 = vadd.xlane.f32.xlu1 %v7097_v42  ;;  %v4099_v14 = vld [vmem:[%s6546_s2 + $0x98] sm:$0xff]  ;;  %v4092_v43 = vld [vmem:[%s6546_s2 + $0x60] sm:$0xff] }
 0x7b2   : > { %4265 = vmatprep.subr.mxu0 %v4099_v14  ;;  %4191 = vmatpush1.msra.mxu1 %v4092_v43  ;;  %v4433_v14 = vld [vmem:[%s6599_s0 + $0x1c8] sm:$0xff]  ;;  %v4384_v43 = vld [vmem:[%s6599_s0 + $0x40] sm:$0xff] }
 0x7b3   : > { %4042 = vadd.xlane.f32.xlu0 %v7099_v44  ;;  %4266 = vmatpush1.msra.mxu0 %v4098_v39  ;;  %v4417_v39 = vld [vmem:[%s6599_s0 + $0x148] sm:$0xff] }
 0x7b4   : > { %4267 = vmatprep.subr.mxu0 %v4095_v10  ;;  %4192 = vmatprep.subr.mxu1 %v4089_v45  ;;  %v4432_v10 = vld [vmem:[%s6599_s0 + $0x1c0] sm:$0xff]  ;;  %v4399_v45 = vld [vmem:[%s6599_s0 + $0xb8] sm:$0xff] }
 0x7b5   : > { %4268 = vmatpush1.msra.mxu0 %v4094_v29  ;;  %4193 = vmatpush1.msra.mxu1 %v4088_v15  ;;  %v4416_v29 = vld [vmem:[%s6599_s0 + $0x140] sm:$0xff]  ;;  %v4383_v15 = vld [vmem:[%s6599_s0 + $0x38] sm:$0xff] }
 0x7b6   : > { %4269 = vmatprep.subr.mxu0 %v4091_v18  ;;  %4194 = vmatprep.subr.mxu1 %v4085_v48  ;;  %v4431_v18 = vld [vmem:[%s6599_s0 + $0x1b8] sm:$0xff]  ;;  %v4398_v48 = vld [vmem:[%s6599_s0 + $0xb0] sm:$0xff] }
 0x7b7   : > { %4270 = vmatpush1.msra.mxu0 %v4090_v46  ;;  %4195 = vmatpush1.msra.mxu1 %v4084_v27  ;;  %v4415_v46 = vld [vmem:[%s6599_s0 + $0x138] sm:$0xff]  ;;  %v4382_v27 = vld [vmem:[%s6599_s0 + $0x30] sm:$0xff] }
 0x7b8   : > { %4271 = vmatprep.subr.mxu0 %v4087_v25  ;;  %4196 = vmatprep.subr.mxu1 %v4081_v51  ;;  %v4430_v25 = vld [vmem:[%s6599_s0 + $0x1b0] sm:$0xff]  ;;  %v4397_v51 = vld [vmem:[%s6599_s0 + $0xa8] sm:$0xff] }
 0x7b9   : > { %4272 = vmatpush1.msra.mxu0 %v4086_v50  ;;  %4197 = vmatpush1.msra.mxu1 %v4080_v53  ;;  %v4414_v50 = vld [vmem:[%s6599_s0 + $0x130] sm:$0xff]  ;;  %v4381_v53 = vld [vmem:[%s6599_s0 + $0x28] sm:$0xff] }
 0x7ba   : > { %4273 = vmatprep.subr.mxu0 %v4083_v52  ;;  %v4429_v52 = vld [vmem:[%s6599_s0 + $0x1a8] sm:$0xff] }
 0x83a   : > { %v4045_v54 = vpop.xlane.xlu1 %4044 }
 0x83b   : > { %v4047_v56 = vmul.f32 0.0078125, %v4045_v54  ;;  %v4082_v54 = vld [vmem:[%s6546_s2 + $0x10] sm:$0xff] }
 0x83c   : > { %v4043_v31 = vpop.xlane.xlu0 %4042  ;;  %4274 = vmatpush1.msra.mxu0 %v4082_v54  ;;  %v4413_v54 = vld [vmem:[%s6599_s0 + $0x128] sm:$0xff] }
 0x83d   : > { %v7116_v57 = vsub.f32 %v7097_v42, %v4047_v56  ;;  %v4046_v58 = vmul.f32 0.0078125, %v4043_v31  ;;  %5316 = vmatprep.subr.mxu0 %v4439_v8  ;;  %v4424_v8 = vld [vmem:[%s6599_s0 + $0x180] sm:$0xff] }
 0x83f   : > { %v7119_v60 = vsub.f32 %v7099_v44, %v4046_v58  ;;  %v4051_v61 = vmul.f32 %v7116_v57, %v7116_v57 }
 0x841   : > { %4054 = vadd.xlane.f32.xlu0 %v4051_v61  ;;  %v4050_v62 = vmul.f32 %v7119_v60, %v7119_v60 }
 0x843   : > { %4052 = vadd.xlane.f32.xlu1 %v4050_v62 }
 0x8ca   : > { %v4055_v56 = vpop.xlane.xlu0 %4054 }
 0x8cb   : > { %v4057_v31 = vmul.f32 0.0078125, %v4055_v56  ;;  %v4396_v56 = vld [vmem:[%s6599_s0 + $0xa0] sm:$0xff] }
 0x8cc   : > { %v4053_v58 = vpop.xlane.xlu1 %4052 }
 0x8cd   : > { %v4059_v61 = vadd.f32 1e-05, %v4057_v31  ;;  %v4056_v62 = vmul.f32 0.0078125, %v4053_v58  ;;  %v4428_v31 = vld [vmem:[%s6599_s0 + $0x1a0] sm:$0xff] }
 0x8ce   : > { %v4380_v58 = vld [vmem:[%s6599_s0 + $0x20] sm:$0xff] }
 0x8cf   : > { %5748 = vrsqrt.f32 %v4059_v61  ;;  %v4058_v63 = vadd.f32 1e-05, %v4056_v62  ;;  %v4412_v61 = vld [vmem:[%s6599_s0 + $0x120] sm:$0xff]  ;;  %v4395_v62 = vld [vmem:[%s6599_s0 + $0x98] sm:$0xff] }
 0x8d1   : > { %5750 = vrsqrt.f32 %v4058_v63  ;;  %v4427_v63 = vld [vmem:[%s6599_s0 + $0x198] sm:$0xff] }
 0x8dc   : > { %v5749_v0 = vpop.eup %5748 }
 0x8dd   : > { %v4063_v3 = vmul.f32 %v5749_v0, %v7116_v57  ;;  %v4379_v0 = vld [vmem:[%s6599_s0 + $0x18] sm:$0xff] }
 0x8de   : > { %v5751_v1 = vpop.eup %5750 }
 0x8df   : > { %v4062_v2 = vmul.f32 %v5751_v1, %v7119_v60  ;;  %v4071_v7 = vmul.f32 %v5142_v4, %v4063_v3  ;;  %v4407_v60 = vld [vmem:[%s6599_s0 + $0xf8] sm:$0xff]  ;;  %v4426_v3 = vld [vmem:[%s6599_s0 + $0x190] sm:$0xff] }
 0x8e0   : > { %5278 = vmatprep.subr.mxu1 %v4407_v60  ;;  %v4411_v1 = vld [vmem:[%s6599_s0 + $0x118] sm:$0xff]  ;;  %v4392_v60 = vld [vmem:[%s6599_s0 + $0x80] sm:$0xff] }
 0x8e1   : > { %v4070_v5 = vmul.f32 %v5142_v4, %v4062_v2  ;;  %v4079_v57 = vadd.f32 %v5143_v40, %v4071_v7  ;;  %v4394_v2 = vld [vmem:[%s6599_s0 + $0x90] sm:$0xff]  ;;  %v4377_v7 = vld [vmem:[%s6599_s0 + $0x8] sm:$0xff] }
 0x8e2   : > { %v4378_v4 = vld [vmem:[%s6599_s0 + $0x10] sm:$0xff] }
 0x8e3   : > { %v4078_v6 = vadd.f32 %v5143_v40, %v4070_v5  ;;  %v4410_v5 = vld [vmem:[%s6599_s0 + $0x110] sm:$0xff]  ;;  %v4393_v40 = vld [vmem:[%s6599_s0 + $0x88] sm:$0xff] }
 0x8e5   : > { %4231 = vmatmul.mubr.f32.vlgmr.msra.gmra.mxu1 %v4078_v6  ;;  %4308 = vmatmul.mubr.f32.vlgmr.msra.gmra.mxu0 %v4078_v6  ;;  %v4425_v6 = vld [vmem:[%s6599_s0 + $0x188] sm:$0xff] }
 0x8e6   : > { %4236 = vmatprep.mubr.f32.mxu1 %v6146_v23  ;;  %4313 = vmatprep.mubr.f32.mxu0 %v6146_v23  ;;  %v4438_v23 = vld [vmem:[%s6599_s0 + $0x1f0] sm:$0xff] }
 0x8e7   : > { %5279 = vmatpush3.msra.mxu1 %v4391_v11  ;;  %5317 = vmatpush3.msra.mxu0 %v4423_v12  ;;  %v4376_v11 = vld [vmem:[%s6599_s0] sm:$0xff] }
 0x8e8   : > { %5280 = vmatprep.subr.mxu1 %v4406_v9  ;;  %5318 = vmatprep.subr.mxu0 %v4438_v23  ;;  %v4408_v12 = vld [vmem:[%s6599_s0 + $0x100] sm:$0xff]  ;;  %v4156_v9 = vsub.s32 2, %v6732_v36  ;;  %v4144_v23 = vld [vmem:[%s6597_s4] sm:$0xf] }
 0x8e9   : > { %4237 = vmatmul.mubr.f32.gmra.mxu1 %v4079_v57  ;;  %4314 = vmatmul.mubr.f32.gmra.mxu0 %v4079_v57  ;;  %v4409_v57 = vld [vmem:[%s6599_s0 + $0x108] sm:$0xff]  ;;  %s7510_s0 = sld [smem:[#allocation52_spill]] (!%p5153_p11) }
 0x8ea   : > { %5281 = vmatpush3.msra.mxu1 %v4390_v47  ;;  %5319 = vmatpush3.msra.mxu0 %v4422_v24  ;;  %v4152_v47 = vsub.s32 1, %v6732_v36  ;;  %v4160_v24 = vsub.s32 3, %v6732_v36 }
 0x8eb   : > { %5282 = vmatprep.subr.mxu1 %v4405_v13  ;;  %5320 = vmatprep.subr.mxu0 %v4437_v28  ;;  %v4149_v13 = vrot.slane %v4144_v23, %v6874_v19  ;;  %v4157_v28 = vrot.slane %v4144_v23, %v4156_v9 }
 0x8ec   : > { %5283 = vmatpush3.msra.mxu1 %v4389_v32  ;;  %5321 = vmatpush3.msra.mxu0 %v4421_v22  ;;  %v4153_v32 = vrot.slane %v4144_v23, %v4152_v47  ;;  %v4161_v22 = vrot.slane %v4144_v23, %v4160_v24 }
 0x8ed   : > { %5284 = vmatprep.subr.mxu1 %v4404_v49  ;;  %5322 = vmatprep.subr.mxu0 %v4436_v30 }
 0x8ee   : > { %5285 = vmatpush3.msra.mxu1 %v4388_v33  ;;  %5323 = vmatpush3.msra.mxu0 %v4420_v34 }
 0x8ef   : > { %5286 = vmatprep.subr.mxu1 %v4403_v55  ;;  %5324 = vmatprep.subr.mxu0 %v4435_v20 }
 0x8f0   : > { %5287 = vmatpush3.msra.mxu1 %v4387_v35  ;;  %5325 = vmatpush3.msra.mxu0 %v4419_v17 }
 0x8f1   : > { %5288 = vmatprep.subr.mxu1 %v4402_v21  ;;  %5326 = vmatprep.subr.mxu0 %v4434_v59 }
 0x8f2   : > { %5289 = vmatpush3.msra.mxu1 %v4386_v37  ;;  %5327 = vmatpush3.msra.mxu0 %v4418_v26 }
 0x8f3   : > { %5290 = vmatprep.subr.mxu1 %v4401_v38  ;;  %5328 = vmatprep.subr.mxu0 %v4433_v14 }
 0x8f4   : > { %5291 = vmatpush3.msra.mxu1 %v4385_v16  ;;  %5329 = vmatpush3.msra.mxu0 %v4417_v39 }
 0x8f5   : > { %5292 = vmatprep.subr.mxu1 %v4400_v41  ;;  %5330 = vmatprep.subr.mxu0 %v4432_v10 }
 0x8f6   : > { %5293 = vmatpush3.msra.mxu1 %v4384_v43  ;;  %5331 = vmatpush3.msra.mxu0 %v4416_v29 }
 0x8f7   : > { %5294 = vmatprep.subr.mxu1 %v4399_v45  ;;  %5332 = vmatprep.subr.mxu0 %v4431_v18 }
 0x8f8   : > { %5295 = vmatpush3.msra.mxu1 %v4383_v15  ;;  %5333 = vmatpush3.msra.mxu0 %v4415_v46 }
 0x8f9   : > { %5296 = vmatprep.subr.mxu1 %v4398_v48  ;;  %5334 = vmatprep.subr.mxu0 %v4430_v25 }
 0x8fa   : > { %5297 = vmatpush3.msra.mxu1 %v4382_v27  ;;  %5335 = vmatpush3.msra.mxu0 %v4414_v50 }
 0x8fb   : > { %5298 = vmatprep.subr.mxu1 %v4397_v51  ;;  %5336 = vmatprep.subr.mxu0 %v4429_v52 }
 0x8fc   : > { %5299 = vmatpush3.msra.mxu1 %v4381_v53  ;;  %5337 = vmatpush3.msra.mxu0 %v4413_v54 }
 0x8fd   : > { %5300 = vmatprep.subr.mxu1 %v4396_v56  ;;  %5338 = vmatprep.subr.mxu0 %v4428_v31 }
 0x8fe   : > { %5301 = vmatpush3.msra.mxu1 %v4380_v58  ;;  %5339 = vmatpush3.msra.mxu0 %v4412_v61 }
 0x8ff   : > { %5302 = vmatprep.subr.mxu1 %v4395_v62  ;;  %5340 = vmatprep.subr.mxu0 %v4427_v63 }
 0x900   : > { %5303 = vmatpush3.msra.mxu1 %v4379_v0  ;;  %5341 = vmatpush3.msra.mxu0 %v4411_v1 }
 0x901   : > { %5304 = vmatprep.subr.mxu1 %v4394_v2  ;;  %5342 = vmatprep.subr.mxu0 %v4426_v3 }
 0x902   : > { %5305 = vmatpush3.msra.mxu1 %v4378_v4  ;;  %5343 = vmatpush3.msra.mxu0 %v4410_v5 }
 0x903   : > { %5306 = vmatprep.subr.mxu1 %v4393_v40  ;;  %5344 = vmatprep.subr.mxu0 %v4425_v6 }
 0x904   : > { %5307 = vmatpush3.msra.mxu1 %v4377_v7  ;;  %5345 = vmatpush3.msra.mxu0 %v4409_v57 }
 0x905   : > { %5308 = vmatprep.subr.mxu1 %v4392_v60  ;;  %5346 = vmatprep.subr.mxu0 %v4424_v8 }
 0x906   : > { %5309 = vmatpush3.msra.mxu1 %v4376_v11  ;;  %5347 = vmatpush3.msra.mxu0 %v4408_v12 }
 0x9a5   : > { %v4232_v49 = vpop.f32.mrf.mxu1  ;;  %v4309_v30 = vpop.f32.mrf.mxu0 }
 0x9a6   : > { %v4233_v33 = vadd.f32 %v4232_v49, %v4149_v13  ;;  %v4310_v34 = vadd.f32 %v4309_v30, %v4157_v28 }
 0x9a7   : > { %v4234_v55 = vpop.f32.mrf.mxu1  ;;  %v4311_v20 = vpop.f32.mrf.mxu0 }
 0x9a8   : > { %v5144_v35 = vmul.f32 -1.442695, %v4233_v33  ;;  %v5146_v17 = vmul.f32 -1.442695, %v4310_v34  ;;  %v4235_v21 = vadd.f32 %v4234_v55, %v4153_v32  ;;  %v4312_v59 = vadd.f32 %v4311_v20, %v4161_v22  ;;  %v5152_v55 = vld [vmem:[%s1105_s14] ss:$0 sm:$0xff] }
 0x9a9   : > { %v4238_v37 = vpop.f32.mrf.mxu1  ;;  %v4315_v26 = vpop.f32.mrf.mxu0 }
 0x9aa   : > { %5752 = vpow2.f32 %v5144_v35  ;;  %v5145_v38 = vmul.f32 -1.442695, %v4235_v21  ;;  %v5147_v36 = vmul.f32 -1.442695, %v4312_v59  ;;  %v4239_v14 = vadd.f32 %v4238_v37, %v4149_v13 }
 0x9ab   : > { %5754 = vpow2.f32 %v5146_v17  ;;  %v4316_v19 = vadd.f32 %v4315_v26, %v4157_v28  ;;  %v4240_v16 = vpop.f32.mrf.mxu1  ;;  %v4317_v39 = vpop.f32.mrf.mxu0 }
 0x9ac   : > { %5756 = vpow2.f32 %v5145_v38  ;;  %v5148_v41 = vmul.f32 -1.442695, %v4239_v14  ;;  %v4241_v10 = vadd.f32 %v4240_v16, %v4153_v32  ;;  %v4318_v43 = vadd.f32 %v4317_v39, %v4161_v22 }
 0x9ad   : > { %5758 = vpow2.f32 %v5147_v36  ;;  %v5150_v29 = vmul.f32 -1.442695, %v4316_v19 }
 0x9ae   : > { %5760 = vpow2.f32 %v5148_v41  ;;  %v5149_v45 = vmul.f32 -1.442695, %v4241_v10  ;;  %v5151_v18 = vmul.f32 -1.442695, %v4318_v43 }
 0x9af   : > { %5762 = vpow2.f32 %v5150_v29 }
 0x9b0   : > { %5764 = vpow2.f32 %v5149_v45 }
 0x9b1   : > { %5766 = vpow2.f32 %v5151_v18 }
 0x9b7   : > { %v5753_v15 = vpop.eup %5752 }
 0x9b8   : > { %v5755_v46 = vpop.eup %5754  ;;  %v4344_v48 = vadd.f32 1.0, %v5753_v15 }
 0x9b9   : > { %v5757_v25 = vpop.eup %5756  ;;  %v4346_v27 = vadd.f32 1.0, %v5755_v46 }
 0x9ba   : > { %v5759_v50 = vpop.eup %5758  ;;  %5768 = vrcp.f32 %v4344_v48  ;;  %v4345_v51 = vadd.f32 1.0, %v5757_v25 }
 0x9bb   : > { %v5761_v52 = vpop.eup %5760  ;;  %5770 = vrcp.f32 %v4346_v27  ;;  %v4347_v53 = vadd.f32 1.0, %v5759_v50 }
 0x9bc   : > { %v5763_v54 = vpop.eup %5762  ;;  %5772 = vrcp.f32 %v4345_v51  ;;  %v4348_v56 = vadd.f32 1.0, %v5761_v52 }
 0x9bd   : > { %v5765_v31 = vpop.eup %5764  ;;  %5774 = vrcp.f32 %v4347_v53  ;;  %v4350_v58 = vadd.f32 1.0, %v5763_v54 }
 0x9be   : > { %v5767_v61 = vpop.eup %5766  ;;  %5776 = vrcp.f32 %v4348_v56  ;;  %v4349_v62 = vadd.f32 1.0, %v5765_v31 }
 0x9bf   : > { %5778 = vrcp.f32 %v4350_v58  ;;  %v4351_v63 = vadd.f32 1.0, %v5767_v61 }
 0x9c0   : > { %5780 = vrcp.f32 %v4349_v62 }
 0x9c1   : > { %5782 = vrcp.f32 %v4351_v63 }
 0x9c7   : > { %v5769_v0 = vpop.eup %5768 }
 0x9c8   : > { %v5771_v1 = vpop.eup %5770  ;;  %v4368_v40 = vmul.f32 %v5769_v0, %v4233_v33 }
 0x9c9   : > { %v5773_v2 = vpop.eup %5772  ;;  %v4370_v57 = vmul.f32 %v5771_v1, %v4310_v34 }
 0x9ca   : > { %v5775_v3 = vpop.eup %5774  ;;  %v4369_v4 = vmul.f32 %v5773_v2, %v4235_v21 }
 0x9cb   : > { %v5777_v5 = vpop.eup %5776  ;;  %v4371_v6 = vmul.f32 %v5775_v3, %v4312_v59 }
 0x9cc   : > { %v5779_v7 = vpop.eup %5778  ;;  %4504 = vmatprep.mubr.f32.mxu1 %v4369_v4  ;;  %v4372_v12 = vmul.f32 %v5777_v5, %v4239_v14 }
 0x9cd   : > { %v5781_v60 = vpop.eup %5780  ;;  %4579 = vmatprep.mubr.f32.mxu0 %v4371_v6  ;;  %4505 = vmatmul.mubr.f32.vlgmr.msra.gmra.mxu1 %v4368_v40  ;;  %v4374_v23 = vmul.f32 %v5779_v7, %v4316_v19 }
 0x9ce   : > { %v5783_v8 = vpop.eup %5782  ;;  %v4373_v11 = vmul.f32 %v5781_v60, %v4241_v10  ;;  %4580 = vmatmul.mubr.f32.vlgmr.msra.gmra.mxu0 %v4370_v57 }
 0x9cf   : > { %v4375_v9 = vmul.f32 %v5783_v8, %v4318_v43 }
 0x9d0   : > { %4509 = vmatprep.mubr.f32.mxu1 %v4373_v11 }
 0x9d1   : > { %4584 = vmatprep.mubr.f32.mxu0 %v4375_v9  ;;  %4510 = vmatmul.mubr.f32.gmra.mxu1 %v4372_v12 }
 0x9d2   : > { %4585 = vmatmul.mubr.f32.gmra.mxu0 %v4374_v23 }
 0xa8d   : > { %v5310_v47 = vpop.f32.mrf.mxu1 }
 0xa8e   : > { %v5348_v24 = vpop.f32.mrf.mxu0 }
 0xa8f   : > { %v5311_v13 = vpop.f32.mrf.mxu1 }
 0xa90   : > { %v5312_v28 = vadd.f32 %v5311_v13, %v5310_v47  ;;  %v5349_v32 = vpop.f32.mrf.mxu0 }
 0xa91   : > { %v5350_v22 = vadd.f32 %v5349_v32, %v5348_v24  ;;  %v5313_v49 = vpop.f32.mrf.mxu1 }
 0xa92   : > { %v5351_v30 = vpop.f32.mrf.mxu0 }
 0xa93   : > { %v4582_v33 = vadd.f32 %v5350_v22, %v5312_v28  ;;  %v5314_v34 = vpop.f32.mrf.mxu1 }
 0xa94   : > { %v5315_v20 = vadd.f32 %v5314_v34, %v5313_v49  ;;  %v5352_v35 = vpop.f32.mrf.mxu0 }
 0xa95   : > { %v4590_v17 = vadd.f32 %v4582_v33, %v7099_v44  ;;  %v5353_v21 = vadd.f32 %v5352_v35, %v5351_v30 }
 0xa97   : > { %v4599_v59 = vadd.f32 %v5152_v55, %v4590_v17  ;;  %v4587_v37 = vadd.f32 %v5353_v21, %v5315_v20 }
 0xa99   : > { %4601 = vst [vmem:[#allocation14] sm:$0xff] %v4599_v59  ;;  %v4591_v26 = vadd.f32 %v4587_v37, %v7097_v42  ;;  %4606 = sbr.rel (%p5153_p11) target bundleno = 3029 (0xbd5), region = 136 }
 0xa9b   : > { %v4600_v38 = vadd.f32 %v5152_v55, %v4591_v26 }
 0xa9d   : > { %4602 = vst [vmem:[#allocation14 + $0x8] sm:$0xff] %v4600_v38 }
 0xa9e   : > { %4609 = vadd.xlane.f32.xlu0 %v4599_v59  ;;  %v5154_v48 = vld [vmem:[%s7510_s0] ss:$0 sm:$0xff] }
 0xa9f   : > { %v5155_v27 = vld [vmem:[%s7511_s1] ss:$0 sm:$0xff] }
 0xaa2   : > { %4611 = vadd.xlane.f32.xlu0 %v4600_v38 }
 0xb27   : > { %v4610_v36 = vpop.xlane.xlu0 %4609 }
 0xb28   : > { %v4613_v14 = vmul.f32 0.0078125, %v4610_v36 }
 0xb2a   : > { %v4615_v19 = vsub.f32 %v4599_v59, %v4613_v14 }
 0xb2b   : > { %v4612_v16 = vpop.xlane.xlu0 %4611 }
 0xb2c   : > { %v4614_v39 = vmul.f32 0.0078125, %v4612_v16  ;;  %v4617_v41 = vmul.f32 %v4615_v19, %v4615_v19 }
 0xb2e   : > { %v4616_v44 = vsub.f32 %v4600_v38, %v4614_v39  ;;  %4619 = vadd.xlane.f32.xlu1 %v4617_v41 }
 0xb30   : > { %v4618_v10 = vmul.f32 %v4616_v44, %v4616_v44 }
 0xb32   : > { %4621 = vadd.xlane.f32.xlu1 %v4618_v10 }
 0xbb7   : > { %v4620_v43 = vpop.xlane.xlu1 %4619 }
 0xbb8   : > { %v4623_v29 = vmul.f32 0.0078125, %v4620_v43 }
 0xbba   : > { %v4625_v42 = vadd.f32 1e-05, %v4623_v29 }
 0xbbb   : > { %v4622_v45 = vpop.xlane.xlu1 %4621 }
 0xbbc   : > { %5786 = vrsqrt.f32 %v4625_v42  ;;  %v4624_v18 = vmul.f32 0.0078125, %v4622_v45 }
 0xbbe   : > { %v4626_v15 = vadd.f32 1e-05, %v4624_v18 }
 0xbc0   : > { %5788 = vrsqrt.f32 %v4626_v15 }
 0xbc9   : > { %v5787_v46 = vpop.eup %5786 }
 0xbca   : > { %v4629_v25 = vmul.f32 %v5787_v46, %v4615_v19 }
 0xbcc   : > { %v4637_v50 = vmul.f32 %v5154_v48, %v4629_v25 }
 0xbcd   : > { %v5789_v51 = vpop.eup %5788 }
 0xbce   : > { %v4645_v52 = vadd.f32 %v5155_v27, %v4637_v50  ;;  %v4630_v53 = vmul.f32 %v5789_v51, %v4616_v44 }
 0xbd0   : > { %4647 = vst [vmem:[#allocation14] sm:$0xff] %v4645_v52  ;;  %v4638_v54 = vmul.f32 %v5154_v48, %v4630_v53 }
 0xbd2   : > { %v4646_v56 = vadd.f32 %v5155_v27, %v4638_v54 }
 0xbd4   : > { %4648 = vst [vmem:[#allocation14 + $0x8] sm:$0xff] %v4646_v56 }
 0xbd5 PF: > { %s7512_s28 = sld [smem:[#allocation33_spill]]  ;;  %s5172_s17 = sshll.u32 %s6122_s30, 8 }
 0xbd6   : > { %s7513_s16 = sld [smem:[#allocation31_spill]]  ;;  %s4686_s18 = sshll.u32 %s6601_s19, 4  ;;  %s7281_s18 = int_to_ptr.vmem [resolvable:$true] %s4686_s18 }
 0xbd7   : > { %s7514_s3 = sld [smem:[#allocation55_spill]]  ;;  %s5984_s27 = scalar_lea.vmem %s7281_s18, 256 }
 0xbd8   : > { %s7516_s7 = sld [smem:[#allocation56_spill]]  ;;  %p5985_p2 = scmp.ne.s32.totalorder %s7281_s18, %s5984_s27 }
 0xbd9   : > { %s6150_s30 = smov [#allocation15]  }
 0xbda   : > { %s5988_s6 = sshll.u32 %s6150_s30, 4  ;;  %s5989_s6 = int_to_ptr.vmem [resolvable:$false] %s5988_s6 }
 0xbdb   : > { %s4650_s13 = scalar_lea.sflag [#allocation16], %s7512_s28  ;;  %s5990_s19 = scalar_lea.vmem %s5989_s6, 512 }
 0xbdc   : > { %p7517_p9 = scmp.ne.s32.totalorder %s7513_s16, 0  ;;  %p5991_p1 = scmp.lt.s32.totalorder %s7281_s18, %s5989_s6 }
 0xbdd   : > { %s7515_s8 = smov %s7514_s3  ;;  %s7278_s15 = scalar_lea.hbm %s7514_s3, %s5172_s17 }
 0xbde   : > { %s7286_s2 = scalar_lea.hbm %s7516_s7, %s5172_s17  ;;  %p5986_p13 = pnand %p5985_p2, %p7517_p9 }
 0xbdf   : > { %p5992_p6 = scmp.lt.s32.totalorder %s5990_s19, %s5984_s27 }
 0xbe0   : > { %p5987_p0 = pneg %p5986_p13 }
 0xbe1   : > { %p5993_p4 = por %p5992_p6, %p5991_p1 }
 0xbe3   : > { %p5994_p12 = pnand %p5993_p4, %p5987_p0 }
 0xbe5   : > { %5997 = shalt.err (!%p5994_p12)
}
 0xbe6   : > { %s5998_s23 = scalar_lea.hbm %s7278_s15, 256  ;;  %s6002_s12 = scalar_lea.hbm %s7515_s8, 512 }
 0xbe7   : > { %p5999_p3 = scmp.ne.s32.totalorder %s7278_s15, %s5998_s23  ;;  %p6003_p7 = scmp.lt.s32.totalorder %s7278_s15, %s7515_s8 }
 0xbe8   : > { %p6004_p8 = scmp.lt.s32.totalorder %s6002_s12, %s5998_s23 }
 0xbe9   : > { %p6000_p5 = pnand %p5999_p3, %p7517_p9 }
 0xbea   : > { %p6005_p11 = por %p6004_p8, %p6003_p7 }
 0xbeb   : > { %p6001_p10 = pneg %p6000_p5 }
 0xbed   : > { %p6006_p2 = pnand %p6005_p11, %p6001_p10 }
 0xbef   : > { %6009 = shalt.err (!%p6006_p2)
}
 0xbf0   : > { %s6151_s14 = smov 128   ;;  %s7518_s0 = sld [smem:[#allocation30_spill]] }
 0xbf1   : > { %s6152_s24 = smov 8   ;;  %s6153_s29 = smov [#allocation14]  }
 0xbf2   : > { %5592 = dma.vmem_to_hbm [thread:$0]  (%p7517_p9), %s7281_s18, 256, %s7278_s15, %s4650_s13, %s6151_s14, %s6151_s14, %s6152_s24  }
 0xbf3   : > { %s4668_s1 = sshll.u32 %s6153_s29, 4  ;;  %s4704_s17 = sshll.u32 %s6603_s22, 4  ;;  %s4669_s1 = int_to_ptr.vmem [resolvable:$true] %s4668_s1  ;;  %s7315_s17 = int_to_ptr.vmem [resolvable:$true] %s4704_s17 }
 0xbf4   : > { %s6010_s20 = scalar_lea.vmem %s4669_s1, 256  ;;  %p6017_p4 = scmp.lt.s32.totalorder %s4669_s1, %s4669_s1 }
 0xbf5   : > { %p6011_p13 = scmp.ne.s32.totalorder %s4669_s1, %s6010_s20  ;;  %p6018_p12 = scmp.lt.s32.totalorder %s6010_s20, %s6010_s20 }
 0xbf6   : > { %p7519_p0 = scmp.eq.s32.totalorder %s7518_s0, 1 }
 0xbf7   : > { %p6019_p3 = por %p6018_p12, %p6017_p4 }
 0xbf8   : > { %p6012_p1 = pnand %p6011_p13, %p7519_p0 }
 0xbfa   : > { %p6013_p6 = pneg %p6012_p1 }
 0xbfc   : > { %p6020_p5 = pnand %p6019_p3, %p6013_p6 }
 0xbfe   : > { %6023 = shalt.err (!%p6020_p5)
}
 0xbff   : > { %p7520_p10 = pmov %p7519_p0  ;;  %s7521_s3 = sld [smem:[#allocation54_spill]] }
 0xc00   : > { %s6034_s15 = scalar_lea.vmem %s7315_s17, 256  ;;  %s6154_s18 = smov [#allocation17]  }
 0xc01   : > { %p6035_p7 = scmp.ne.s32.totalorder %s7315_s17, %s6034_s15  ;;  %s6038_s5 = sshll.u32 %s6154_s18, 4  ;;  %s6039_s5 = int_to_ptr.vmem [resolvable:$false] %s6038_s5 }
 0xc02   : > { %s6040_s25 = scalar_lea.vmem %s6039_s5, 512  ;;  %p6041_p2 = scmp.lt.s32.totalorder %s7315_s17, %s6039_s5 }
 0xc03   : > { %p6036_p8 = pnand %p6035_p7, %p7517_p9  ;;  %p6042_p13 = scmp.lt.s32.totalorder %s6040_s25, %s6034_s15 }
 0xc05   : > { %5591 = dma.vmem_to_hbm [thread:$0]  (%p7520_p10), %s4669_s1, 256, %s7521_s3, [#allocation4], %s6151_s14, %s6151_s14, %s6152_s24  }
 0xc06   : > { %p6037_p11 = pneg %p6036_p8  ;;  %p6043_p0 = por %p6042_p13, %p6041_p2 }
 0xc08   : > { %p6044_p1 = pnand %p6043_p0, %p6037_p11 }
 0xc0a   : > { %6047 = shalt.err (!%p6044_p1)
}
 0xc0b   : > { %s6048_s27 = scalar_lea.hbm %s7286_s2, 256  ;;  %s6052_s19 = scalar_lea.hbm %s7516_s7, 512 }
 0xc0c   : > { %p6049_p6 = scmp.ne.s32.totalorder %s7286_s2, %s6048_s27  ;;  %p6053_p3 = scmp.lt.s32.totalorder %s7286_s2, %s7516_s7 }
 0xc0d   : > { %p6054_p5 = scmp.lt.s32.totalorder %s6052_s19, %s6048_s27 }
 0xc0e   : > { %p6050_p4 = pnand %p6049_p6, %p7517_p9 }
 0xc0f   : > { %p6055_p10 = por %p6054_p5, %p6053_p3 }
 0xc10   : > { %p6051_p12 = pneg %p6050_p4 }
 0xc12   : > { %p6056_p7 = pnand %p6055_p10, %p6051_p12 }
 0xc14   : > { %6059 = shalt.err (!%p6056_p7)
}
 0xc15   : > { %5593 = dma.vmem_to_hbm [thread:$0]  (%p7517_p9), %s7315_s17, 256, %s7286_s2, %s4650_s13, %s6151_s14, %s6151_s14, %s6152_s24  }
 0xc16   : > { %p7522_p8 = scmp.eq.s32.totalorder %s7518_s0, 1 }
 0xc18   : > { %6101 = dma.done.wait (%p7522_p8), [#allocation4], 256   ;;  %p7523_p11 = pmov %p7522_p8 }
 0xc1a   : > { %6103 = vsyncadd (%p7523_p11), [#allocation4], 4294967040 }
 0xc1b PF: > { %s7524_s26 = sld [smem:[#allocation27_spill]] }
 0xc1c   : > { %s7526_s4 = sld [smem:[#allocation32_spill]] }
 0xc21   : > { %s7525_s12 = sadd.s32 4294967294, %s7524_s26   ;;  %p7528_p13 = scmp.ge.s32.totalorder %s7524_s26, 2 }
 0xc22   : > { %s4723_s16 = sand.u32 1, %s7525_s12   ;;  %p7527_p2 = scmp.ne.s32.totalorder %s7526_s4, 0 }
 0xc23   : > { %s4724_s28 = scalar_lea.sflag [#allocation16], %s4723_s16 }
 0xc24   : > { %p5622_p0 = pnand %p7528_p13, %p7527_p2 }
 0xc26   : > { %p5623_p1 = pneg %p5622_p0 }
 0xc28   : > { %6105 = dma.done.wait (%p5623_p1), %s4724_s28, 512  }
 0xc29   : > { %6107 = vsyncadd (%p5623_p1), %s4724_s28, 4294966784  ;;  %s47_s0 = sadd.s32 1, %s7524_s26   ;;  %s7529_s3 = sld [smem:[#allocation24_spill]] }
 0xc2a   : > { %p44_p9 = scmp.ge.s32.totalorder %s47_s0, 4   ;;  %s7530_s28 = sld [smem:[#allocation25_spill]] }
 0xc2b   : > { %s7531_s29 = sld [smem:[#allocation29_spill]] }
 0xc2c   : > { %s7532_s30 = sld [smem:[#allocation26_spill]]  ;;  %46 = sbr.rel (!%p44_p9) target bundleno = 36 (0x24), region = 276 }
 0xc2d   : > { %s7533_s4 = sld [smem:[#allocation28_spill]] }
 0xc31   :  { %4738 = vsyncpa [#allocation3], 1 }
 0xc32   :  { %4740 = vsyncpa [#allocation3 + $0x1], 1 }
 0xc33   :  { %4741 = vsyncpa [#allocation6], 1 }
 0xc34   :  { %4743 = vsyncpa [#allocation6 + $0x1], 1 }
 0xc35   :  { %4744 = vsyncpa [#allocation9], 1 }
 0xc36   :  { %4746 = vsyncpa [#allocation9 + $0x1], 1 }
 0xc37   :  { %4747 = vsyncpa [#allocation12], 1 }
 0xc38   :  { %4749 = vsyncpa [#allocation12 + $0x1], 1 }
 0xc39   :  { %4750 = vsyncpa [#allocation4], 1 }
 0xc3a   :  { %4752 = vsyncpa [#allocation4 + $0x1], 1 }
 0xc3b   :  { %4753 = vsyncpa [#allocation16], 1 }
 0xc3c   :  { %4755 = vsyncpa [#allocation16 + $0x1], 1 }

</bundles_post_ra>
